<compile_context>
chip_gen: v7x
topology: tpu7x:2x2x1
jax: 0.10.0
libtpu: 0.0.40
codegen_flags: <defaults>
</compile_context>

<pallas_src>
import functools

import jax
import jax.numpy as jnp
from jax import lax
from jax.experimental import pallas as pl
from jax.experimental.pallas import tpu as pltpu

NEG_SLOPE = 0.05  # IMDN-style B.conv_block / activation('lrelu') default slope


# ------------------------------ fused Pallas kernel ------------------------------
def _make_crfn_kernel(H, W, nf, num_modules, k, c_tail, neg_slope, base, pad_len):
    HW = H * W
    bf16 = jnp.bfloat16
    f32 = jnp.float32

    def kernel(xp_ref, fea_w_ref, fea_b_ref, crf_w_ref, crf_b_ref,
               c_w_ref, c_b_ref, tail_w_ref, tail_b_ref, o_ref,
               pad_a, b_cat, fea_out):
        # Re-zero the padded-activation slab every image (16 KiB splat).  This keeps the
        # halo zero even when the "parallel" batch axis is sharded across TensorCores
        # (a program_id==0 gate would never execute on the second core).
        pad_a[...] = jnp.zeros_like(pad_a)

        # Column masks for the flattened-HW shift trick: a horizontal tap (dx-1 = -1/+1)
        # is a lane shift of the flattened buffer, which wraps across row boundaries; the
        # wrap is killed by zeroing output columns x==0 (left tap) / x==W-1 (right tap).
        col = lax.broadcasted_iota(jnp.int32, (nf, HW), 1) % W
        not_first_col = col != 0
        not_last_col = col != (W - 1)
        zeros_nf = jnp.zeros((nf, HW), bf16)

        def conv3x3(w2d, b_col, act, residual):
            # im2col: 9 lane-shifted windows of the channel-major padded buffer,
            # concatenated along the sublane (channel) axis -> ONE deep MXU contraction.
            wins = []
            for dy in range(3):
                for dx in range(3):
                    s = base + (dy - 1) * W + (dx - 1)
                    win = pad_a[:, s:s + HW]
                    if dx == 0:
                        win = jnp.where(not_first_col, win, zeros_nf)
                    elif dx == 2:
                        win = jnp.where(not_last_col, win, zeros_nf)
                    wins.append(win)
            patch = jnp.concatenate(wins, axis=0)                    # (9*nf, HW) bf16
            acc = jnp.dot(w2d, patch, preferred_element_type=f32)    # (cout, HW) f32
            acc = acc + b_col                                        # f32 epilogue
            if act:
                acc = jnp.maximum(acc, neg_slope * acc)              # LeakyReLU
            if residual is not None:
                acc = acc + residual
            return acc

        # ---- fea_conv: first-layer im2col arrives pre-built (x4 channel-cat folded in) ----
        fea = jnp.dot(fea_w_ref[...], xp_ref[...], preferred_element_type=f32)
        fea = fea + fea_b_ref[...]
        fea_out[...] = fea                                           # global residual (f32)
        cur = fea

        # ---- CRF modules (stand-in): k x (conv3x3 + lrelu); skip added after last act ----
        for i in range(num_modules):
            skip = cur
            for j in range(k):
                pad_a[:, base:base + HW] = cur.astype(bf16)          # aligned lane-dense store
                idx = i * k + j
                cur = conv3x3(crf_w_ref[idx], crf_b_ref[idx],
                              act=True, residual=skip if j == k - 1 else None)
            b_cat[i * nf:(i + 1) * nf, :] = cur.astype(bf16)         # module output -> concat

        # ---- 1x1 'c' conv over the channel concat, lrelu, + global residual ----
        acc = jnp.dot(c_w_ref[...], b_cat[...], preferred_element_type=f32) + c_b_ref[...]
        acc = jnp.maximum(acc, neg_slope * acc)
        out = acc + fea_out[...]

        # ---- tail: 3x3 conv -> out_nc*upscale**2 channels ((c_tail, HW) lane-dense store) --
        pad_a[:, base:base + HW] = out.astype(bf16)
        tail = conv3x3(tail_w_ref[...], tail_b_ref[...], act=False, residual=None)
        o_ref[...] = tail.astype(o_ref.dtype)

    return kernel


# --------------------------------- helpers & wrapper --------------------------------
def _im2col_nchw(x):
    """(N, C, H, W) -> (N, 9*C, H*W) patches, row order (dy*3+dx)*C + c."""
    N, C, H, W = x.shape
    xp = jnp.pad(x, ((0, 0), (0, 0), (1, 1), (1, 1)))
    cols = [xp[:, :, dy:dy + H, dx:dx + W].reshape(N, C, H * W)
            for dy in range(3) for dx in range(3)]
    return jnp.concatenate(cols, axis=1)


def _w2d(w_hwio):
    """HWIO (kh, kw, Cin, Cout) -> (Cout, kh*kw*Cin), contraction order (dy, dx, c)."""
    kh, kw, cin, cout = w_hwio.shape
    return w_hwio.reshape(kh * kw * cin, cout).T


def pixel_shuffle_nchw(x, r):
    """Matches torch.nn.PixelShuffle: out[n,c,h*r+i,w*r+j] = in[n, c*r*r + i*r + j, h, w]."""
    N, C, H, W = x.shape
    c = C // (r * r)
    x = x.reshape(N, c, r, r, H, W)
    x = jnp.transpose(x, (0, 1, 4, 2, 5, 3))
    return x.reshape(N, c, H * r, W * r)


def crfn_forward(params, x_nchw, *, num_modules, k, upscale, out_nc):
    N, in_nc, H, W = x_nchw.shape
    nf = params["fea"]["w"].shape[-1]
    c_tail = out_nc * upscale ** 2
    HW = H * W

    # Interior of the padded activation buffer starts on a lane-tile boundary (>= W+1 so the
    # top halo fits); total length covers the bottom halo, rounded up to 128 lanes.
    base = ((W + 1 + 127) // 128) * 128
    pad_len = ((base + HW + W + 1 + 127) // 128) * 128

    # Fold torch.cat([x,x,x,x], dim=1): conv(cat([x]*4)) == conv(x) with the four
    # input-channel replica slices of the fea weight summed.
    wf = params["fea"]["w"]                                        # (3,3,4*in_nc,nf) HWIO
    wf = sum(wf[:, :, s * in_nc:(s + 1) * in_nc, :] for s in range(4))
    fea_w = _w2d(wf).astype(jnp.bfloat16)                          # (nf, 9*in_nc)
    fea_b = params["fea"]["b"].reshape(nf, 1).astype(jnp.float32)

    crf_w = jnp.stack([_w2d(params["crfbs"][i][j]["w"])
                       for i in range(num_modules) for j in range(k)]).astype(jnp.bfloat16)
    crf_b = jnp.stack([params["crfbs"][i][j]["b"].reshape(nf, 1)
                       for i in range(num_modules) for j in range(k)]).astype(jnp.float32)

    c_w = params["c"]["w"].reshape(num_modules * nf, nf).T.astype(jnp.bfloat16)  # (nf, 3*nf)
    c_b = params["c"]["b"].reshape(nf, 1).astype(jnp.float32)

    tail_w = _w2d(params["tail"]["w"]).astype(jnp.bfloat16)        # (c_tail, 9*nf)
    tail_b = params["tail"]["b"].reshape(c_tail, 1).astype(jnp.float32)

    # First-layer im2col in the wrapper (tiny, lane-dense on HW) -> (N, 9*in_nc, HW) bf16.
    x_patch = _im2col_nchw(x_nchw.astype(jnp.bfloat16))

    kernel = _make_crfn_kernel(H, W, nf, num_modules, k, c_tail, NEG_SLOPE, base, pad_len)

    def full_spec(a):
        nd = a.ndim
        return pl.BlockSpec(a.shape, lambda n, nd=nd: (0,) * nd)

    n_layers = num_modules * k
    flops = 2 * N * HW * (9 * in_nc * nf + n_layers * 9 * nf * nf
                          + num_modules * nf * nf + 9 * nf * c_tail)
    bytes_accessed = (x_patch.size * 2 + N * HW * c_tail * 4
                      + (fea_w.size + crf_w.size + c_w.size + tail_w.size) * 2
                      + (fea_b.size + crf_b.size + c_b.size + tail_b.size) * 4)

    tail_out = pl.pallas_call(
        kernel,
        out_shape=jax.ShapeDtypeStruct((N, c_tail, HW), jnp.float32),
        grid=(N,),
        in_specs=[
            pl.BlockSpec((None, 9 * in_nc, HW), lambda n: (n, 0, 0)),
            full_spec(fea_w), full_spec(fea_b),
            full_spec(crf_w), full_spec(crf_b),
            full_spec(c_w), full_spec(c_b),
            full_spec(tail_w), full_spec(tail_b),
        ],
        out_specs=pl.BlockSpec((None, c_tail, HW), lambda n: (n, 0, 0)),
        scratch_shapes=[
            pltpu.VMEM((nf, pad_len), jnp.bfloat16),               # padded activation (reused)
            pltpu.VMEM((num_modules * nf, HW), jnp.bfloat16),      # module-output concat
            pltpu.VMEM((nf, HW), jnp.float32),                     # out_fea (global residual)
        ],
        compiler_params=pltpu.CompilerParams(
            dimension_semantics=("parallel",),
            vmem_limit_bytes=32 * 1024 * 1024),
        cost_estimate=pl.CostEstimate(flops=flops, transcendentals=0,
                                      bytes_accessed=bytes_accessed),
    )(x_patch, fea_w, fea_b, crf_w, crf_b, c_w, c_b, tail_w, tail_b)

    tail_nchw = tail_out.reshape(N, c_tail, H, W)
    y = pixel_shuffle_nchw(tail_nchw, upscale)                     # (N, out_nc, H*r, W*r)
    return y.astype(x_nchw.dtype)


# ----------------------------------- params --------------------------------------
def _conv_param(key, ksize, cin, cout):
    kw, kb = jax.random.split(key)
    fan_in = float(ksize * ksize * cin)
    w = jax.random.normal(kw, (ksize, ksize, cin, cout), jnp.float32) / jnp.sqrt(fan_in)
    b = 0.01 * jax.random.normal(kb, (cout,), jnp.float32)
    return {"w": w, "b": b}


def init_params(key, *, in_nc=3, nf=64, num_modules=3, out_nc=3, upscale=4, k=2):
    n_keys = 3 + num_modules * k
    keys = list(jax.random.split(key, n_keys))
    params = {}
    params["fea"] = _conv_param(keys.pop(0), 3, in_nc * 4, nf)            # fea_conv
    params["crfbs"] = [[_conv_param(keys.pop(0), 3, nf, nf) for _ in range(k)]
                       for _ in range(num_modules)]                       # CRFModule stand-in
    params["c"] = _conv_param(keys.pop(0), 1, nf * num_modules, nf)       # 1x1 conv + lrelu
    params["tail"] = _conv_param(keys.pop(0), 3, nf, out_nc * upscale ** 2)
    return params


# ----------------------------- pure-JAX reference ---------------------------------
def _conv_ref(x, w, b, neg_slope=None):
    y = lax.conv_general_dilated(x, w, (1, 1), "SAME",
                                 dimension_numbers=("NCHW", "HWIO", "NCHW"))
    y = y + b.reshape(1, -1, 1, 1)
    if neg_slope is not None:
        y = jnp.where(y >= 0, y, neg_slope * y)
    return y


def crfn_forward_ref(params, x, *, num_modules, k, upscale):
    x4 = jnp.concatenate([x, x, x, x], axis=1)
    fea = _conv_ref(x4, params["fea"]["w"], params["fea"]["b"])
    cur = fea
    outs = []
    for i in range(num_modules):
        skip = cur
        for j in range(k):
            cur = _conv_ref(cur, params["crfbs"][i][j]["w"], params["crfbs"][i][j]["b"],
                            NEG_SLOPE)
            if j == k - 1:
                cur = cur + skip
        outs.append(cur)
    cat = jnp.concatenate(outs, axis=1)
    out = _conv_ref(cat, params["c"]["w"], params["c"]["b"], NEG_SLOPE) + fea
    tail = _conv_ref(out, params["tail"]["w"], params["tail"]["b"])
    return pixel_shuffle_nchw(tail, upscale)


# ------------------------------------ driver --------------------------------------
if __name__ == "__main__":
    cfg = dict(in_nc=3, nf=16, num_modules=3, out_nc=3, upscale=4, k=2)
    key = jax.random.PRNGKey(0)
    pkey, xkey = jax.random.split(key)

    params = init_params(pkey, **cfg)
    x = jax.random.normal(xkey, (2, cfg["in_nc"], 16, 16), jnp.float32)   # NCHW like PyTorch

    fwd = jax.jit(functools.partial(
        crfn_forward,
        num_modules=cfg["num_modules"], k=cfg["k"],
        upscale=cfg["upscale"], out_nc=cfg["out_nc"]))

    y = fwd(params, x)
    jax.block_until_ready(y)
    assert y.shape == (2, cfg["out_nc"], 16 * cfg["upscale"], 16 * cfg["upscale"]), y.shape
    assert bool(jnp.all(jnp.isfinite(y)))

    # Loose reference check (kernel uses bf16 matmul inputs; reference is full f32).
    y_ref = jax.jit(functools.partial(
        crfn_forward_ref, num_modules=cfg["num_modules"], k=cfg["k"],
        upscale=cfg["upscale"]))(params, x)
    max_err = float(jnp.max(jnp.abs(y - y_ref)))
    assert max_err < 0.25, max_err

    print("KERNEL_OK")
</pallas_src>

<mosaic_0001>
module attributes {stable_mosaic.version = 11 : i64} {
  func.func @kernel(%arg0: i32, %arg1: memref<1x27x256xbf16, #tpu.memory_space<vmem>>, %arg2: memref<16x27xbf16, #tpu.memory_space<vmem>>, %arg3: memref<16x1xf32, #tpu.memory_space<vmem>>, %arg4: memref<6x16x144xbf16, #tpu.memory_space<vmem>>, %arg5: memref<6x16x1xf32, #tpu.memory_space<vmem>>, %arg6: memref<16x48xbf16, #tpu.memory_space<vmem>>, %arg7: memref<16x1xf32, #tpu.memory_space<vmem>>, %arg8: memref<48x144xbf16, #tpu.memory_space<vmem>>, %arg9: memref<48x1xf32, #tpu.memory_space<vmem>>, %arg10: memref<1x48x256xf32, #tpu.memory_space<vmem>>, %arg11: memref<16x512xbf16, #tpu.memory_space<vmem>>, %arg12: memref<48x256xbf16, #tpu.memory_space<vmem>>, %arg13: memref<16x256xf32, #tpu.memory_space<vmem>>) attributes {dimension_semantics = [#tpu.dimension_semantics<parallel>], iteration_bounds = array<i64: 2>, scalar_prefetch = 0 : i64, scratch_operands = 3 : i64, tpu.core_type = #tpu.core_type<tc>, window_params = [{transform_indices = @transform_0, window_bounds = array<i64: 1, 27, 256>}, {pipeline_mode = #tpu.pipeline_mode<synchronous>, transform_indices = @transform_1, window_bounds = array<i64: 16, 27>}, {pipeline_mode = #tpu.pipeline_mode<synchronous>, transform_indices = @transform_2, window_bounds = array<i64: 16, 1>}, {pipeline_mode = #tpu.pipeline_mode<synchronous>, transform_indices = @transform_3, window_bounds = array<i64: 6, 16, 144>}, {pipeline_mode = #tpu.pipeline_mode<synchronous>, transform_indices = @transform_4, window_bounds = array<i64: 6, 16, 1>}, {pipeline_mode = #tpu.pipeline_mode<synchronous>, transform_indices = @transform_5, window_bounds = array<i64: 16, 48>}, {pipeline_mode = #tpu.pipeline_mode<synchronous>, transform_indices = @transform_6, window_bounds = array<i64: 16, 1>}, {pipeline_mode = #tpu.pipeline_mode<synchronous>, transform_indices = @transform_7, window_bounds = array<i64: 48, 144>}, {pipeline_mode = #tpu.pipeline_mode<synchronous>, transform_indices = @transform_8, window_bounds = array<i64: 48, 1>}, {transform_indices = @transform_9, window_bounds = array<i64: 1, 48, 256>}]} {
    %cst = arith.constant 0.000000e+00 : bf16
    %0 = vector.broadcast %cst : bf16 to vector<16x512xbf16>
    %c0 = arith.constant 0 : index
    %c0_0 = arith.constant 0 : index
    %1 = vector.load %arg11[%c0, %c0_0] : memref<16x512xbf16, #tpu.memory_space<vmem>>, vector<16x512xbf16>
    tpu.vector_store %arg11[%c0, %c0_0], %0 {strides = array<i32>} : memref<16x512xbf16, #tpu.memory_space<vmem>>, vector<16x512xbf16>,
    %2 = tpu.iota {dimensions = array<i32: 1>} : vector<16x256xi32>
    %c16_i32 = arith.constant 16 : i32
    %c0_i32 = arith.constant 0 : i32
    %3 = arith.cmpi eq, %c16_i32, %c0_i32 : i32
    %c1_i32 = arith.constant 1 : i32
    %4 = arith.select %3, %c1_i32, %c16_i32 : i32
    %5 = vector.broadcast %4 : i32 to vector<16x256xi32>
    %6 = arith.remsi %2, %5 : vector<16x256xi32>
    %c0_i32_1 = arith.constant 0 : i32
    %7 = vector.broadcast %c0_i32_1 : i32 to vector<16x256xi32>
    %8 = arith.cmpi ne, %6, %7 : vector<16x256xi32>
    %c0_i32_2 = arith.constant 0 : i32
    %9 = vector.broadcast %c0_i32_2 : i32 to vector<16x256xi32>
    %10 = arith.cmpi slt, %6, %9 : vector<16x256xi32>
    %c0_i32_3 = arith.constant 0 : i32
    %11 = arith.cmpi slt, %4, %c0_i32_3 : i32
    %12 = vector.broadcast %11 : i1 to vector<16x256xi1>
    %13 = vector.broadcast %12 : vector<16x256xi1> to vector<16x256xi1>
    %14 = arith.xori %10, %13 : vector<16x256xi1>
    %15 = arith.andi %14, %8 : vector<16x256xi1>
    %16 = vector.broadcast %4 : i32 to vector<16x256xi32>
    %17 = arith.addi %6, %16 : vector<16x256xi32>
    %18 = arith.select %15, %17, %6 : vector<16x256xi1>, vector<16x256xi32>
    %c0_i32_4 = arith.constant 0 : i32
    %19 = vector.broadcast %c0_i32_4 : i32 to vector<16x256xi32>
    %20 = arith.cmpi ne, %18, %19 : vector<16x256xi32>
    %c15_i32 = arith.constant 15 : i32
    %21 = vector.broadcast %c15_i32 : i32 to vector<16x256xi32>
    %22 = arith.cmpi ne, %18, %21 : vector<16x256xi32>
    %cst_5 = arith.constant 0.000000e+00 : bf16
    %23 = vector.broadcast %cst_5 : bf16 to vector<16x256xbf16>
    %c0_6 = arith.constant 0 : index
    %c0_7 = arith.constant 0 : index
    %24 = vector.load %arg2[%c0_6, %c0_7] : memref<16x27xbf16, #tpu.memory_space<vmem>>, vector<16x27xbf16>
    %c0_8 = arith.constant 0 : index
    %c0_9 = arith.constant 0 : index
    %c0_10 = arith.constant 0 : index
    %25 = vector.load %arg1[%c0_8, %c0_9, %c0_10] : memref<1x27x256xbf16, #tpu.memory_space<vmem>>, vector<1x27x256xbf16>
    %26 = vector.shape_cast %25 : vector<1x27x256xbf16> to vector<27x256xbf16>
    %cst_11 = arith.constant dense<0.000000e+00> : vector<16x256xf32>
    %27 = tpu.matmul %24, %26, %cst_11 {dimension_numbers = #tpu.dot_dimension_numbers<[1], [0], [0], [1], [0, 0, 1, 1], [], []>} : vector<16x27xbf16>, vector<27x256xbf16>, vector<16x256xf32> -> vector<16x256xf32>
    %c0_12 = arith.constant 0 : index
    %c0_13 = arith.constant 0 : index
    %28 = vector.load %arg3[%c0_12, %c0_13] : memref<16x1xf32, #tpu.memory_space<vmem>>, vector<16x1xf32>
    %29 = vector.broadcast %28 : vector<16x1xf32> to vector<16x256xf32>
    %30 = arith.addf %27, %29 : vector<16x256xf32>
    %c0_14 = arith.constant 0 : index
    %c0_15 = arith.constant 0 : index
    %31 = vector.load %arg13[%c0_14, %c0_15] : memref<16x256xf32, #tpu.memory_space<vmem>>, vector<16x256xf32>
    tpu.vector_store %arg13[%c0_14, %c0_15], %30 {strides = array<i32>} : memref<16x256xf32, #tpu.memory_space<vmem>>, vector<16x256xf32>,
    %32 = arith.truncf %30 : vector<16x256xf32> to vector<16x256xbf16>
    %c0_16 = arith.constant 0 : index
    %c128 = arith.constant 128 : index
    %33 = vector.load %arg11[%c0_16, %c128] : memref<16x512xbf16, #tpu.memory_space<vmem>>, vector<16x256xbf16>
    tpu.vector_store %arg11[%c0_16, %c128], %32 {strides = array<i32>} : memref<16x512xbf16, #tpu.memory_space<vmem>>, vector<16x256xbf16>,
    %c0_17 = arith.constant 0 : index
    %c0_18 = arith.constant 0 : index
    %c0_19 = arith.constant 0 : index
    %34 = vector.load %arg4[%c0_17, %c0_18, %c0_19] : memref<6x16x144xbf16, #tpu.memory_space<vmem>>, vector<1x16x144xbf16>
    %35 = vector.shape_cast %34 : vector<1x16x144xbf16> to vector<16x144xbf16>
    %c0_20 = arith.constant 0 : index
    %c0_21 = arith.constant 0 : index
    %c0_22 = arith.constant 0 : index
    %36 = vector.load %arg5[%c0_20, %c0_21, %c0_22] : memref<6x16x1xf32, #tpu.memory_space<vmem>>, vector<1x16x1xf32>
    %37 = vector.shape_cast %36 : vector<1x16x1xf32> to vector<16x1xf32>
    %c0_23 = arith.constant 0 : index
    %c111 = arith.constant 111 : index
    %38 = vector.load %arg11[%c0_23, %c111] : memref<16x512xbf16, #tpu.memory_space<vmem>>, vector<16x256xbf16>
    %39 = arith.select %20, %38, %23 : vector<16x256xi1>, vector<16x256xbf16>
    %c0_24 = arith.constant 0 : index
    %c112 = arith.constant 112 : index
    %40 = vector.load %arg11[%c0_24, %c112] : memref<16x512xbf16, #tpu.memory_space<vmem>>, vector<16x256xbf16>
    %c0_25 = arith.constant 0 : index
    %c113 = arith.constant 113 : index
    %41 = vector.load %arg11[%c0_25, %c113] : memref<16x512xbf16, #tpu.memory_space<vmem>>, vector<16x256xbf16>
    %42 = arith.select %22, %41, %23 : vector<16x256xi1>, vector<16x256xbf16>
    %c0_26 = arith.constant 0 : index
    %c127 = arith.constant 127 : index
    %43 = vector.load %arg11[%c0_26, %c127] : memref<16x512xbf16, #tpu.memory_space<vmem>>, vector<16x256xbf16>
    %44 = arith.select %20, %43, %23 : vector<16x256xi1>, vector<16x256xbf16>
    %c0_27 = arith.constant 0 : index
    %c128_28 = arith.constant 128 : index
    %45 = vector.load %arg11[%c0_27, %c128_28] : memref<16x512xbf16, #tpu.memory_space<vmem>>, vector<16x256xbf16>
    %c0_29 = arith.constant 0 : index
    %c129 = arith.constant 129 : index
    %46 = vector.load %arg11[%c0_29, %c129] : memref<16x512xbf16, #tpu.memory_space<vmem>>, vector<16x256xbf16>
    %47 = arith.select %22, %46, %23 : vector<16x256xi1>, vector<16x256xbf16>
    %c0_30 = arith.constant 0 : index
    %c143 = arith.constant 143 : index
    %48 = vector.load %arg11[%c0_30, %c143] : memref<16x512xbf16, #tpu.memory_space<vmem>>, vector<16x256xbf16>
    %49 = arith.select %20, %48, %23 : vector<16x256xi1>, vector<16x256xbf16>
    %c0_31 = arith.constant 0 : index
    %c144 = arith.constant 144 : index
    %50 = vector.load %arg11[%c0_31, %c144] : memref<16x512xbf16, #tpu.memory_space<vmem>>, vector<16x256xbf16>
    %c0_32 = arith.constant 0 : index
    %c145 = arith.constant 145 : index
    %51 = vector.load %arg11[%c0_32, %c145] : memref<16x512xbf16, #tpu.memory_space<vmem>>, vector<16x256xbf16>
    %52 = arith.select %22, %51, %23 : vector<16x256xi1>, vector<16x256xbf16>
    %53 = tpu.concatenate %39, %40, %42, %44, %45, %47, %49, %50, %52 in 0 : vector<16x256xbf16>, vector<16x256xbf16>, vector<16x256xbf16>, vector<16x256xbf16>, vector<16x256xbf16>, vector<16x256xbf16>, vector<16x256xbf16>, vector<16x256xbf16>, vector<16x256xbf16> -> vector<144x256xbf16>
    %cst_33 = arith.constant dense<0.000000e+00> : vector<16x256xf32>
    %54 = tpu.matmul %35, %53, %cst_33 {dimension_numbers = #tpu.dot_dimension_numbers<[1], [0], [0], [1], [0, 0, 1, 1], [], []>} : vector<16x144xbf16>, vector<144x256xbf16>, vector<16x256xf32> -> vector<16x256xf32>
    %55 = vector.broadcast %37 : vector<16x1xf32> to vector<16x256xf32>
    %56 = arith.addf %54, %55 : vector<16x256xf32>
    %cst_34 = arith.constant 5.000000e-02 : f32
    %57 = vector.broadcast %cst_34 : f32 to vector<16x256xf32>
    %58 = arith.mulf %57, %56 : vector<16x256xf32>
    %59 = arith.maximumf %56, %58 : vector<16x256xf32>
    %60 = arith.truncf %59 : vector<16x256xf32> to vector<16x256xbf16>
    %c0_35 = arith.constant 0 : index
    %c128_36 = arith.constant 128 : index
    %61 = vector.load %arg11[%c0_35, %c128_36] : memref<16x512xbf16, #tpu.memory_space<vmem>>, vector<16x256xbf16>
    tpu.vector_store %arg11[%c0_35, %c128_36], %60 {strides = array<i32>} : memref<16x512xbf16, #tpu.memory_space<vmem>>, vector<16x256xbf16>,
    %c1 = arith.constant 1 : index
    %c0_37 = arith.constant 0 : index
    %c0_38 = arith.constant 0 : index
    %62 = vector.load %arg4[%c1, %c0_37, %c0_38] : memref<6x16x144xbf16, #tpu.memory_space<vmem>>, vector<1x16x144xbf16>
    %63 = vector.shape_cast %62 : vector<1x16x144xbf16> to vector<16x144xbf16>
    %c1_39 = arith.constant 1 : index
    %c0_40 = arith.constant 0 : index
    %c0_41 = arith.constant 0 : index
    %64 = vector.load %arg5[%c1_39, %c0_40, %c0_41] : memref<6x16x1xf32, #tpu.memory_space<vmem>>, vector<1x16x1xf32>
    %65 = vector.shape_cast %64 : vector<1x16x1xf32> to vector<16x1xf32>
    %c0_42 = arith.constant 0 : index
    %c111_43 = arith.constant 111 : index
    %66 = vector.load %arg11[%c0_42, %c111_43] : memref<16x512xbf16, #tpu.memory_space<vmem>>, vector<16x256xbf16>
    %67 = arith.select %20, %66, %23 : vector<16x256xi1>, vector<16x256xbf16>
    %c0_44 = arith.constant 0 : index
    %c112_45 = arith.constant 112 : index
    %68 = vector.load %arg11[%c0_44, %c112_45] : memref<16x512xbf16, #tpu.memory_space<vmem>>, vector<16x256xbf16>
    %c0_46 = arith.constant 0 : index
    %c113_47 = arith.constant 113 : index
    %69 = vector.load %arg11[%c0_46, %c113_47] : memref<16x512xbf16, #tpu.memory_space<vmem>>, vector<16x256xbf16>
    %70 = arith.select %22, %69, %23 : vector<16x256xi1>, vector<16x256xbf16>
    %c0_48 = arith.constant 0 : index
    %c127_49 = arith.constant 127 : index
    %71 = vector.load %arg11[%c0_48, %c127_49] : memref<16x512xbf16, #tpu.memory_space<vmem>>, vector<16x256xbf16>
    %72 = arith.select %20, %71, %23 : vector<16x256xi1>, vector<16x256xbf16>
    %c0_50 = arith.constant 0 : index
    %c128_51 = arith.constant 128 : index
    %73 = vector.load %arg11[%c0_50, %c128_51] : memref<16x512xbf16, #tpu.memory_space<vmem>>, vector<16x256xbf16>
    %c0_52 = arith.constant 0 : index
    %c129_53 = arith.constant 129 : index
    %74 = vector.load %arg11[%c0_52, %c129_53] : memref<16x512xbf16, #tpu.memory_space<vmem>>, vector<16x256xbf16>
    %75 = arith.select %22, %74, %23 : vector<16x256xi1>, vector<16x256xbf16>
    %c0_54 = arith.constant 0 : index
    %c143_55 = arith.constant 143 : index
    %76 = vector.load %arg11[%c0_54, %c143_55] : memref<16x512xbf16, #tpu.memory_space<vmem>>, vector<16x256xbf16>
    %77 = arith.select %20, %76, %23 : vector<16x256xi1>, vector<16x256xbf16>
    %c0_56 = arith.constant 0 : index
    %c144_57 = arith.constant 144 : index
    %78 = vector.load %arg11[%c0_56, %c144_57] : memref<16x512xbf16, #tpu.memory_space<vmem>>, vector<16x256xbf16>
    %c0_58 = arith.constant 0 : index
    %c145_59 = arith.constant 145 : index
    %79 = vector.load %arg11[%c0_58, %c145_59] : memref<16x512xbf16, #tpu.memory_space<vmem>>, vector<16x256xbf16>
    %80 = arith.select %22, %79, %23 : vector<16x256xi1>, vector<16x256xbf16>
    %81 = tpu.concatenate %67, %68, %70, %72, %73, %75, %77, %78, %80 in 0 : vector<16x256xbf16>, vector<16x256xbf16>, vector<16x256xbf16>, vector<16x256xbf16>, vector<16x256xbf16>, vector<16x256xbf16>, vector<16x256xbf16>, vector<16x256xbf16>, vector<16x256xbf16> -> vector<144x256xbf16>
    %cst_60 = arith.constant dense<0.000000e+00> : vector<16x256xf32>
    %82 = tpu.matmul %63, %81, %cst_60 {dimension_numbers = #tpu.dot_dimension_numbers<[1], [0], [0], [1], [0, 0, 1, 1], [], []>} : vector<16x144xbf16>, vector<144x256xbf16>, vector<16x256xf32> -> vector<16x256xf32>
    %83 = vector.broadcast %65 : vector<16x1xf32> to vector<16x256xf32>
    %84 = arith.addf %82, %83 : vector<16x256xf32>
    %cst_61 = arith.constant 5.000000e-02 : f32
    %85 = vector.broadcast %cst_61 : f32 to vector<16x256xf32>
    %86 = arith.mulf %85, %84 : vector<16x256xf32>
    %87 = arith.maximumf %84, %86 : vector<16x256xf32>
    %88 = arith.addf %87, %30 : vector<16x256xf32>
    %89 = arith.truncf %88 : vector<16x256xf32> to vector<16x256xbf16>
    %c0_62 = arith.constant 0 : index
    %c0_63 = arith.constant 0 : index
    %90 = vector.load %arg12[%c0_62, %c0_63] : memref<48x256xbf16, #tpu.memory_space<vmem>>, vector<16x256xbf16>
    tpu.vector_store %arg12[%c0_62, %c0_63], %89 {strides = array<i32>} : memref<48x256xbf16, #tpu.memory_space<vmem>>, vector<16x256xbf16>,
    %91 = arith.truncf %88 : vector<16x256xf32> to vector<16x256xbf16>
    %c0_64 = arith.constant 0 : index
    %c128_65 = arith.constant 128 : index
    %92 = vector.load %arg11[%c0_64, %c128_65] : memref<16x512xbf16, #tpu.memory_space<vmem>>, vector<16x256xbf16>
    tpu.vector_store %arg11[%c0_64, %c128_65], %91 {strides = array<i32>} : memref<16x512xbf16, #tpu.memory_space<vmem>>, vector<16x256xbf16>,
    %c2 = arith.constant 2 : index
    %c0_66 = arith.constant 0 : index
    %c0_67 = arith.constant 0 : index
    %93 = vector.load %arg4[%c2, %c0_66, %c0_67] : memref<6x16x144xbf16, #tpu.memory_space<vmem>>, vector<1x16x144xbf16>
    %94 = vector.shape_cast %93 : vector<1x16x144xbf16> to vector<16x144xbf16>
    %c2_68 = arith.constant 2 : index
    %c0_69 = arith.constant 0 : index
    %c0_70 = arith.constant 0 : index
    %95 = vector.load %arg5[%c2_68, %c0_69, %c0_70] : memref<6x16x1xf32, #tpu.memory_space<vmem>>, vector<1x16x1xf32>
    %96 = vector.shape_cast %95 : vector<1x16x1xf32> to vector<16x1xf32>
    %c0_71 = arith.constant 0 : index
    %c111_72 = arith.constant 111 : index
    %97 = vector.load %arg11[%c0_71, %c111_72] : memref<16x512xbf16, #tpu.memory_space<vmem>>, vector<16x256xbf16>
    %98 = arith.select %20, %97, %23 : vector<16x256xi1>, vector<16x256xbf16>
    %c0_73 = arith.constant 0 : index
    %c112_74 = arith.constant 112 : index
    %99 = vector.load %arg11[%c0_73, %c112_74] : memref<16x512xbf16, #tpu.memory_space<vmem>>, vector<16x256xbf16>
    %c0_75 = arith.constant 0 : index
    %c113_76 = arith.constant 113 : index
    %100 = vector.load %arg11[%c0_75, %c113_76] : memref<16x512xbf16, #tpu.memory_space<vmem>>, vector<16x256xbf16>
    %101 = arith.select %22, %100, %23 : vector<16x256xi1>, vector<16x256xbf16>
    %c0_77 = arith.constant 0 : index
    %c127_78 = arith.constant 127 : index
    %102 = vector.load %arg11[%c0_77, %c127_78] : memref<16x512xbf16, #tpu.memory_space<vmem>>, vector<16x256xbf16>
    %103 = arith.select %20, %102, %23 : vector<16x256xi1>, vector<16x256xbf16>
    %c0_79 = arith.constant 0 : index
    %c128_80 = arith.constant 128 : index
    %104 = vector.load %arg11[%c0_79, %c128_80] : memref<16x512xbf16, #tpu.memory_space<vmem>>, vector<16x256xbf16>
    %c0_81 = arith.constant 0 : index
    %c129_82 = arith.constant 129 : index
    %105 = vector.load %arg11[%c0_81, %c129_82] : memref<16x512xbf16, #tpu.memory_space<vmem>>, vector<16x256xbf16>
    %106 = arith.select %22, %105, %23 : vector<16x256xi1>, vector<16x256xbf16>
    %c0_83 = arith.constant 0 : index
    %c143_84 = arith.constant 143 : index
    %107 = vector.load %arg11[%c0_83, %c143_84] : memref<16x512xbf16, #tpu.memory_space<vmem>>, vector<16x256xbf16>
    %108 = arith.select %20, %107, %23 : vector<16x256xi1>, vector<16x256xbf16>
    %c0_85 = arith.constant 0 : index
    %c144_86 = arith.constant 144 : index
    %109 = vector.load %arg11[%c0_85, %c144_86] : memref<16x512xbf16, #tpu.memory_space<vmem>>, vector<16x256xbf16>
    %c0_87 = arith.constant 0 : index
    %c145_88 = arith.constant 145 : index
    %110 = vector.load %arg11[%c0_87, %c145_88] : memref<16x512xbf16, #tpu.memory_space<vmem>>, vector<16x256xbf16>
    %111 = arith.select %22, %110, %23 : vector<16x256xi1>, vector<16x256xbf16>
    %112 = tpu.concatenate %98, %99, %101, %103, %104, %106, %108, %109, %111 in 0 : vector<16x256xbf16>, vector<16x256xbf16>, vector<16x256xbf16>, vector<16x256xbf16>, vector<16x256xbf16>, vector<16x256xbf16>, vector<16x256xbf16>, vector<16x256xbf16>, vector<16x256xbf16> -> vector<144x256xbf16>
    %cst_89 = arith.constant dense<0.000000e+00> : vector<16x256xf32>
    %113 = tpu.matmul %94, %112, %cst_89 {dimension_numbers = #tpu.dot_dimension_numbers<[1], [0], [0], [1], [0, 0, 1, 1], [], []>} : vector<16x144xbf16>, vector<144x256xbf16>, vector<16x256xf32> -> vector<16x256xf32>
    %114 = vector.broadcast %96 : vector<16x1xf32> to vector<16x256xf32>
    %115 = arith.addf %113, %114 : vector<16x256xf32>
    %cst_90 = arith.constant 5.000000e-02 : f32
    %116 = vector.broadcast %cst_90 : f32 to vector<16x256xf32>
    %117 = arith.mulf %116, %115 : vector<16x256xf32>
    %118 = arith.maximumf %115, %117 : vector<16x256xf32>
    %119 = arith.truncf %118 : vector<16x256xf32> to vector<16x256xbf16>
    %c0_91 = arith.constant 0 : index
    %c128_92 = arith.constant 128 : index
    %120 = vector.load %arg11[%c0_91, %c128_92] : memref<16x512xbf16, #tpu.memory_space<vmem>>, vector<16x256xbf16>
    tpu.vector_store %arg11[%c0_91, %c128_92], %119 {strides = array<i32>} : memref<16x512xbf16, #tpu.memory_space<vmem>>, vector<16x256xbf16>,
    %c3 = arith.constant 3 : index
    %c0_93 = arith.constant 0 : index
    %c0_94 = arith.constant 0 : index
    %121 = vector.load %arg4[%c3, %c0_93, %c0_94] : memref<6x16x144xbf16, #tpu.memory_space<vmem>>, vector<1x16x144xbf16>
    %122 = vector.shape_cast %121 : vector<1x16x144xbf16> to vector<16x144xbf16>
    %c3_95 = arith.constant 3 : index
    %c0_96 = arith.constant 0 : index
    %c0_97 = arith.constant 0 : index
    %123 = vector.load %arg5[%c3_95, %c0_96, %c0_97] : memref<6x16x1xf32, #tpu.memory_space<vmem>>, vector<1x16x1xf32>
    %124 = vector.shape_cast %123 : vector<1x16x1xf32> to vector<16x1xf32>
    %c0_98 = arith.constant 0 : index
    %c111_99 = arith.constant 111 : index
    %125 = vector.load %arg11[%c0_98, %c111_99] : memref<16x512xbf16, #tpu.memory_space<vmem>>, vector<16x256xbf16>
    %126 = arith.select %20, %125, %23 : vector<16x256xi1>, vector<16x256xbf16>
    %c0_100 = arith.constant 0 : index
    %c112_101 = arith.constant 112 : index
    %127 = vector.load %arg11[%c0_100, %c112_101] : memref<16x512xbf16, #tpu.memory_space<vmem>>, vector<16x256xbf16>
    %c0_102 = arith.constant 0 : index
    %c113_103 = arith.constant 113 : index
    %128 = vector.load %arg11[%c0_102, %c113_103] : memref<16x512xbf16, #tpu.memory_space<vmem>>, vector<16x256xbf16>
    %129 = arith.select %22, %128, %23 : vector<16x256xi1>, vector<16x256xbf16>
    %c0_104 = arith.constant 0 : index
    %c127_105 = arith.constant 127 : index
    %130 = vector.load %arg11[%c0_104, %c127_105] : memref<16x512xbf16, #tpu.memory_space<vmem>>, vector<16x256xbf16>
    %131 = arith.select %20, %130, %23 : vector<16x256xi1>, vector<16x256xbf16>
    %c0_106 = arith.constant 0 : index
    %c128_107 = arith.constant 128 : index
    %132 = vector.load %arg11[%c0_106, %c128_107] : memref<16x512xbf16, #tpu.memory_space<vmem>>, vector<16x256xbf16>
    %c0_108 = arith.constant 0 : index
    %c129_109 = arith.constant 129 : index
    %133 = vector.load %arg11[%c0_108, %c129_109] : memref<16x512xbf16, #tpu.memory_space<vmem>>, vector<16x256xbf16>
    %134 = arith.select %22, %133, %23 : vector<16x256xi1>, vector<16x256xbf16>
    %c0_110 = arith.constant 0 : index
    %c143_111 = arith.constant 143 : index
    %135 = vector.load %arg11[%c0_110, %c143_111] : memref<16x512xbf16, #tpu.memory_space<vmem>>, vector<16x256xbf16>
    %136 = arith.select %20, %135, %23 : vector<16x256xi1>, vector<16x256xbf16>
    %c0_112 = arith.constant 0 : index
    %c144_113 = arith.constant 144 : index
    %137 = vector.load %arg11[%c0_112, %c144_113] : memref<16x512xbf16, #tpu.memory_space<vmem>>, vector<16x256xbf16>
    %c0_114 = arith.constant 0 : index
    %c145_115 = arith.constant 145 : index
    %138 = vector.load %arg11[%c0_114, %c145_115] : memref<16x512xbf16, #tpu.memory_space<vmem>>, vector<16x256xbf16>
    %139 = arith.select %22, %138, %23 : vector<16x256xi1>, vector<16x256xbf16>
    %140 = tpu.concatenate %126, %127, %129, %131, %132, %134, %136, %137, %139 in 0 : vector<16x256xbf16>, vector<16x256xbf16>, vector<16x256xbf16>, vector<16x256xbf16>, vector<16x256xbf16>, vector<16x256xbf16>, vector<16x256xbf16>, vector<16x256xbf16>, vector<16x256xbf16> -> vector<144x256xbf16>
    %cst_116 = arith.constant dense<0.000000e+00> : vector<16x256xf32>
    %141 = tpu.matmul %122, %140, %cst_116 {dimension_numbers = #tpu.dot_dimension_numbers<[1], [0], [0], [1], [0, 0, 1, 1], [], []>} : vector<16x144xbf16>, vector<144x256xbf16>, vector<16x256xf32> -> vector<16x256xf32>
    %142 = vector.broadcast %124 : vector<16x1xf32> to vector<16x256xf32>
    %143 = arith.addf %141, %142 : vector<16x256xf32>
    %cst_117 = arith.constant 5.000000e-02 : f32
    %144 = vector.broadcast %cst_117 : f32 to vector<16x256xf32>
    %145 = arith.mulf %144, %143 : vector<16x256xf32>
    %146 = arith.maximumf %143, %145 : vector<16x256xf32>
    %147 = arith.addf %146, %88 : vector<16x256xf32>
    %148 = arith.truncf %147 : vector<16x256xf32> to vector<16x256xbf16>
    %c16 = arith.constant 16 : index
    %c0_118 = arith.constant 0 : index
    %149 = vector.load %arg12[%c16, %c0_118] : memref<48x256xbf16, #tpu.memory_space<vmem>>, vector<16x256xbf16>
    tpu.vector_store %arg12[%c16, %c0_118], %148 {strides = array<i32>} : memref<48x256xbf16, #tpu.memory_space<vmem>>, vector<16x256xbf16>,
    %150 = arith.truncf %147 : vector<16x256xf32> to vector<16x256xbf16>
    %c0_119 = arith.constant 0 : index
    %c128_120 = arith.constant 128 : index
    %151 = vector.load %arg11[%c0_119, %c128_120] : memref<16x512xbf16, #tpu.memory_space<vmem>>, vector<16x256xbf16>
    tpu.vector_store %arg11[%c0_119, %c128_120], %150 {strides = array<i32>} : memref<16x512xbf16, #tpu.memory_space<vmem>>, vector<16x256xbf16>,
    %c4 = arith.constant 4 : index
    %c0_121 = arith.constant 0 : index
    %c0_122 = arith.constant 0 : index
    %152 = vector.load %arg4[%c4, %c0_121, %c0_122] : memref<6x16x144xbf16, #tpu.memory_space<vmem>>, vector<1x16x144xbf16>
    %153 = vector.shape_cast %152 : vector<1x16x144xbf16> to vector<16x144xbf16>
    %c4_123 = arith.constant 4 : index
    %c0_124 = arith.constant 0 : index
    %c0_125 = arith.constant 0 : index
    %154 = vector.load %arg5[%c4_123, %c0_124, %c0_125] : memref<6x16x1xf32, #tpu.memory_space<vmem>>, vector<1x16x1xf32>
    %155 = vector.shape_cast %154 : vector<1x16x1xf32> to vector<16x1xf32>
    %c0_126 = arith.constant 0 : index
    %c111_127 = arith.constant 111 : index
    %156 = vector.load %arg11[%c0_126, %c111_127] : memref<16x512xbf16, #tpu.memory_space<vmem>>, vector<16x256xbf16>
    %157 = arith.select %20, %156, %23 : vector<16x256xi1>, vector<16x256xbf16>
    %c0_128 = arith.constant 0 : index
    %c112_129 = arith.constant 112 : index
    %158 = vector.load %arg11[%c0_128, %c112_129] : memref<16x512xbf16, #tpu.memory_space<vmem>>, vector<16x256xbf16>
    %c0_130 = arith.constant 0 : index
    %c113_131 = arith.constant 113 : index
    %159 = vector.load %arg11[%c0_130, %c113_131] : memref<16x512xbf16, #tpu.memory_space<vmem>>, vector<16x256xbf16>
    %160 = arith.select %22, %159, %23 : vector<16x256xi1>, vector<16x256xbf16>
    %c0_132 = arith.constant 0 : index
    %c127_133 = arith.constant 127 : index
    %161 = vector.load %arg11[%c0_132, %c127_133] : memref<16x512xbf16, #tpu.memory_space<vmem>>, vector<16x256xbf16>
    %162 = arith.select %20, %161, %23 : vector<16x256xi1>, vector<16x256xbf16>
    %c0_134 = arith.constant 0 : index
    %c128_135 = arith.constant 128 : index
    %163 = vector.load %arg11[%c0_134, %c128_135] : memref<16x512xbf16, #tpu.memory_space<vmem>>, vector<16x256xbf16>
    %c0_136 = arith.constant 0 : index
    %c129_137 = arith.constant 129 : index
    %164 = vector.load %arg11[%c0_136, %c129_137] : memref<16x512xbf16, #tpu.memory_space<vmem>>, vector<16x256xbf16>
    %165 = arith.select %22, %164, %23 : vector<16x256xi1>, vector<16x256xbf16>
    %c0_138 = arith.constant 0 : index
    %c143_139 = arith.constant 143 : index
    %166 = vector.load %arg11[%c0_138, %c143_139] : memref<16x512xbf16, #tpu.memory_space<vmem>>, vector<16x256xbf16>
    %167 = arith.select %20, %166, %23 : vector<16x256xi1>, vector<16x256xbf16>
    %c0_140 = arith.constant 0 : index
    %c144_141 = arith.constant 144 : index
    %168 = vector.load %arg11[%c0_140, %c144_141] : memref<16x512xbf16, #tpu.memory_space<vmem>>, vector<16x256xbf16>
    %c0_142 = arith.constant 0 : index
    %c145_143 = arith.constant 145 : index
    %169 = vector.load %arg11[%c0_142, %c145_143] : memref<16x512xbf16, #tpu.memory_space<vmem>>, vector<16x256xbf16>
    %170 = arith.select %22, %169, %23 : vector<16x256xi1>, vector<16x256xbf16>
    %171 = tpu.concatenate %157, %158, %160, %162, %163, %165, %167, %168, %170 in 0 : vector<16x256xbf16>, vector<16x256xbf16>, vector<16x256xbf16>, vector<16x256xbf16>, vector<16x256xbf16>, vector<16x256xbf16>, vector<16x256xbf16>, vector<16x256xbf16>, vector<16x256xbf16> -> vector<144x256xbf16>
    %cst_144 = arith.constant dense<0.000000e+00> : vector<16x256xf32>
    %172 = tpu.matmul %153, %171, %cst_144 {dimension_numbers = #tpu.dot_dimension_numbers<[1], [0], [0], [1], [0, 0, 1, 1], [], []>} : vector<16x144xbf16>, vector<144x256xbf16>, vector<16x256xf32> -> vector<16x256xf32>
    %173 = vector.broadcast %155 : vector<16x1xf32> to vector<16x256xf32>
    %174 = arith.addf %172, %173 : vector<16x256xf32>
    %cst_145 = arith.constant 5.000000e-02 : f32
    %175 = vector.broadcast %cst_145 : f32 to vector<16x256xf32>
    %176 = arith.mulf %175, %174 : vector<16x256xf32>
    %177 = arith.maximumf %174, %176 : vector<16x256xf32>
    %178 = arith.truncf %177 : vector<16x256xf32> to vector<16x256xbf16>
    %c0_146 = arith.constant 0 : index
    %c128_147 = arith.constant 128 : index
    %179 = vector.load %arg11[%c0_146, %c128_147] : memref<16x512xbf16, #tpu.memory_space<vmem>>, vector<16x256xbf16>
    tpu.vector_store %arg11[%c0_146, %c128_147], %178 {strides = array<i32>} : memref<16x512xbf16, #tpu.memory_space<vmem>>, vector<16x256xbf16>,
    %c5 = arith.constant 5 : index
    %c0_148 = arith.constant 0 : index
    %c0_149 = arith.constant 0 : index
    %180 = vector.load %arg4[%c5, %c0_148, %c0_149] : memref<6x16x144xbf16, #tpu.memory_space<vmem>>, vector<1x16x144xbf16>
    %181 = vector.shape_cast %180 : vector<1x16x144xbf16> to vector<16x144xbf16>
    %c5_150 = arith.constant 5 : index
    %c0_151 = arith.constant 0 : index
    %c0_152 = arith.constant 0 : index
    %182 = vector.load %arg5[%c5_150, %c0_151, %c0_152] : memref<6x16x1xf32, #tpu.memory_space<vmem>>, vector<1x16x1xf32>
    %183 = vector.shape_cast %182 : vector<1x16x1xf32> to vector<16x1xf32>
    %c0_153 = arith.constant 0 : index
    %c111_154 = arith.constant 111 : index
    %184 = vector.load %arg11[%c0_153, %c111_154] : memref<16x512xbf16, #tpu.memory_space<vmem>>, vector<16x256xbf16>
    %185 = arith.select %20, %184, %23 : vector<16x256xi1>, vector<16x256xbf16>
    %c0_155 = arith.constant 0 : index
    %c112_156 = arith.constant 112 : index
    %186 = vector.load %arg11[%c0_155, %c112_156] : memref<16x512xbf16, #tpu.memory_space<vmem>>, vector<16x256xbf16>
    %c0_157 = arith.constant 0 : index
    %c113_158 = arith.constant 113 : index
    %187 = vector.load %arg11[%c0_157, %c113_158] : memref<16x512xbf16, #tpu.memory_space<vmem>>, vector<16x256xbf16>
    %188 = arith.select %22, %187, %23 : vector<16x256xi1>, vector<16x256xbf16>
    %c0_159 = arith.constant 0 : index
    %c127_160 = arith.constant 127 : index
    %189 = vector.load %arg11[%c0_159, %c127_160] : memref<16x512xbf16, #tpu.memory_space<vmem>>, vector<16x256xbf16>
    %190 = arith.select %20, %189, %23 : vector<16x256xi1>, vector<16x256xbf16>
    %c0_161 = arith.constant 0 : index
    %c128_162 = arith.constant 128 : index
    %191 = vector.load %arg11[%c0_161, %c128_162] : memref<16x512xbf16, #tpu.memory_space<vmem>>, vector<16x256xbf16>
    %c0_163 = arith.constant 0 : index
    %c129_164 = arith.constant 129 : index
    %192 = vector.load %arg11[%c0_163, %c129_164] : memref<16x512xbf16, #tpu.memory_space<vmem>>, vector<16x256xbf16>
    %193 = arith.select %22, %192, %23 : vector<16x256xi1>, vector<16x256xbf16>
    %c0_165 = arith.constant 0 : index
    %c143_166 = arith.constant 143 : index
    %194 = vector.load %arg11[%c0_165, %c143_166] : memref<16x512xbf16, #tpu.memory_space<vmem>>, vector<16x256xbf16>
    %195 = arith.select %20, %194, %23 : vector<16x256xi1>, vector<16x256xbf16>
    %c0_167 = arith.constant 0 : index
    %c144_168 = arith.constant 144 : index
    %196 = vector.load %arg11[%c0_167, %c144_168] : memref<16x512xbf16, #tpu.memory_space<vmem>>, vector<16x256xbf16>
    %c0_169 = arith.constant 0 : index
    %c145_170 = arith.constant 145 : index
    %197 = vector.load %arg11[%c0_169, %c145_170] : memref<16x512xbf16, #tpu.memory_space<vmem>>, vector<16x256xbf16>
    %198 = arith.select %22, %197, %23 : vector<16x256xi1>, vector<16x256xbf16>
    %199 = tpu.concatenate %185, %186, %188, %190, %191, %193, %195, %196, %198 in 0 : vector<16x256xbf16>, vector<16x256xbf16>, vector<16x256xbf16>, vector<16x256xbf16>, vector<16x256xbf16>, vector<16x256xbf16>, vector<16x256xbf16>, vector<16x256xbf16>, vector<16x256xbf16> -> vector<144x256xbf16>
    %cst_171 = arith.constant dense<0.000000e+00> : vector<16x256xf32>
    %200 = tpu.matmul %181, %199, %cst_171 {dimension_numbers = #tpu.dot_dimension_numbers<[1], [0], [0], [1], [0, 0, 1, 1], [], []>} : vector<16x144xbf16>, vector<144x256xbf16>, vector<16x256xf32> -> vector<16x256xf32>
    %201 = vector.broadcast %183 : vector<16x1xf32> to vector<16x256xf32>
    %202 = arith.addf %200, %201 : vector<16x256xf32>
    %cst_172 = arith.constant 5.000000e-02 : f32
    %203 = vector.broadcast %cst_172 : f32 to vector<16x256xf32>
    %204 = arith.mulf %203, %202 : vector<16x256xf32>
    %205 = arith.maximumf %202, %204 : vector<16x256xf32>
    %206 = arith.addf %205, %147 : vector<16x256xf32>
    %207 = arith.truncf %206 : vector<16x256xf32> to vector<16x256xbf16>
    %c32 = arith.constant 32 : index
    %c0_173 = arith.constant 0 : index
    %208 = vector.load %arg12[%c32, %c0_173] : memref<48x256xbf16, #tpu.memory_space<vmem>>, vector<16x256xbf16>
    tpu.vector_store %arg12[%c32, %c0_173], %207 {strides = array<i32>} : memref<48x256xbf16, #tpu.memory_space<vmem>>, vector<16x256xbf16>,
    %c0_174 = arith.constant 0 : index
    %c0_175 = arith.constant 0 : index
    %209 = vector.load %arg6[%c0_174, %c0_175] : memref<16x48xbf16, #tpu.memory_space<vmem>>, vector<16x48xbf16>
    %c0_176 = arith.constant 0 : index
    %c0_177 = arith.constant 0 : index
    %210 = vector.load %arg12[%c0_176, %c0_177] : memref<48x256xbf16, #tpu.memory_space<vmem>>, vector<48x256xbf16>
    %cst_178 = arith.constant dense<0.000000e+00> : vector<16x256xf32>
    %211 = tpu.matmul %209, %210, %cst_178 {dimension_numbers = #tpu.dot_dimension_numbers<[1], [0], [0], [1], [0, 0, 1, 1], [], []>} : vector<16x48xbf16>, vector<48x256xbf16>, vector<16x256xf32> -> vector<16x256xf32>
    %c0_179 = arith.constant 0 : index
    %c0_180 = arith.constant 0 : index
    %212 = vector.load %arg7[%c0_179, %c0_180] : memref<16x1xf32, #tpu.memory_space<vmem>>, vector<16x1xf32>
    %213 = vector.broadcast %212 : vector<16x1xf32> to vector<16x256xf32>
    %214 = arith.addf %211, %213 : vector<16x256xf32>
    %cst_181 = arith.constant 5.000000e-02 : f32
    %215 = vector.broadcast %cst_181 : f32 to vector<16x256xf32>
    %216 = arith.mulf %215, %214 : vector<16x256xf32>
    %217 = arith.maximumf %214, %216 : vector<16x256xf32>
    %c0_182 = arith.constant 0 : index
    %c0_183 = arith.constant 0 : index
    %218 = vector.load %arg13[%c0_182, %c0_183] : memref<16x256xf32, #tpu.memory_space<vmem>>, vector<16x256xf32>
    %219 = arith.addf %217, %218 : vector<16x256xf32>
    %220 = arith.truncf %219 : vector<16x256xf32> to vector<16x256xbf16>
    %c0_184 = arith.constant 0 : index
    %c128_185 = arith.constant 128 : index
    %221 = vector.load %arg11[%c0_184, %c128_185] : memref<16x512xbf16, #tpu.memory_space<vmem>>, vector<16x256xbf16>
    tpu.vector_store %arg11[%c0_184, %c128_185], %220 {strides = array<i32>} : memref<16x512xbf16, #tpu.memory_space<vmem>>, vector<16x256xbf16>,
    %c0_186 = arith.constant 0 : index
    %c0_187 = arith.constant 0 : index
    %222 = vector.load %arg8[%c0_186, %c0_187] : memref<48x144xbf16, #tpu.memory_space<vmem>>, vector<48x144xbf16>
    %c0_188 = arith.constant 0 : index
    %c0_189 = arith.constant 0 : index
    %223 = vector.load %arg9[%c0_188, %c0_189] : memref<48x1xf32, #tpu.memory_space<vmem>>, vector<48x1xf32>
    %c0_190 = arith.constant 0 : index
    %c111_191 = arith.constant 111 : index
    %224 = vector.load %arg11[%c0_190, %c111_191] : memref<16x512xbf16, #tpu.memory_space<vmem>>, vector<16x256xbf16>
    %225 = arith.select %20, %224, %23 : vector<16x256xi1>, vector<16x256xbf16>
    %c0_192 = arith.constant 0 : index
    %c112_193 = arith.constant 112 : index
    %226 = vector.load %arg11[%c0_192, %c112_193] : memref<16x512xbf16, #tpu.memory_space<vmem>>, vector<16x256xbf16>
    %c0_194 = arith.constant 0 : index
    %c113_195 = arith.constant 113 : index
    %227 = vector.load %arg11[%c0_194, %c113_195] : memref<16x512xbf16, #tpu.memory_space<vmem>>, vector<16x256xbf16>
    %228 = arith.select %22, %227, %23 : vector<16x256xi1>, vector<16x256xbf16>
    %c0_196 = arith.constant 0 : index
    %c127_197 = arith.constant 127 : index
    %229 = vector.load %arg11[%c0_196, %c127_197] : memref<16x512xbf16, #tpu.memory_space<vmem>>, vector<16x256xbf16>
    %230 = arith.select %20, %229, %23 : vector<16x256xi1>, vector<16x256xbf16>
    %c0_198 = arith.constant 0 : index
    %c128_199 = arith.constant 128 : index
    %231 = vector.load %arg11[%c0_198, %c128_199] : memref<16x512xbf16, #tpu.memory_space<vmem>>, vector<16x256xbf16>
    %c0_200 = arith.constant 0 : index
    %c129_201 = arith.constant 129 : index
    %232 = vector.load %arg11[%c0_200, %c129_201] : memref<16x512xbf16, #tpu.memory_space<vmem>>, vector<16x256xbf16>
    %233 = arith.select %22, %232, %23 : vector<16x256xi1>, vector<16x256xbf16>
    %c0_202 = arith.constant 0 : index
    %c143_203 = arith.constant 143 : index
    %234 = vector.load %arg11[%c0_202, %c143_203] : memref<16x512xbf16, #tpu.memory_space<vmem>>, vector<16x256xbf16>
    %235 = arith.select %20, %234, %23 : vector<16x256xi1>, vector<16x256xbf16>
    %c0_204 = arith.constant 0 : index
    %c144_205 = arith.constant 144 : index
    %236 = vector.load %arg11[%c0_204, %c144_205] : memref<16x512xbf16, #tpu.memory_space<vmem>>, vector<16x256xbf16>
    %c0_206 = arith.constant 0 : index
    %c145_207 = arith.constant 145 : index
    %237 = vector.load %arg11[%c0_206, %c145_207] : memref<16x512xbf16, #tpu.memory_space<vmem>>, vector<16x256xbf16>
    %238 = arith.select %22, %237, %23 : vector<16x256xi1>, vector<16x256xbf16>
    %239 = tpu.concatenate %225, %226, %228, %230, %231, %233, %235, %236, %238 in 0 : vector<16x256xbf16>, vector<16x256xbf16>, vector<16x256xbf16>, vector<16x256xbf16>, vector<16x256xbf16>, vector<16x256xbf16>, vector<16x256xbf16>, vector<16x256xbf16>, vector<16x256xbf16> -> vector<144x256xbf16>
    %cst_208 = arith.constant dense<0.000000e+00> : vector<48x256xf32>
    %240 = tpu.matmul %222, %239, %cst_208 {dimension_numbers = #tpu.dot_dimension_numbers<[1], [0], [0], [1], [0, 0, 1, 1], [], []>} : vector<48x144xbf16>, vector<144x256xbf16>, vector<48x256xf32> -> vector<48x256xf32>
    %241 = vector.broadcast %223 : vector<48x1xf32> to vector<48x256xf32>
    %242 = arith.addf %240, %241 : vector<48x256xf32>
    %c0_209 = arith.constant 0 : index
    %c0_210 = arith.constant 0 : index
    %c0_211 = arith.constant 0 : index
    %243 = vector.load %arg10[%c0_209, %c0_210, %c0_211] : memref<1x48x256xf32, #tpu.memory_space<vmem>>, vector<1x48x256xf32>
    %244 = vector.shape_cast %243 : vector<1x48x256xf32> to vector<48x256xf32>
    %245 = vector.shape_cast %242 : vector<48x256xf32> to vector<1x48x256xf32>
    tpu.vector_store %arg10[%c0_209, %c0_210, %c0_211], %245 {strides = array<i32>} : memref<1x48x256xf32, #tpu.memory_space<vmem>>, vector<1x48x256xf32>,
    return
  }
  func.func @transform_0(%arg0: i32) -> (i32, i32, i32) {
    %c0_i32 = arith.constant 0 : i32
    %c0_i32_0 = arith.constant 0 : i32
    %c0_i32_1 = arith.constant 0 : i32
    return %arg0, %c0_i32, %c0_i32_0 : i32, i32, i32
  }
  func.func @transform_1(%arg0: i32) -> (i32, i32) {
    %c0_i32 = arith.constant 0 : i32
    %c0_i32_0 = arith.constant 0 : i32
    %c0_i32_1 = arith.constant 0 : i32
    return %c0_i32, %c0_i32_0 : i32, i32
  }
  func.func @transform_2(%arg0: i32) -> (i32, i32) {
    %c0_i32 = arith.constant 0 : i32
    %c0_i32_0 = arith.constant 0 : i32
    %c0_i32_1 = arith.constant 0 : i32
    return %c0_i32, %c0_i32_0 : i32, i32
  }
  func.func @transform_3(%arg0: i32) -> (i32, i32, i32) {
    %c0_i32 = arith.constant 0 : i32
    %c0_i32_0 = arith.constant 0 : i32
    %c0_i32_1 = arith.constant 0 : i32
    %c0_i32_2 = arith.constant 0 : i32
    return %c0_i32, %c0_i32_0, %c0_i32_1 : i32, i32, i32
  }
  func.func @transform_4(%arg0: i32) -> (i32, i32, i32) {
    %c0_i32 = arith.constant 0 : i32
    %c0_i32_0 = arith.constant 0 : i32
    %c0_i32_1 = arith.constant 0 : i32
    %c0_i32_2 = arith.constant 0 : i32
    return %c0_i32, %c0_i32_0, %c0_i32_1 : i32, i32, i32
  }
  func.func @transform_5(%arg0: i32) -> (i32, i32) {
    %c0_i32 = arith.constant 0 : i32
    %c0_i32_0 = arith.constant 0 : i32
    %c0_i32_1 = arith.constant 0 : i32
    return %c0_i32, %c0_i32_0 : i32, i32
  }
  func.func @transform_6(%arg0: i32) -> (i32, i32) {
    %c0_i32 = arith.constant 0 : i32
    %c0_i32_0 = arith.constant 0 : i32
    %c0_i32_1 = arith.constant 0 : i32
    return %c0_i32, %c0_i32_0 : i32, i32
  }
  func.func @transform_7(%arg0: i32) -> (i32, i32) {
    %c0_i32 = arith.constant 0 : i32
    %c0_i32_0 = arith.constant 0 : i32
    %c0_i32_1 = arith.constant 0 : i32
    return %c0_i32, %c0_i32_0 : i32, i32
  }
  func.func @transform_8(%arg0: i32) -> (i32, i32) {
    %c0_i32 = arith.constant 0 : i32
    %c0_i32_0 = arith.constant 0 : i32
    %c0_i32_1 = arith.constant 0 : i32
    return %c0_i32, %c0_i32_0 : i32, i32
  }
  func.func @transform_9(%arg0: i32) -> (i32, i32, i32) {
    %c0_i32 = arith.constant 0 : i32
    %c0_i32_0 = arith.constant 0 : i32
    %c0_i32_1 = arith.constant 0 : i32
    return %arg0, %c0_i32, %c0_i32_0 : i32, i32, i32
  }
}

</mosaic_0001>

<bundles_post_ra>
// kernel: crfn_forward.1
= control target key start
LH: loop header
LB: loop body
LE: loop exit
PB: predicated region body
PF: predicated region fallthrough
CT: control target
= control target key end

     0   :  { %s2961_s30 = smov 0   ;;  %s4104_s0 = inlined_call_operand.vmem [shape: bf16[2,27,256], index: 0, kind: input, shape index: {}]   ;;  %s4105_s1 = inlined_call_operand.vmem [shape: bf16[16,27], index: 1, kind: input, shape index: {}]   ;;  %s4106_s2 = inlined_call_operand.vmem [shape: f32[16,1], index: 2, kind: input, shape index: {}]   ;;  %s4107_s3 = inlined_call_operand.vmem [shape: bf16[6,16,144], index: 3, kind: input, shape index: {}]   ;;  %s4108_s4 = inlined_call_operand.vmem [shape: f32[6,16,1], index: 4, kind: input, shape index: {}]   ;;  %s4109_s5 = inlined_call_operand.vmem [shape: bf16[16,48], index: 5, kind: input, shape index: {}]   ;;  %s4110_s6 = inlined_call_operand.vmem [shape: f32[16,1], index: 6, kind: input, shape index: {}]   ;;  %s4111_s7 = inlined_call_operand.vmem [shape: bf16[48,144], index: 7, kind: input, shape index: {}]   ;;  %s4112_s8 = inlined_call_operand.vmem [shape: f32[48,1], index: 8, kind: input, shape index: {}]   ;;  %s4113_s9 = inlined_call_operand.vmem [shape: f32[2,48,256], index: 9, kind: output, shape index: {}]  }
   0x1 LB: > { %s2763_s10 = sadd.s32 4294967295, %s2895_s30   ;;  %p2767_p0 = scmp.ge.s32.totalorder %s2895_s30, 1  ;;  %s2895_s30 = sphi %s2961_s30, %s19_s30  }
   0x2   : > { %p287_p1 = scmp.lt.s32.totalorder %s2895_s30, 3 }
   0x4   : > { %p288_p2 = pnand %p2767_p0, %p287_p1 }
   0x5   : > { %p323_p3 = scmp.lt.s32.totalorder (!%p288_p2), %s2763_s10, 1  ;;  %vm416_vm0 = vcmask (!%p288_p2), 1044480   ;;  %v2897_v0 = vmov (!%p288_p2), 0   ;;  %v340_v1 = vlaneseq (!%p288_p2)  ;;  %vm417_vm1 = vcmask (!%p288_p2), 1045504   ;;  %v377_v2 = vld [vmem:[%s4106_s2] sm:$0xff] (!%p288_p2)  ;;  %v378_v5 = vld [vmem:[%s4106_s2 + $0x8] sm:$0xff] (!%p288_p2) }
   0x6   : > { %291 = sbr.rel (%p288_p2) target bundleno = 4046 (0xfce), region = 56  ;;  %458 = vmatprep.mubr.bf16.mxu0 (!%p288_p2), %v2897_v0  ;;  %2852 = vset.pattern.permute.xlu0 (!%p288_p2), %v2897_v0  ;;  %v2898_v3 = vmov (!%p288_p2), 65535   ;;  %v2860_v19 = vld [vmem:[%s4105_s1] sm:$0xff] (!%p288_p2)   ;;  %vm412_vm8 = vcmask (!%p288_p2), 220160   ;;  %s2899_s21 = smov (!%p288_p2), 113   ;;  %vm4123_vm9 = vcmask (!%p288_p2), 1039360  }
   0x7   : > { %2853 = vset.pattern.permute.xlu1 (!%p288_p2), %v2897_v0  ;;  %v418_v4 = vsel (!%p288_p2), %vm416_vm0, 4294967295, %v2898_v3  ;;  %381 = vperm.xlu0 (!%p288_p2), %2852, %v377_v2   ;;  %v341_v6 = vand.u32 (!%p288_p2), 127, %v340_v1  ;;  %v487_v7 = vshrl.u32 (!%p288_p2), %v340_v1, 7  ;;  %s2900_s22 = smov (!%p288_p2), 127   ;;  %s2901_s23 = smov (!%p288_p2), 1   ;;  %vm520_vm10 = vcmask (!%p288_p2), 924672  }
   0x8   : > { %v419_v11 = vsel (!%p288_p2), %vm417_vm1, %v418_v4, 0  ;;  %s2902_s24 = smov (!%p288_p2), 15   ;;  %s2903_s25 = smov (!%p288_p2), 17   ;;  %vm547_vm1 = vcmask (!%p288_p2), 7168  }
   0x9   : > { %v342_v8 = vadd.s32 (!%p288_p2), 128, %v341_v6  ;;  %v347_v9 = vand.u32 (!%p288_p2), 15, %v341_v6  ;;  %v488_v12 = vsub.s32 (!%p288_p2), 0, %v487_v7  ;;  %v492_v20 = vsub.s32 (!%p288_p2), 4, %v487_v7  ;;  %s2904_s26 = smov (!%p288_p2), 111   ;;  %s2905_s27 = smov (!%p288_p2), 126  }
   0xa   : > { %s2906_s28 = smov (!%p288_p2), 112   ;;  %s2907_s29 = smov (!%p288_p2), 110  }
   0xb   : > { %386 = vperm.xlu0 (!%p288_p2), %2852, %v378_v5   ;;  %v354_v14 = vand.u32 (!%p288_p2), 15, %v342_v8  ;;  %vm369_vm2 = vcmp.ne.s32.totalorder (!%p288_p2), %v347_v9, 15  ;;  %vm367_vm4 = vcmp.ne.s32.totalorder (!%p288_p2), %v347_v9, 0  ;;  %s2908_s11 = smov (!%p288_p2), 96   ;;  %s2909_s12 = smov (!%p288_p2), 95  }
   0xc   : > { %s2910_s13 = smov (!%p288_p2), 94  }
   0xd   : > { %s4205_s10 = smov (!%p323_p3, %s2763_s10), 1  ;;  %vm370_vm3 = vcmp.ne.s32.totalorder %v354_v14, 15  ;;  %vm368_vm5 = vcmp.ne.s32.totalorder %v354_v14, 0 }
   0xe   : > { %s2828_s15 = sshll.u32 %s4205_s10, 5  ;;  %vm506_vm6 = vmpackc.low %vm370_vm3, %vm369_vm2  ;;  %vm559_vm2 = vcmask 121856  }
   0xf   : > { %s327_s18 = scalar_lea.vmem %s4104_s0, %s2828_s15  ;;  %v507_v21 = vsel %vm506_vm6, 65537, %v2897_v0  ;;  %vm484_vm7 = vmpackc.low %vm368_vm5, %vm367_vm4  ;;  %vm571_vm5 = vcmask 138240  }
  0x10   : > { %v2854_v10 = vld [vmem:[%s327_s18 + $0x4] ss:$8 sps:$4 sm:$0xff]   ;;  %v2856_v13 = vld [vmem:[%s327_s18] ss:$8 sps:$4 sm:$0xff]   ;;  %v511_v22 = vrot.slane %v507_v21, %v488_v12  ;;  %v485_v23 = vsel %vm484_vm7, 65537, %v2897_v0  ;;  %v515_v25 = vrot.slane %v507_v21, %v492_v20  ;;  %vm4115_vm7 = vcmask 908288  }
  0x11   : > { %426 = vmatprep.subr.bf16.mxu0 %v2854_v10  ;;  %v2857_v15 = vld [vmem:[%s327_s18 + $0x14] ss:$8 sps:$4 sm:$0x3f]   ;;  %v2859_v16 = vld [vmem:[%s327_s18 + $0x10] ss:$8 sps:$4 sm:$0x3f]   ;;  %v489_v24 = vrot.slane %v485_v23, %v488_v12  ;;  %v493_v26 = vrot.slane %v485_v23, %v492_v20 }
  0x12   : > { %427 = vmatpush1.bf16.msra.mxu0 %v2856_v13  ;;  %v424_v17 = vand.u32 %v2857_v15, %v419_v11  ;;  %v421_v18 = vand.u32 %v2859_v16, %v419_v11  ;;  %516 = vrot.lane.b32.xlu1 %v511_v22, %s2899_s21 }
  0x13   : > { %528 = vrot.lane.b32.xlu0 %v489_v24, %s2900_s22 }
  0x14   : > { %428 = vmatprep.subr.bf16.mxu0 %v424_v17 }
  0x16   : > { %429 = vmatpush1.bf16.msra.mxu0 %v421_v18  ;;  %518 = vrot.lane.b32.xlu1 %v515_v25, %s2899_s21 }
  0x17   : > { %543 = vrot.lane.b32.xlu0 %v511_v22, %s2901_s23 }
  0x19   : > { %2776 = vmatmul.mubr.msk.bf16.vlgmr.msra.gmra.mrb[0].mxu0 %vm412_vm8, %v2860_v19 }
  0x1a   : > { %530 = vrot.lane.b32.xlu1 %v493_v26, %s2900_s22 }
  0x1b   : > { %555 = vrot.lane.b32.xlu0 %v489_v24, %s2902_s24 }
  0x1e   : > { %545 = vrot.lane.b32.xlu1 %v515_v25, %s2901_s23 }
  0x1f   : > { %567 = vrot.lane.b32.xlu0 %v511_v22, %s2903_s25 }
  0x22   : > { %557 = vrot.lane.b32.xlu1 %v493_v26, %s2902_s24 }
  0x23   : > { %494 = vrot.lane.b32.xlu0 %v489_v24, %s2904_s26 }
  0x26   : > { %569 = vrot.lane.b32.xlu1 %v515_v25, %s2903_s25 }
  0x27   : > { %582 = vrot.lane.b32.xlu0 %v2897_v0, %s2900_s22 }
  0x2a   : > { %496 = vrot.lane.b32.xlu1 %v493_v26, %s2904_s26 }
  0x2b   : > { %605 = vrot.lane.b32.xlu0 %v2897_v0, %s2906_s28 }
  0x2e   : > { %593 = vrot.lane.b32.xlu1 %v2897_v0, %s2905_s27 }
  0x84   : > { %v517_v27 = vpop.permute.xlu1 %516 }
  0x86   : > { %v382_v28 = vpop.permute.xlu0 %381 }
  0x88   : > { %v3001_v29 = vpop.permute.xlu1 %518 }
  0x89   : > { %v3029_v44 = vsel %vm520_vm10, %v517_v27, %v3001_v29  ;;  %vm524_vm13 = vcmp.ne.s16.totalorder %v3001_v29, 0 }
  0x8a   : > { %v387_v30 = vpop.permute.xlu0 %386  ;;  %vm523_vm12 = vcmp.ne.s16.totalorder %v3029_v44, 0 }
  0x8c   : > { %v3003_v33 = vpop.permute.xlu1 %530 }
  0x8d   : > { %vm536_vm15 = vcmp.ne.s16.totalorder %v3003_v33, 0 }
  0x8e   : > { %v529_v35 = vpop.permute.xlu0 %528 }
  0x8f   : > { %v3011_v39 = vsel %vm4123_vm9, %v529_v35, %v3003_v33 }
  0x90   : > { %vm535_vm11 = vcmp.ne.s16.totalorder %v3011_v39, 0  ;;  %v546_v51 = vpop.permute.xlu1 %545 }
  0x92   : > { %v3036_v46 = vpop.permute.xlu0 %543 }
  0x93   : > { %vm549_vm14 = vcmp.ne.s16.totalorder %v3036_v46, 0  ;;  %v3065_v54 = vsel %vm547_vm1, %v3036_v46, %v546_v51 }
  0x94   : > { %v558_v55 = vpop.permute.xlu1 %557  ;;  %vm550_vm3 = vcmp.ne.s16.totalorder %v3065_v54, 0 }
  0x96   : > { %v3046_v48 = vpop.permute.xlu0 %555 }
  0x97   : > { %vm561_vm0 = vcmp.ne.s16.totalorder %v3046_v48, 0  ;;  %v3073_v56 = vsel %vm559_vm2, %v3046_v48, %v558_v55  ;;  %vm4116_vm2 = vcmask 1031168   ;;  %v2863_v55 = vld [vmem:[%s4107_s3 + $0x4] ss:$8 sps:$4 sm:$0xff]  }
  0x98   : > { %vm4120_vm4 = vcmp.ne.s16.totalorder %v3073_v56, 0  ;;  %v570_v58 = vpop.permute.xlu1 %569 }
  0x9a   : > { %v3078_v59 = vpop.permute.xlu0 %567 }
  0x9b   : > { %vm573_vm6 = vcmp.ne.s16.totalorder %v3078_v59, 0  ;;  %v3090_v61 = vsel %vm571_vm5, %v3078_v59, %v570_v58 }
  0x9c   : > { %v3092_v62 = vpop.permute.xlu1 %496  ;;  %vm4122_vm8 = vcmp.ne.s16.totalorder %v3090_v61, 0 }
  0x9d   : > { %vm4121_vm10 = vcmp.ne.s16.totalorder %v3092_v62, 0 }
  0x9e   : > { %v495_v63 = vpop.permute.xlu0 %494 }
  0x9f   : > { %v3103_v2 = vsel %vm4115_vm7, %v495_v63, %v3092_v62 }
  0xa0   : > { %vm4114_vm1 = vcmp.ne.s16.totalorder %v3103_v2, 0  ;;  %v594_v7 = vpop.permute.xlu1 %593 }
  0xa2   : > { %v583_v6 = vpop.permute.xlu0 %582 }
  0xa6   : > { %v606_v8 = vpop.permute.xlu0 %605 }
  0xec   : > { %v460_v31 = vpop.f32.mrb[0].mxu0 }
  0xed   : > { %v462_v32 = vpop.f32.mrb[1].mxu0  ;;  %v3005_v36 = vadd.f32 %v460_v31, %v382_v28 }
  0xee   : > { %v464_v34 = vpop.f32.mrb[2].mxu0  ;;  %v3020_v42 = vadd.f32 %v462_v32, %v382_v28 }
  0xef   : > { %v3007_v37 = vadd.f32 %v464_v34, %v387_v30  ;;  %v466_v38 = vpop.f32.mrb[3].mxu0 }
  0xf0   : > { %v3017_v41 = vadd.f32 %v466_v38, %v387_v30 }
  0xf1   : > { %v3015_v40 = vpack.c.bf16 %v3007_v37, %v3005_v36 }
  0xf2   : > { %v474_v43 = vpack.c.bf16 %v3017_v41, %v3020_v42 }
  0xf3   : > { %614 = vrot.lane.b32.xlu1 %v3015_v40, %s2904_s26  ;;  %584 = vrot.lane.b32.xlu0 %v3015_v40, %s2900_s22  ;;  %v538_v45 = vsel %vm535_vm11, %v3015_v40, 0  ;;  %v526_v47 = vsel %vm523_vm12, %v3015_v40, 0  ;;  %v552_v50 = vsel %vm549_vm14, %v3015_v40, 0  ;;  %v564_v52 = vsel %vm561_vm0, %v3015_v40, 0 }
  0xf4   : > { %v527_v49 = vsel %vm524_vm13, %v474_v43, 0  ;;  %v539_v53 = vsel %vm536_vm15, %v474_v43, 0  ;;  %v553_v57 = vsel %vm550_vm3, %v474_v43, 0  ;;  %v565_v60 = vsel %vm4120_vm4, %v474_v43, 0 }
  0xf5   : > { %v576_v1 = vsel %vm573_vm6, %v3015_v40, 0  ;;  %v577_v3 = vsel %vm4122_vm8, %v474_v43, 0  ;;  %v505_v4 = vsel %vm4121_vm10, %v474_v43, 0  ;;  %v504_v5 = vsel %vm4114_vm1, %v3015_v40, 0 }
  0xf6   : > { %vm4117_vm1 = vcmask 916480  }
  0xf7   : > { %586 = vrot.lane.b32.xlu1 %v474_v43, %s2900_s22  ;;  %607 = vrot.lane.b32.xlu0 %v538_v45, %s2906_s28 }
  0xfb   : > { %616 = vrot.lane.b32.xlu0 %v474_v43, %s2904_s26  ;;  %595 = vrot.lane.b32.xlu1 %v526_v47, %s2905_s27 }
  0xff   : > { %597 = vrot.lane.b32.xlu0 %v527_v49, %s2905_s27  ;;  %622 = vrot.lane.b32.xlu1 %v552_v50, %s2907_s29 }
 0x103   : > { %634 = vrot.lane.b32.xlu0 %v564_v52, %s2908_s11  ;;  %609 = vrot.lane.b32.xlu1 %v539_v53, %s2906_s28 }
 0x107   : > { %638 = vrot.lane.b32.xlu0 %v2897_v0, %s2908_s11  ;;  %626 = vrot.lane.b32.xlu1 %v2897_v0, %s2907_s29 }
 0x10b   : > { %624 = vrot.lane.b32.xlu0 %v553_v57, %s2907_s29  ;;  %646 = vrot.lane.b32.xlu1 %v3015_v40, %s2909_s12 }
 0x10f   : > { %648 = vrot.lane.b32.xlu0 %v474_v43, %s2909_s12  ;;  %636 = vrot.lane.b32.xlu1 %v565_v60, %s2908_s11 }
 0x113   : > { %658 = vrot.lane.b32.xlu0 %v576_v1, %s2910_s13  ;;  %650 = vrot.lane.b32.xlu1 %v2897_v0, %s2909_s12 }
 0x117   : > { %662 = vrot.lane.b32.xlu0 %v2897_v0, %s2910_s13  ;;  %660 = vrot.lane.b32.xlu1 %v577_v3, %s2910_s13  ;;  %v479_v3 = vld [vmem:[%s4108_s4] sm:$0xff] }
 0x11b   : > { %693 = vrot.lane.b32.xlu0 %v505_v4, %s2903_s25  ;;  %691 = vrot.lane.b32.xlu1 %v504_v5, %s2903_s25  ;;  %v480_v4 = vld [vmem:[%s4108_s4 + $0x8] sm:$0xff] }
 0x11f   : > { %689 = vrot.lane.b32.xlu1 %v2897_v0, %s2903_s25 }
 0x165   : > { %v615_v9 = vpop.permute.xlu1 %614  ;;  %v585_v10 = vpop.permute.xlu0 %584 }
 0x166   : > { %v588_v11 = vsel %vm4123_vm9, %v583_v6, %v585_v10 }
 0x167   : > { %695 = vrot.lane.b32.xlu0 %v588_v11, %s2903_s25 }
 0x169   : > { %v587_v12 = vpop.permute.xlu1 %586  ;;  %v608_v13 = vpop.permute.xlu0 %607 }
 0x16a   : > { %699 = vrot.lane.b32.xlu1 %v587_v12, %s2903_s25  ;;  %v589_v19 = vsel %vm4123_vm9, %v585_v10, %v587_v12  ;;  %v612_v24 = vsel %vm4117_vm1, %v606_v8, %v608_v13 }
 0x16d   : > { %v617_v14 = vpop.permute.xlu0 %616  ;;  %v596_v15 = vpop.permute.xlu1 %595 }
 0x16e   : > { %717 = vrot.lane.b32.xlu0 %v617_v14, %s2903_s25  ;;  %v600_v16 = vsel %vm4116_vm2, %v594_v7, %v596_v15  ;;  %v618_v25 = vsel %vm4115_vm7, %v615_v9, %v617_v14  ;;  %vm652_vm7 = vcmask 777216  }
 0x16f   : > { %701 = vrot.lane.b32.xlu1 %v600_v16, %s2903_s25 }
 0x171   : > { %v598_v17 = vpop.permute.xlu0 %597  ;;  %v623_v18 = vpop.permute.xlu1 %622 }
 0x172   : > { %697 = vrot.lane.b32.xlu0 %v589_v19, %s2903_s25  ;;  %v601_v28 = vsel %vm4116_vm2, %v596_v15, %v598_v17  ;;  %vm4118_vm2 = vcmask 900096  }
 0x175   : > { %v635_v20 = vpop.permute.xlu0 %634  ;;  %v610_v21 = vpop.permute.xlu1 %609 }
 0x176   : > { %705 = vrot.lane.b32.xlu0 %v598_v17, %s2903_s25  ;;  %711 = vrot.lane.b32.xlu1 %v610_v21, %s2903_s25  ;;  %v613_v32 = vsel %vm4117_vm1, %v608_v13, %v610_v21  ;;  %vm4119_vm1 = vcmask 785408  }
 0x179   : > { %v639_v22 = vpop.permute.xlu0 %638  ;;  %v627_v23 = vpop.permute.xlu1 %626 }
 0x17a   : > { %707 = vrot.lane.b32.xlu0 %v612_v24, %s2903_s25  ;;  %715 = vrot.lane.b32.xlu1 %v618_v25, %s2903_s25 }
 0x17d   : > { %v625_v26 = vpop.permute.xlu0 %624  ;;  %v647_v27 = vpop.permute.xlu1 %646 }
 0x17e   : > { %719 = vrot.lane.b32.xlu0 %v623_v18, %s2903_s25  ;;  %703 = vrot.lane.b32.xlu1 %v601_v28, %s2903_s25  ;;  %v629_v45 = vsel %vm4118_vm2, %v623_v18, %v625_v26  ;;  %v630_v47 = vsel %vm4118_vm2, %v625_v26, %v627_v23  ;;  %vm779_vm2 = vcmask 130048  }
 0x17f   : > { %2779 = vmatprep.mubr.msk.bf16.mxu1 %vm779_vm2, %v2863_v55 }
 0x181   : > { %v649_v30 = vpop.permute.xlu0 %648  ;;  %v637_v31 = vpop.permute.xlu1 %636 }
 0x182   : > { %709 = vrot.lane.b32.xlu0 %v613_v32, %s2903_s25  ;;  %713 = vrot.lane.b32.xlu1 %v615_v9, %s2903_s25  ;;  %v653_v38 = vsel %vm652_vm7, %v647_v27, %v649_v30  ;;  %v642_v51 = vsel %vm4119_vm1, %v637_v31, %v639_v22  ;;  %v641_v52 = vsel %vm4119_vm1, %v635_v20, %v637_v31  ;;  %vm664_vm1 = vcmask 769024  }
 0x185   : > { %v659_v34 = vpop.permute.xlu0 %658  ;;  %v651_v35 = vpop.permute.xlu1 %650 }
 0x186   : > { %733 = vrot.lane.b32.xlu0 %v653_v38, %s2903_s25  ;;  %725 = vrot.lane.b32.xlu1 %v635_v20, %s2903_s25  ;;  %v654_v58 = vsel %vm652_vm7, %v649_v30, %v651_v35 }
 0x189   : > { %v663_v40 = vpop.permute.xlu0 %662  ;;  %v661_v43 = vpop.permute.xlu1 %660 }
 0x18a   : > { %721 = vrot.lane.b32.xlu0 %v629_v45, %s2903_s25  ;;  %723 = vrot.lane.b32.xlu1 %v630_v47, %s2903_s25  ;;  %v666_v63 = vsel %vm664_vm1, %v661_v43, %v663_v40  ;;  %v665_v1 = vsel %vm664_vm1, %v659_v34, %v661_v43 }
 0x18d   : > { %v694_v49 = vpop.permute.xlu0 %693  ;;  %v692_v50 = vpop.permute.xlu1 %691 }
 0x18e   : > { %729 = vrot.lane.b32.xlu0 %v642_v51, %s2903_s25  ;;  %727 = vrot.lane.b32.xlu1 %v641_v52, %s2903_s25  ;;  %v744_v53 = vsel %vm571_vm5, %v692_v50, %v694_v49 }
 0x18f   : > { %783 = vmatprep.subr.bf16.mxu1 %v744_v53 }
 0x191   : > { %v690_v57 = vpop.permute.xlu1 %689 }
 0x192   : > { %731 = vrot.lane.b32.xlu0 %v647_v27, %s2903_s25  ;;  %735 = vrot.lane.b32.xlu1 %v654_v58, %s2903_s25  ;;  %v743_v60 = vsel %vm571_vm5, %v690_v57, %v692_v50  ;;  %v2861_v57 = vld [vmem:[%s4107_s3] ss:$8 sps:$4 sm:$0xff]  }
 0x193   : > { %784 = vmatpush1.bf16.msra.mxu1 %v743_v60 }
 0x196   : > { %741 = vrot.lane.b32.xlu0 %v666_v63, %s2903_s25  ;;  %739 = vrot.lane.b32.xlu1 %v665_v1, %s2903_s25 }
 0x19a   : > { %669 = vperm.xlu0 %2852, %v479_v3   ;;  %737 = vrot.lane.b32.xlu1 %v659_v34, %s2903_s25 }
 0x19e   : > { %674 = vperm.xlu1 %2853, %v480_v4   ;;  %871 = vrot.lane.b32.xlu0 %v2897_v0, %s2900_s22 }
 0x1a2   : > { %893 = vrot.lane.b32.xlu0 %v2897_v0, %s2906_s28  ;;  %882 = vrot.lane.b32.xlu1 %v2897_v0, %s2905_s27 }
 0x1d9   : > { %v696_v5 = vpop.permute.xlu0 %695 }
 0x1dc   : > { %v700_v6 = vpop.permute.xlu1 %699 }
 0x1e0   : > { %v718_v7 = vpop.permute.xlu0 %717 }
 0x1e1   : > { %v702_v8 = vpop.permute.xlu1 %701 }
 0x1e4   : > { %v698_v9 = vpop.permute.xlu0 %697 }
 0x1e5   : > { %v746_v10 = vsel %vm571_vm5, %v698_v9, %v700_v6  ;;  %v745_v11 = vsel %vm571_vm5, %v696_v5, %v698_v9 }
 0x1e6   : > { %785 = vmatprep.subr.bf16.mxu1 %v746_v10 }
 0x1e7   : > { %786 = vmatpush1.bf16.msra.mxu1 %v745_v11 }
 0x1e8   : > { %v706_v12 = vpop.permute.xlu0 %705  ;;  %v712_v13 = vpop.permute.xlu1 %711 }
 0x1ec   : > { %v708_v14 = vpop.permute.xlu0 %707  ;;  %v716_v15 = vpop.permute.xlu1 %715 }
 0x1ed   : > { %v752_v24 = vsel %vm571_vm5, %v716_v15, %v718_v7 }
 0x1f0   : > { %v720_v16 = vpop.permute.xlu0 %719  ;;  %v704_v17 = vpop.permute.xlu1 %703 }
 0x1f1   : > { %v748_v18 = vsel %vm571_vm5, %v704_v17, %v706_v12  ;;  %v747_v19 = vsel %vm571_vm5, %v702_v8, %v704_v17 }
 0x1f2   : > { %787 = vmatprep.subr.bf16.mxu1 %v748_v18 }
 0x1f3   : > { %788 = vmatpush1.bf16.msra.mxu1 %v747_v19 }
 0x1f4   : > { %v710_v20 = vpop.permute.xlu0 %709  ;;  %v714_v21 = vpop.permute.xlu1 %713 }
 0x1f5   : > { %v750_v22 = vsel %vm571_vm5, %v710_v20, %v712_v13  ;;  %v749_v23 = vsel %vm571_vm5, %v708_v14, %v710_v20  ;;  %v751_v27 = vsel %vm571_vm5, %v714_v21, %v716_v15 }
 0x1f6   : > { %789 = vmatprep.subr.bf16.mxu1 %v750_v22 }
 0x1f7   : > { %790 = vmatpush1.bf16.msra.mxu1 %v749_v23 }
 0x1f8   : > { %v734_v25 = vpop.permute.xlu0 %733  ;;  %791 = vmatprep.subr.bf16.mxu1 %v752_v24  ;;  %v726_v26 = vpop.permute.xlu1 %725 }
 0x1fb   : > { %792 = vmatpush1.bf16.msra.mxu1 %v751_v27 }
 0x1fc   : > { %v722_v28 = vpop.permute.xlu0 %721  ;;  %v724_v30 = vpop.permute.xlu1 %723 }
 0x1fd   : > { %v754_v31 = vsel %vm571_vm5, %v722_v28, %v724_v30  ;;  %v753_v32 = vsel %vm571_vm5, %v720_v16, %v722_v28 }
 0x1fe   : > { %793 = vmatprep.subr.bf16.mxu1 %v754_v31 }
 0x1ff   : > { %794 = vmatpush1.bf16.msra.mxu1 %v753_v32 }
 0x200   : > { %v730_v34 = vpop.permute.xlu0 %729  ;;  %v728_v35 = vpop.permute.xlu1 %727 }
 0x201   : > { %v756_v38 = vsel %vm571_vm5, %v728_v35, %v730_v34  ;;  %v755_v40 = vsel %vm571_vm5, %v726_v26, %v728_v35 }
 0x202   : > { %795 = vmatprep.subr.bf16.mxu1 %v756_v38 }
 0x203   : > { %796 = vmatpush1.bf16.msra.mxu1 %v755_v40 }
 0x204   : > { %v732_v43 = vpop.permute.xlu0 %731  ;;  %v736_v45 = vpop.permute.xlu1 %735 }
 0x205   : > { %v758_v47 = vsel %vm571_vm5, %v734_v25, %v736_v45  ;;  %v757_v49 = vsel %vm571_vm5, %v732_v43, %v734_v25 }
 0x206   : > { %797 = vmatprep.subr.bf16.mxu1 %v758_v47 }
 0x207   : > { %798 = vmatpush1.bf16.msra.mxu1 %v757_v49 }
 0x208   : > { %v742_v50 = vpop.permute.xlu0 %741  ;;  %v740_v51 = vpop.permute.xlu1 %739 }
 0x209   : > { %v760_v52 = vsel %vm571_vm5, %v740_v51, %v742_v50 }
 0x20a   : > { %799 = vmatprep.subr.bf16.mxu1 %v760_v52 }
 0x20c   : > { %v738_v53 = vpop.permute.xlu1 %737 }
 0x20d   : > { %v759_v55 = vsel %vm571_vm5, %v738_v53, %v740_v51 }
 0x20e   : > { %800 = vmatpush1.bf16.msra.mxu1 %v759_v55 }
 0x211   : > { %816 = vmatmul.mubr.bf16.vlgmr.msra.gmra.mrb[0].mxu1 %v2861_v57 }
 0x219   : > { %v670_v58 = vpop.permute.xlu0 %669 }
 0x21d   : > { %v675_v63 = vpop.permute.xlu1 %674  ;;  %v872_v32 = vpop.permute.xlu0 %871 }
 0x221   : > { %v894_v34 = vpop.permute.xlu0 %893  ;;  %v883_v35 = vpop.permute.xlu1 %882 }
 0x2e4   : > { %v817_v60 = vpop.f32.mrb[0].mxu1 }
 0x2e5   : > { %v818_v1 = vadd.f32 %v817_v60, %v670_v58  ;;  %v819_v3 = vpop.f32.mrb[1].mxu1 }
 0x2e6   : > { %v820_v4 = vadd.f32 %v819_v3, %v670_v58  ;;  %v821_v5 = vpop.f32.mrb[2].mxu1 }
 0x2e7   : > { %v826_v6 = vmul.f32 0.05, %v818_v1  ;;  %v822_v7 = vadd.f32 %v821_v5, %v675_v63  ;;  %v823_v8 = vpop.f32.mrb[3].mxu1 }
 0x2e8   : > { %v827_v9 = vmul.f32 0.05, %v820_v4  ;;  %v824_v10 = vadd.f32 %v823_v8, %v675_v63 }
 0x2e9   : > { %v828_v11 = vmul.f32 0.05, %v822_v7  ;;  %v830_v13 = vmax.f32 %v818_v1, %v826_v6 }
 0x2ea   : > { %v829_v12 = vmul.f32 0.05, %v824_v10  ;;  %v831_v15 = vmax.f32 %v820_v4, %v827_v9 }
 0x2eb   : > { %v832_v14 = vmax.f32 %v822_v7, %v828_v11 }
 0x2ec   : > { %v833_v16 = vmax.f32 %v824_v10, %v829_v12 }
 0x2ed   : > { %v834_v17 = vpack.c.bf16 %v832_v14, %v830_v13 }
 0x2ee   : > { %v835_v18 = vpack.c.bf16 %v833_v16, %v831_v15 }
 0x2ef   : > { %901 = vrot.lane.b32.xlu1 %v834_v17, %s2904_s26  ;;  %873 = vrot.lane.b32.xlu0 %v834_v17, %s2900_s22  ;;  %v854_v19 = vsel %vm535_vm11, %v834_v17, 0  ;;  %v851_v20 = vsel %vm523_vm12, %v834_v17, 0  ;;  %v859_v22 = vsel %vm549_vm14, %v834_v17, 0  ;;  %v862_v23 = vsel %vm561_vm0, %v834_v17, 0 }
 0x2f0   : > { %v852_v21 = vsel %vm524_vm13, %v835_v18, 0  ;;  %v855_v24 = vsel %vm536_vm15, %v835_v18, 0  ;;  %v860_v25 = vsel %vm550_vm3, %v835_v18, 0  ;;  %v863_v26 = vsel %vm4120_vm4, %v835_v18, 0 }
 0x2f1   : > { %v865_v27 = vsel %vm573_vm6, %v834_v17, 0  ;;  %v866_v28 = vsel %vm4122_vm8, %v835_v18, 0  ;;  %v849_v30 = vsel %vm4121_vm10, %v835_v18, 0  ;;  %vm4124_vm4 = vcmp.ne.s16.totalorder %v3103_v2, 0 }
 0x2f2   : > { %v848_v31 = vsel %vm4124_vm4, %v834_v17, 0  ;;  %vm4125_vm4 = vcmask 1031168   ;;  %vm4126_vm10 = vcmask 916480   ;;  %vm4127_vm8 = vcmask 908288  }
 0x2f3   : > { %875 = vrot.lane.b32.xlu1 %v835_v18, %s2900_s22  ;;  %895 = vrot.lane.b32.xlu0 %v854_v19, %s2906_s28 }
 0x2f7   : > { %903 = vrot.lane.b32.xlu0 %v835_v18, %s2904_s26  ;;  %884 = vrot.lane.b32.xlu1 %v851_v20, %s2905_s27 }
 0x2fb   : > { %886 = vrot.lane.b32.xlu0 %v852_v21, %s2905_s27  ;;  %909 = vrot.lane.b32.xlu1 %v859_v22, %s2907_s29  ;;  %v2864_v22 = vld [vmem:[%s4107_s3 + $0x14] ss:$8 sps:$4 sm:$0xff]  }
 0x2fc   : > { %2786 = vmatprep.mubr.msk.bf16.mxu1 %vm779_vm2, %v2864_v22 }
 0x2ff   : > { %920 = vrot.lane.b32.xlu0 %v862_v23, %s2908_s11  ;;  %897 = vrot.lane.b32.xlu1 %v855_v24, %s2906_s28 }
 0x303   : > { %924 = vrot.lane.b32.xlu0 %v2897_v0, %s2908_s11  ;;  %913 = vrot.lane.b32.xlu1 %v2897_v0, %s2907_s29 }
 0x307   : > { %911 = vrot.lane.b32.xlu0 %v860_v25, %s2907_s29  ;;  %931 = vrot.lane.b32.xlu1 %v834_v17, %s2909_s12 }
 0x30b   : > { %933 = vrot.lane.b32.xlu0 %v835_v18, %s2909_s12  ;;  %922 = vrot.lane.b32.xlu1 %v863_v26, %s2908_s11 }
 0x30f   : > { %942 = vrot.lane.b32.xlu0 %v865_v27, %s2910_s13  ;;  %935 = vrot.lane.b32.xlu1 %v2897_v0, %s2909_s12 }
 0x313   : > { %946 = vrot.lane.b32.xlu0 %v2897_v0, %s2910_s13  ;;  %944 = vrot.lane.b32.xlu1 %v866_v28, %s2910_s13  ;;  %v2782_v28 = vld [vmem:[%s4108_s4 + $0x10] sm:$0xff] }
 0x317   : > { %976 = vrot.lane.b32.xlu0 %v849_v30, %s2903_s25  ;;  %974 = vrot.lane.b32.xlu1 %v848_v31, %s2903_s25  ;;  %v2783_v30 = vld [vmem:[%s4108_s4 + $0x18] sm:$0xff] }
 0x31b   : > { %972 = vrot.lane.b32.xlu1 %v2897_v0, %s2903_s25 }
 0x361   : > { %v874_v38 = vpop.permute.xlu0 %873  ;;  %v902_v40 = vpop.permute.xlu1 %901 }
 0x362   : > { %v877_v43 = vsel %vm4123_vm9, %v872_v32, %v874_v38 }
 0x363   : > { %978 = vrot.lane.b32.xlu0 %v877_v43, %s2903_s25 }
 0x365   : > { %v896_v45 = vpop.permute.xlu0 %895  ;;  %v876_v47 = vpop.permute.xlu1 %875 }
 0x366   : > { %982 = vrot.lane.b32.xlu1 %v876_v47, %s2903_s25  ;;  %v878_v55 = vsel %vm4123_vm9, %v874_v38, %v876_v47  ;;  %v899_v1 = vsel %vm4126_vm10, %v894_v34, %v896_v45  ;;  %vm4128_vm9 = vmmov %vm4126_vm10 }
 0x369   : > { %v904_v49 = vpop.permute.xlu0 %903  ;;  %v885_v50 = vpop.permute.xlu1 %884 }
 0x36a   : > { %1000 = vrot.lane.b32.xlu0 %v904_v49, %s2903_s25  ;;  %v888_v51 = vsel %vm4125_vm4, %v883_v35, %v885_v50  ;;  %v905_v3 = vsel %vm4127_vm8, %v902_v40, %v904_v49  ;;  %vm4129_vm8 = vcmask 900096  }
 0x36b   : > { %984 = vrot.lane.b32.xlu1 %v888_v51, %s2903_s25  ;;  %vm4130_vm10 = vmmov %vm4129_vm8 }
 0x36d   : > { %v887_v52 = vpop.permute.xlu0 %886  ;;  %v910_v53 = vpop.permute.xlu1 %909 }
 0x36e   : > { %980 = vrot.lane.b32.xlu0 %v878_v55, %s2903_s25  ;;  %v889_v6 = vsel %vm4125_vm4, %v885_v50, %v887_v52 }
 0x371   : > { %v921_v57 = vpop.permute.xlu0 %920  ;;  %v898_v58 = vpop.permute.xlu1 %897 }
 0x372   : > { %988 = vrot.lane.b32.xlu0 %v887_v52, %s2903_s25  ;;  %994 = vrot.lane.b32.xlu1 %v898_v58, %s2903_s25  ;;  %v900_v9 = vsel %vm4128_vm9, %v896_v45, %v898_v58  ;;  %vm4131_vm9 = vcmask 785408  }
 0x373   : > { %vm4132_vm4 = vmmov %vm4131_vm9 }
 0x375   : > { %v925_v60 = vpop.permute.xlu0 %924  ;;  %v914_v63 = vpop.permute.xlu1 %913 }
 0x376   : > { %990 = vrot.lane.b32.xlu0 %v899_v1, %s2903_s25  ;;  %998 = vrot.lane.b32.xlu1 %v905_v3, %s2903_s25 }
 0x379   : > { %v912_v4 = vpop.permute.xlu0 %911  ;;  %v932_v5 = vpop.permute.xlu1 %931 }
 0x37a   : > { %1002 = vrot.lane.b32.xlu0 %v910_v53, %s2903_s25  ;;  %986 = vrot.lane.b32.xlu1 %v889_v6, %s2903_s25  ;;  %v916_v15 = vsel %vm4129_vm8, %v912_v4, %v914_v63  ;;  %v915_v16 = vsel %vm4130_vm10, %v910_v53, %v912_v4  ;;  %vm4133_vm8 = vcmp.ne.s16.totalorder %v3073_v56, 0  ;;  %vm4134_vm10 = vcmp.ne.s16.totalorder %v3090_v61, 0 }
 0x37d   : > { %v934_v7 = vpop.permute.xlu0 %933  ;;  %v923_v8 = vpop.permute.xlu1 %922 }
 0x37e   : > { %992 = vrot.lane.b32.xlu0 %v900_v9, %s2903_s25  ;;  %996 = vrot.lane.b32.xlu1 %v902_v40, %s2903_s25  ;;  %v937_v12 = vsel %vm652_vm7, %v932_v5, %v934_v7  ;;  %v927_v19 = vsel %vm4131_vm9, %v923_v8, %v925_v60  ;;  %v926_v20 = vsel %vm4132_vm4, %v921_v57, %v923_v8  ;;  %vm4135_vm9 = vcmp.ne.s16.totalorder %v3092_v62, 0 }
 0x37f   : > { %vm4136_vm4 = vcmp.ne.s16.totalorder %v3103_v2, 0 }
 0x381   : > { %v943_v10 = vpop.permute.xlu0 %942  ;;  %v936_v11 = vpop.permute.xlu1 %935 }
 0x382   : > { %1008 = vrot.lane.b32.xlu1 %v921_v57, %s2903_s25  ;;  %1016 = vrot.lane.b32.xlu0 %v937_v12, %s2903_s25  ;;  %v938_v23 = vsel %vm652_vm7, %v934_v7, %v936_v11 }
 0x385   : > { %v947_v13 = vpop.permute.xlu0 %946  ;;  %v945_v14 = vpop.permute.xlu1 %944 }
 0x386   : > { %1006 = vrot.lane.b32.xlu1 %v916_v15, %s2903_s25  ;;  %1004 = vrot.lane.b32.xlu0 %v915_v16, %s2903_s25  ;;  %v949_v26 = vsel %vm664_vm1, %v945_v14, %v947_v13  ;;  %v948_v27 = vsel %vm664_vm1, %v943_v10, %v945_v14 }
 0x389   : > { %v977_v17 = vpop.permute.xlu0 %976  ;;  %v975_v18 = vpop.permute.xlu1 %974 }
 0x38a   : > { %1012 = vrot.lane.b32.xlu0 %v927_v19, %s2903_s25  ;;  %1010 = vrot.lane.b32.xlu1 %v926_v20, %s2903_s25  ;;  %v1027_v21 = vsel %vm571_vm5, %v975_v18, %v977_v17 }
 0x38b   : > { %1065 = vmatprep.subr.bf16.mxu1 %v1027_v21 }
 0x38d   : > { %v973_v24 = vpop.permute.xlu1 %972 }
 0x38e   : > { %v1026_v25 = vsel %vm571_vm5, %v973_v24, %v975_v18  ;;  %1014 = vrot.lane.b32.xlu0 %v932_v5, %s2903_s25  ;;  %1018 = vrot.lane.b32.xlu1 %v938_v23, %s2903_s25  ;;  %v2866_v23 = vld [vmem:[%s4107_s3 + $0x10] ss:$8 sps:$4 sm:$0xff]  }
 0x38f   : > { %1066 = vmatpush1.bf16.msra.mxu1 %v1026_v25 }
 0x392   : > { %1024 = vrot.lane.b32.xlu0 %v949_v26, %s2903_s25  ;;  %1022 = vrot.lane.b32.xlu1 %v948_v27, %s2903_s25 }
 0x396   : > { %952 = vperm.xlu0 %2852, %v2782_v28   ;;  %1020 = vrot.lane.b32.xlu1 %v943_v10, %s2903_s25 }
 0x39a   : > { %957 = vperm.xlu1 %2853, %v2783_v30   ;;  %1159 = vrot.lane.b32.xlu0 %v2897_v0, %s2900_s22 }
 0x39e   : > { %1181 = vrot.lane.b32.xlu0 %v2897_v0, %s2906_s28  ;;  %1170 = vrot.lane.b32.xlu1 %v2897_v0, %s2905_s27 }
 0x3d5   : > { %v979_v31 = vpop.permute.xlu0 %978 }
 0x3d8   : > { %v983_v32 = vpop.permute.xlu1 %982 }
 0x3dc   : > { %v1001_v34 = vpop.permute.xlu0 %1000 }
 0x3dd   : > { %v985_v35 = vpop.permute.xlu1 %984 }
 0x3e0   : > { %v981_v38 = vpop.permute.xlu0 %980 }
 0x3e1   : > { %v1029_v40 = vsel %vm571_vm5, %v981_v38, %v983_v32  ;;  %v1028_v43 = vsel %vm571_vm5, %v979_v31, %v981_v38 }
 0x3e2   : > { %1067 = vmatprep.subr.bf16.mxu1 %v1029_v40 }
 0x3e3   : > { %1068 = vmatpush1.bf16.msra.mxu1 %v1028_v43 }
 0x3e4   : > { %v989_v45 = vpop.permute.xlu0 %988  ;;  %v995_v47 = vpop.permute.xlu1 %994 }
 0x3e8   : > { %v991_v49 = vpop.permute.xlu0 %990  ;;  %v999_v50 = vpop.permute.xlu1 %998 }
 0x3e9   : > { %v1035_v1 = vsel %vm571_vm5, %v999_v50, %v1001_v34 }
 0x3ec   : > { %v1003_v51 = vpop.permute.xlu0 %1002  ;;  %v987_v52 = vpop.permute.xlu1 %986 }
 0x3ed   : > { %v1031_v53 = vsel %vm571_vm5, %v987_v52, %v989_v45  ;;  %v1030_v55 = vsel %vm571_vm5, %v985_v35, %v987_v52 }
 0x3ee   : > { %1069 = vmatprep.subr.bf16.mxu1 %v1031_v53 }
 0x3ef   : > { %1070 = vmatpush1.bf16.msra.mxu1 %v1030_v55 }
 0x3f0   : > { %v993_v57 = vpop.permute.xlu0 %992  ;;  %v997_v58 = vpop.permute.xlu1 %996 }
 0x3f1   : > { %v1033_v60 = vsel %vm571_vm5, %v993_v57, %v995_v47  ;;  %v1032_v63 = vsel %vm571_vm5, %v991_v49, %v993_v57  ;;  %v1034_v5 = vsel %vm571_vm5, %v997_v58, %v999_v50 }
 0x3f2   : > { %1071 = vmatprep.subr.bf16.mxu1 %v1033_v60 }
 0x3f3   : > { %1072 = vmatpush1.bf16.msra.mxu1 %v1032_v63 }
 0x3f4   : > { %v1017_v3 = vpop.permute.xlu0 %1016  ;;  %1073 = vmatprep.subr.bf16.mxu1 %v1035_v1  ;;  %v1009_v4 = vpop.permute.xlu1 %1008 }
 0x3f7   : > { %1074 = vmatpush1.bf16.msra.mxu1 %v1034_v5 }
 0x3f8   : > { %v1005_v6 = vpop.permute.xlu0 %1004  ;;  %v1007_v7 = vpop.permute.xlu1 %1006 }
 0x3f9   : > { %v1037_v8 = vsel %vm571_vm5, %v1005_v6, %v1007_v7  ;;  %v1036_v9 = vsel %vm571_vm5, %v1003_v51, %v1005_v6 }
 0x3fa   : > { %1075 = vmatprep.subr.bf16.mxu1 %v1037_v8 }
 0x3fb   : > { %1076 = vmatpush1.bf16.msra.mxu1 %v1036_v9 }
 0x3fc   : > { %v1013_v10 = vpop.permute.xlu0 %1012  ;;  %v1011_v11 = vpop.permute.xlu1 %1010 }
 0x3fd   : > { %v1039_v12 = vsel %vm571_vm5, %v1011_v11, %v1013_v10  ;;  %v1038_v13 = vsel %vm571_vm5, %v1009_v4, %v1011_v11 }
 0x3fe   : > { %1077 = vmatprep.subr.bf16.mxu1 %v1039_v12 }
 0x3ff   : > { %1078 = vmatpush1.bf16.msra.mxu1 %v1038_v13 }
 0x400   : > { %v1015_v14 = vpop.permute.xlu0 %1014  ;;  %v1019_v15 = vpop.permute.xlu1 %1018 }
 0x401   : > { %v1040_v16 = vsel %vm571_vm5, %v1015_v14, %v1017_v3  ;;  %v1041_v17 = vsel %vm571_vm5, %v1017_v3, %v1019_v15 }
 0x402   : > { %1079 = vmatprep.subr.bf16.mxu1 %v1041_v17 }
 0x403   : > { %1080 = vmatpush1.bf16.msra.mxu1 %v1040_v16 }
 0x404   : > { %v1025_v18 = vpop.permute.xlu0 %1024  ;;  %v1023_v19 = vpop.permute.xlu1 %1022 }
 0x405   : > { %v1043_v20 = vsel %vm571_vm5, %v1023_v19, %v1025_v18 }
 0x406   : > { %1081 = vmatprep.subr.bf16.mxu1 %v1043_v20 }
 0x408   : > { %v1021_v21 = vpop.permute.xlu1 %1020 }
 0x409   : > { %v1042_v22 = vsel %vm571_vm5, %v1021_v21, %v1023_v19 }
 0x40a   : > { %1082 = vmatpush1.bf16.msra.mxu1 %v1042_v22 }
 0x40d   : > { %1098 = vmatmul.mubr.bf16.vlgmr.msra.gmra.mrb[4].mxu1 %v2866_v23 }
 0x415   : > { %v953_v24 = vpop.permute.xlu0 %952 }
 0x419   : > { %v958_v28 = vpop.permute.xlu1 %957  ;;  %v1160_v13 = vpop.permute.xlu0 %1159 }
 0x41d   : > { %v1182_v14 = vpop.permute.xlu0 %1181  ;;  %v1171_v15 = vpop.permute.xlu1 %1170 }
 0x4e0   : > { %v1099_v25 = vpop.f32.mrb[4].mxu1 }
 0x4e1   : > { %v1100_v26 = vadd.f32 %v1099_v25, %v953_v24  ;;  %v1101_v27 = vpop.f32.mrb[5].mxu1 }
 0x4e2   : > { %v1102_v30 = vadd.f32 %v1101_v27, %v953_v24  ;;  %v1103_v31 = vpop.f32.mrb[6].mxu1 }
 0x4e3   : > { %v1108_v32 = vmul.f32 0.05, %v1100_v26  ;;  %v1104_v34 = vadd.f32 %v1103_v31, %v958_v28  ;;  %v1105_v35 = vpop.f32.mrb[7].mxu1 }
 0x4e4   : > { %v1106_v38 = vadd.f32 %v1105_v35, %v958_v28  ;;  %v1109_v43 = vmul.f32 0.05, %v1102_v30 }
 0x4e5   : > { %v1112_v40 = vmax.f32 %v1100_v26, %v1108_v32  ;;  %v1110_v45 = vmul.f32 0.05, %v1104_v34 }
 0x4e6   : > { %v1111_v47 = vmul.f32 0.05, %v1106_v38  ;;  %v1113_v52 = vmax.f32 %v1102_v30, %v1109_v43 }
 0x4e7   : > { %v1114_v49 = vmax.f32 %v1104_v34, %v1110_v45  ;;  %v3326_v51 = vadd.f32 %v1112_v40, %v3005_v36 }
 0x4e8   : > { %v1115_v50 = vmax.f32 %v1106_v38, %v1111_v47  ;;  %v3339_v58 = vadd.f32 %v1113_v52, %v3020_v42 }
 0x4e9   : > { %v3329_v53 = vadd.f32 %v1114_v49, %v3007_v37 }
 0x4ea   : > { %v3336_v57 = vadd.f32 %v1115_v50, %v3017_v41 }
 0x4eb   : > { %v3333_v55 = vpack.c.bf16 %v3329_v53, %v3326_v51 }
 0x4ec   : > { %v3347_v60 = vpack.c.bf16 %v3336_v57, %v3339_v58 }
 0x4ed   : > { %1189 = vrot.lane.b32.xlu1 %v3333_v55, %s2904_s26  ;;  %1161 = vrot.lane.b32.xlu0 %v3333_v55, %s2900_s22  ;;  %v1142_v63 = vsel %vm535_vm11, %v3333_v55, 0  ;;  %v1139_v1 = vsel %vm523_vm12, %v3333_v55, 0  ;;  %v1147_v4 = vsel %vm549_vm14, %v3333_v55, 0  ;;  %v1150_v5 = vsel %vm561_vm0, %v3333_v55, 0 }
 0x4ee   : > { %v1140_v3 = vsel %vm524_vm13, %v3347_v60, 0  ;;  %v1143_v6 = vsel %vm536_vm15, %v3347_v60, 0  ;;  %v1148_v7 = vsel %vm550_vm3, %v3347_v60, 0  ;;  %v1151_v8 = vsel %vm4133_vm8, %v3347_v60, 0 }
 0x4ef   : > { %v1153_v9 = vsel %vm573_vm6, %v3333_v55, 0  ;;  %v1154_v10 = vsel %vm4134_vm10, %v3347_v60, 0  ;;  %v1137_v11 = vsel %vm4135_vm9, %v3347_v60, 0  ;;  %v1136_v12 = vsel %vm4136_vm4, %v3333_v55, 0 }
 0x4f0   : > { %vm4137_vm8 = vcmask 1039360   ;;  %vm4138_vm10 = vcmask 1031168   ;;  %vm4140_vm4 = vcmask 916480  }
 0x4f1   : > { %1163 = vrot.lane.b32.xlu1 %v3347_v60, %s2900_s22  ;;  %1183 = vrot.lane.b32.xlu0 %v1142_v63, %s2906_s28  ;;  %vm4139_vm9 = vmmov %vm4137_vm8 }
 0x4f5   : > { %1191 = vrot.lane.b32.xlu0 %v3347_v60, %s2904_s26  ;;  %1172 = vrot.lane.b32.xlu1 %v1139_v1, %s2905_s27 }
 0x4f9   : > { %1174 = vrot.lane.b32.xlu0 %v1140_v3, %s2905_s27  ;;  %1197 = vrot.lane.b32.xlu1 %v1147_v4, %s2907_s29 }
 0x4fd   : > { %1208 = vrot.lane.b32.xlu0 %v1150_v5, %s2908_s11  ;;  %1185 = vrot.lane.b32.xlu1 %v1143_v6, %s2906_s28 }
 0x501   : > { %1212 = vrot.lane.b32.xlu0 %v2897_v0, %s2908_s11  ;;  %1201 = vrot.lane.b32.xlu1 %v2897_v0, %s2907_s29 }
 0x505   : > { %1199 = vrot.lane.b32.xlu0 %v1148_v7, %s2907_s29  ;;  %1219 = vrot.lane.b32.xlu1 %v3333_v55, %s2909_s12 }
 0x509   : > { %1221 = vrot.lane.b32.xlu0 %v3347_v60, %s2909_s12  ;;  %1210 = vrot.lane.b32.xlu1 %v1151_v8, %s2908_s11 }
 0x50d   : > { %1230 = vrot.lane.b32.xlu0 %v1153_v9, %s2910_s13  ;;  %1223 = vrot.lane.b32.xlu1 %v2897_v0, %s2909_s12 }
 0x511   : > { %1234 = vrot.lane.b32.xlu0 %v2897_v0, %s2910_s13  ;;  %1232 = vrot.lane.b32.xlu1 %v1154_v10, %s2910_s13  ;;  %v2867_v10 = vld [vmem:[%s4107_s3 + $0x24] ss:$8 sps:$4 sm:$0xff]  }
 0x512   : > { %2793 = vmatprep.mubr.msk.bf16.mxu1 %vm779_vm2, %v2867_v10 }
 0x515   : > { %1264 = vrot.lane.b32.xlu0 %v1137_v11, %s2903_s25  ;;  %1262 = vrot.lane.b32.xlu1 %v1136_v12, %s2903_s25 }
 0x519   : > { %1260 = vrot.lane.b32.xlu1 %v2897_v0, %s2903_s25 }
 0x55f   : > { %v1162_v16 = vpop.permute.xlu0 %1161  ;;  %v1190_v17 = vpop.permute.xlu1 %1189 }
 0x560   : > { %v1165_v18 = vsel %vm4137_vm8, %v1160_v13, %v1162_v16  ;;  %vm4141_vm8 = vcmask 908288  }
 0x561   : > { %1266 = vrot.lane.b32.xlu0 %v1165_v18, %s2903_s25 }
 0x563   : > { %v1184_v19 = vpop.permute.xlu0 %1183  ;;  %v1164_v20 = vpop.permute.xlu1 %1163 }
 0x564   : > { %1270 = vrot.lane.b32.xlu1 %v1164_v20, %s2903_s25  ;;  %v1166_v26 = vsel %vm4139_vm9, %v1162_v16, %v1164_v20  ;;  %v1187_v32 = vsel %vm4140_vm4, %v1182_v14, %v1184_v19  ;;  %vm4142_vm9 = vmmov %vm4140_vm4  ;;  %vm4143_vm4 = vcmask 900096   ;;  %v2789_v16 = vld [vmem:[%s4108_s4 + $0x20] sm:$0xff] }
 0x567   : > { %v1192_v21 = vpop.permute.xlu0 %1191  ;;  %v1173_v22 = vpop.permute.xlu1 %1172 }
 0x568   : > { %1288 = vrot.lane.b32.xlu0 %v1192_v21, %s2903_s25  ;;  %v1176_v23 = vsel %vm4138_vm10, %v1171_v15, %v1173_v22  ;;  %v1193_v34 = vsel %vm4141_vm8, %v1190_v17, %v1192_v21  ;;  %vm4144_vm8 = vmmov %vm4143_vm4 }
 0x569   : > { %1272 = vrot.lane.b32.xlu1 %v1176_v23, %s2903_s25 }
 0x56b   : > { %v1175_v24 = vpop.permute.xlu0 %1174  ;;  %v1198_v25 = vpop.permute.xlu1 %1197 }
 0x56c   : > { %1268 = vrot.lane.b32.xlu0 %v1166_v26, %s2903_s25  ;;  %v1177_v40 = vsel %vm4138_vm10, %v1173_v22, %v1175_v24  ;;  %vm4145_vm10 = vcmask 785408  }
 0x56f   : > { %v1209_v27 = vpop.permute.xlu0 %1208  ;;  %v1186_v28 = vpop.permute.xlu1 %1185 }
 0x570   : > { %1276 = vrot.lane.b32.xlu0 %v1175_v24, %s2903_s25  ;;  %1282 = vrot.lane.b32.xlu1 %v1186_v28, %s2903_s25  ;;  %v1188_v47 = vsel %vm4142_vm9, %v1184_v19, %v1186_v28  ;;  %vm4146_vm9 = vmmov %vm4145_vm10 }
 0x573   : > { %v1213_v30 = vpop.permute.xlu0 %1212  ;;  %v1202_v31 = vpop.permute.xlu1 %1201 }
 0x574   : > { %1278 = vrot.lane.b32.xlu0 %v1187_v32, %s2903_s25  ;;  %1286 = vrot.lane.b32.xlu1 %v1193_v34, %s2903_s25 }
 0x577   : > { %v1200_v35 = vpop.permute.xlu0 %1199  ;;  %v1220_v38 = vpop.permute.xlu1 %1219 }
 0x578   : > { %1290 = vrot.lane.b32.xlu0 %v1198_v25, %s2903_s25  ;;  %1274 = vrot.lane.b32.xlu1 %v1177_v40, %s2903_s25  ;;  %v1204_v3 = vsel %vm4143_vm4, %v1200_v35, %v1202_v31  ;;  %v1203_v4 = vsel %vm4144_vm8, %v1198_v25, %v1200_v35  ;;  %vm4147_vm4 = vcmp.ne.s16.totalorder %v3073_v56, 0  ;;  %vm4148_vm8 = vcmp.ne.s16.totalorder %v3090_v61, 0 }
 0x57b   : > { %v1222_v43 = vpop.permute.xlu0 %1221  ;;  %v1211_v45 = vpop.permute.xlu1 %1210 }
 0x57c   : > { %1280 = vrot.lane.b32.xlu0 %v1188_v47, %s2903_s25  ;;  %1284 = vrot.lane.b32.xlu1 %v1190_v17, %s2903_s25  ;;  %v1225_v52 = vsel %vm652_vm7, %v1220_v38, %v1222_v43  ;;  %v1215_v7 = vsel %vm4145_vm10, %v1211_v45, %v1213_v30  ;;  %v1214_v8 = vsel %vm4146_vm9, %v1209_v27, %v1211_v45  ;;  %v2790_v17 = vld [vmem:[%s4108_s4 + $0x28] sm:$0xff]  ;;  %vm4149_vm10 = vcmp.ne.s16.totalorder %v3092_v62, 0 }
 0x57d   : > { %vm4150_vm9 = vcmp.ne.s16.totalorder %v3103_v2, 0 }
 0x57f   : > { %v1231_v49 = vpop.permute.xlu0 %1230  ;;  %v1224_v50 = vpop.permute.xlu1 %1223 }
 0x580   : > { %1296 = vrot.lane.b32.xlu1 %v1209_v27, %s2903_s25  ;;  %1304 = vrot.lane.b32.xlu0 %v1225_v52, %s2903_s25  ;;  %v1226_v11 = vsel %vm652_vm7, %v1222_v43, %v1224_v50 }
 0x583   : > { %v1235_v63 = vpop.permute.xlu0 %1234  ;;  %v1233_v1 = vpop.permute.xlu1 %1232 }
 0x584   : > { %1294 = vrot.lane.b32.xlu1 %v1204_v3, %s2903_s25  ;;  %1292 = vrot.lane.b32.xlu0 %v1203_v4, %s2903_s25  ;;  %v1237_v14 = vsel %vm664_vm1, %v1233_v1, %v1235_v63  ;;  %v1236_v15 = vsel %vm664_vm1, %v1231_v49, %v1233_v1 }
 0x587   : > { %v1265_v5 = vpop.permute.xlu0 %1264  ;;  %v1263_v6 = vpop.permute.xlu1 %1262 }
 0x588   : > { %1300 = vrot.lane.b32.xlu0 %v1215_v7, %s2903_s25  ;;  %1298 = vrot.lane.b32.xlu1 %v1214_v8, %s2903_s25  ;;  %v1315_v9 = vsel %vm571_vm5, %v1263_v6, %v1265_v5 }
 0x589   : > { %1353 = vmatprep.subr.bf16.mxu1 %v1315_v9 }
 0x58b   : > { %v1261_v12 = vpop.permute.xlu1 %1260 }
 0x58c   : > { %v1314_v13 = vsel %vm571_vm5, %v1261_v12, %v1263_v6  ;;  %1302 = vrot.lane.b32.xlu0 %v1220_v38, %s2903_s25  ;;  %1306 = vrot.lane.b32.xlu1 %v1226_v11, %s2903_s25 }
 0x58d   : > { %1354 = vmatpush1.bf16.msra.mxu1 %v1314_v13 }
 0x590   : > { %1312 = vrot.lane.b32.xlu0 %v1237_v14, %s2903_s25  ;;  %1310 = vrot.lane.b32.xlu1 %v1236_v15, %s2903_s25 }
 0x594   : > { %1240 = vperm.xlu0 %2852, %v2789_v16   ;;  %1308 = vrot.lane.b32.xlu1 %v1231_v49, %s2903_s25 }
 0x598   : > { %1245 = vperm.xlu1 %2853, %v2790_v17   ;;  %1441 = vrot.lane.b32.xlu0 %v2897_v0, %s2900_s22  ;;  %v2869_v17 = vld [vmem:[%s4107_s3 + $0x20] ss:$8 sps:$4 sm:$0xff]  }
 0x59c   : > { %1463 = vrot.lane.b32.xlu0 %v2897_v0, %s2906_s28  ;;  %1452 = vrot.lane.b32.xlu1 %v2897_v0, %s2905_s27 }
 0x5d3   : > { %v1267_v18 = vpop.permute.xlu0 %1266 }
 0x5d6   : > { %v1271_v19 = vpop.permute.xlu1 %1270 }
 0x5da   : > { %v1289_v20 = vpop.permute.xlu0 %1288 }
 0x5db   : > { %v1273_v21 = vpop.permute.xlu1 %1272 }
 0x5de   : > { %v1269_v22 = vpop.permute.xlu0 %1268 }
 0x5df   : > { %v1317_v23 = vsel %vm571_vm5, %v1269_v22, %v1271_v19  ;;  %v1316_v24 = vsel %vm571_vm5, %v1267_v18, %v1269_v22 }
 0x5e0   : > { %1355 = vmatprep.subr.bf16.mxu1 %v1317_v23 }
 0x5e1   : > { %1356 = vmatpush1.bf16.msra.mxu1 %v1316_v24 }
 0x5e2   : > { %v1277_v25 = vpop.permute.xlu0 %1276  ;;  %v1283_v26 = vpop.permute.xlu1 %1282 }
 0x5e6   : > { %v1279_v27 = vpop.permute.xlu0 %1278  ;;  %v1287_v28 = vpop.permute.xlu1 %1286 }
 0x5e7   : > { %v1323_v45 = vsel %vm571_vm5, %v1287_v28, %v1289_v20 }
 0x5ea   : > { %v1291_v30 = vpop.permute.xlu0 %1290  ;;  %v1275_v31 = vpop.permute.xlu1 %1274 }
 0x5eb   : > { %v1319_v32 = vsel %vm571_vm5, %v1275_v31, %v1277_v25  ;;  %v1318_v34 = vsel %vm571_vm5, %v1273_v21, %v1275_v31 }
 0x5ec   : > { %1357 = vmatprep.subr.bf16.mxu1 %v1319_v32 }
 0x5ed   : > { %1358 = vmatpush1.bf16.msra.mxu1 %v1318_v34 }
 0x5ee   : > { %v1281_v35 = vpop.permute.xlu0 %1280  ;;  %v1285_v38 = vpop.permute.xlu1 %1284 }
 0x5ef   : > { %v1321_v40 = vsel %vm571_vm5, %v1281_v35, %v1283_v26  ;;  %v1320_v43 = vsel %vm571_vm5, %v1279_v27, %v1281_v35  ;;  %v1322_v50 = vsel %vm571_vm5, %v1285_v38, %v1287_v28 }
 0x5f0   : > { %1359 = vmatprep.subr.bf16.mxu1 %v1321_v40 }
 0x5f1   : > { %1360 = vmatpush1.bf16.msra.mxu1 %v1320_v43 }
 0x5f2   : > { %v1305_v47 = vpop.permute.xlu0 %1304  ;;  %1361 = vmatprep.subr.bf16.mxu1 %v1323_v45  ;;  %v1297_v49 = vpop.permute.xlu1 %1296 }
 0x5f5   : > { %1362 = vmatpush1.bf16.msra.mxu1 %v1322_v50 }
 0x5f6   : > { %v1293_v52 = vpop.permute.xlu0 %1292  ;;  %v1295_v63 = vpop.permute.xlu1 %1294 }
 0x5f7   : > { %v1325_v1 = vsel %vm571_vm5, %v1293_v52, %v1295_v63  ;;  %v1324_v3 = vsel %vm571_vm5, %v1291_v30, %v1293_v52 }
 0x5f8   : > { %1363 = vmatprep.subr.bf16.mxu1 %v1325_v1 }
 0x5f9   : > { %1364 = vmatpush1.bf16.msra.mxu1 %v1324_v3 }
 0x5fa   : > { %v1301_v4 = vpop.permute.xlu0 %1300  ;;  %v1299_v5 = vpop.permute.xlu1 %1298 }
 0x5fb   : > { %v1327_v6 = vsel %vm571_vm5, %v1299_v5, %v1301_v4  ;;  %v1326_v7 = vsel %vm571_vm5, %v1297_v49, %v1299_v5 }
 0x5fc   : > { %1365 = vmatprep.subr.bf16.mxu1 %v1327_v6 }
 0x5fd   : > { %1366 = vmatpush1.bf16.msra.mxu1 %v1326_v7 }
 0x5fe   : > { %v1303_v8 = vpop.permute.xlu0 %1302  ;;  %v1307_v9 = vpop.permute.xlu1 %1306 }
 0x5ff   : > { %v1328_v10 = vsel %vm571_vm5, %v1303_v8, %v1305_v47  ;;  %v1329_v11 = vsel %vm571_vm5, %v1305_v47, %v1307_v9 }
 0x600   : > { %1367 = vmatprep.subr.bf16.mxu1 %v1329_v11 }
 0x601   : > { %1368 = vmatpush1.bf16.msra.mxu1 %v1328_v10 }
 0x602   : > { %v1313_v12 = vpop.permute.xlu0 %1312  ;;  %v1311_v13 = vpop.permute.xlu1 %1310 }
 0x603   : > { %v1331_v14 = vsel %vm571_vm5, %v1311_v13, %v1313_v12 }
 0x604   : > { %1369 = vmatprep.subr.bf16.mxu1 %v1331_v14 }
 0x606   : > { %v1309_v15 = vpop.permute.xlu1 %1308 }
 0x607   : > { %v1330_v16 = vsel %vm571_vm5, %v1309_v15, %v1311_v13 }
 0x608   : > { %1370 = vmatpush1.bf16.msra.mxu1 %v1330_v16 }
 0x60b   : > { %1386 = vmatmul.mubr.bf16.vlgmr.msra.gmra.mrb[8].mxu1 %v2869_v17 }
 0x613   : > { %v1241_v18 = vpop.permute.xlu0 %1240 }
 0x617   : > { %v1246_v22 = vpop.permute.xlu1 %1245  ;;  %v1442_v9 = vpop.permute.xlu0 %1441 }
 0x61b   : > { %v1464_v10 = vpop.permute.xlu0 %1463  ;;  %v1453_v11 = vpop.permute.xlu1 %1452 }
 0x6de   : > { %v1387_v19 = vpop.f32.mrb[8].mxu1 }
 0x6df   : > { %v1388_v20 = vadd.f32 %v1387_v19, %v1241_v18  ;;  %v1389_v21 = vpop.f32.mrb[9].mxu1 }
 0x6e0   : > { %v1390_v23 = vadd.f32 %v1389_v21, %v1241_v18  ;;  %v1391_v24 = vpop.f32.mrb[10].mxu1 }
 0x6e1   : > { %v1396_v25 = vmul.f32 0.05, %v1388_v20  ;;  %v1392_v26 = vadd.f32 %v1391_v24, %v1246_v22  ;;  %v1393_v27 = vpop.f32.mrb[11].mxu1 }
 0x6e2   : > { %v1397_v28 = vmul.f32 0.05, %v1390_v23  ;;  %v1394_v30 = vadd.f32 %v1393_v27, %v1246_v22 }
 0x6e3   : > { %v1398_v31 = vmul.f32 0.05, %v1392_v26  ;;  %v1400_v34 = vmax.f32 %v1388_v20, %v1396_v25 }
 0x6e4   : > { %v1399_v32 = vmul.f32 0.05, %v1394_v30  ;;  %v1401_v38 = vmax.f32 %v1390_v23, %v1397_v28 }
 0x6e5   : > { %v1402_v35 = vmax.f32 %v1392_v26, %v1398_v31 }
 0x6e6   : > { %v1403_v40 = vmax.f32 %v1394_v30, %v1399_v32 }
 0x6e7   : > { %v1404_v43 = vpack.c.bf16 %v1402_v35, %v1400_v34 }
 0x6e8   : > { %v1405_v45 = vpack.c.bf16 %v1403_v40, %v1401_v38 }
 0x6e9   : > { %1471 = vrot.lane.b32.xlu1 %v1404_v43, %s2904_s26  ;;  %1443 = vrot.lane.b32.xlu0 %v1404_v43, %s2900_s22  ;;  %v1424_v47 = vsel %vm535_vm11, %v1404_v43, 0  ;;  %v1421_v49 = vsel %vm523_vm12, %v1404_v43, 0  ;;  %v1429_v52 = vsel %vm549_vm14, %v1404_v43, 0  ;;  %v1432_v63 = vsel %vm561_vm0, %v1404_v43, 0 }
 0x6ea   : > { %v1422_v50 = vsel %vm524_vm13, %v1405_v45, 0  ;;  %v1425_v1 = vsel %vm536_vm15, %v1405_v45, 0  ;;  %v1430_v3 = vsel %vm550_vm3, %v1405_v45, 0  ;;  %v1433_v4 = vsel %vm4147_vm4, %v1405_v45, 0 }
 0x6eb   : > { %v1435_v5 = vsel %vm573_vm6, %v1404_v43, 0  ;;  %v1436_v6 = vsel %vm4148_vm8, %v1405_v45, 0  ;;  %v1419_v7 = vsel %vm4149_vm10, %v1405_v45, 0  ;;  %v1418_v8 = vsel %vm4150_vm9, %v1404_v43, 0 }
 0x6ec   : > { %vm4151_vm4 = vcmask 1039360   ;;  %vm4152_vm8 = vcmask 1031168   ;;  %vm4154_vm9 = vcmask 916480  }
 0x6ed   : > { %1445 = vrot.lane.b32.xlu1 %v1405_v45, %s2900_s22  ;;  %1465 = vrot.lane.b32.xlu0 %v1424_v47, %s2906_s28  ;;  %vm4153_vm10 = vmmov %vm4151_vm4 }
 0x6f1   : > { %1473 = vrot.lane.b32.xlu0 %v1405_v45, %s2904_s26  ;;  %1454 = vrot.lane.b32.xlu1 %v1421_v49, %s2905_s27 }
 0x6f5   : > { %1456 = vrot.lane.b32.xlu0 %v1422_v50, %s2905_s27  ;;  %1479 = vrot.lane.b32.xlu1 %v1429_v52, %s2907_s29 }
 0x6f9   : > { %1490 = vrot.lane.b32.xlu0 %v1432_v63, %s2908_s11  ;;  %1467 = vrot.lane.b32.xlu1 %v1425_v1, %s2906_s28 }
 0x6fd   : > { %1494 = vrot.lane.b32.xlu0 %v2897_v0, %s2908_s11  ;;  %1483 = vrot.lane.b32.xlu1 %v2897_v0, %s2907_s29 }
 0x701   : > { %1481 = vrot.lane.b32.xlu0 %v1430_v3, %s2907_s29  ;;  %1501 = vrot.lane.b32.xlu1 %v1404_v43, %s2909_s12 }
 0x705   : > { %1503 = vrot.lane.b32.xlu0 %v1405_v45, %s2909_s12  ;;  %1492 = vrot.lane.b32.xlu1 %v1433_v4, %s2908_s11 }
 0x709   : > { %1512 = vrot.lane.b32.xlu0 %v1435_v5, %s2910_s13  ;;  %1505 = vrot.lane.b32.xlu1 %v2897_v0, %s2909_s12 }
 0x70d   : > { %1516 = vrot.lane.b32.xlu0 %v2897_v0, %s2910_s13  ;;  %1514 = vrot.lane.b32.xlu1 %v1436_v6, %s2910_s13  ;;  %v2870_v6 = vld [vmem:[%s4107_s3 + $0x34] ss:$8 sps:$4 sm:$0xff]  }
 0x70e   : > { %2800 = vmatprep.mubr.msk.bf16.mxu0 %vm779_vm2, %v2870_v6 }
 0x711   : > { %1546 = vrot.lane.b32.xlu0 %v1419_v7, %s2903_s25  ;;  %1544 = vrot.lane.b32.xlu1 %v1418_v8, %s2903_s25 }
 0x715   : > { %1542 = vrot.lane.b32.xlu1 %v2897_v0, %s2903_s25 }
 0x75b   : > { %v1444_v12 = vpop.permute.xlu0 %1443  ;;  %v1472_v13 = vpop.permute.xlu1 %1471 }
 0x75c   : > { %v1447_v14 = vsel %vm4151_vm4, %v1442_v9, %v1444_v12  ;;  %vm4155_vm4 = vcmask 908288  }
 0x75d   : > { %1548 = vrot.lane.b32.xlu0 %v1447_v14, %s2903_s25 }
 0x75f   : > { %v1466_v15 = vpop.permute.xlu0 %1465  ;;  %v1446_v16 = vpop.permute.xlu1 %1445 }
 0x760   : > { %1552 = vrot.lane.b32.xlu1 %v1446_v16, %s2903_s25  ;;  %v1448_v22 = vsel %vm4153_vm10, %v1444_v12, %v1446_v16  ;;  %v1469_v27 = vsel %vm4154_vm9, %v1464_v10, %v1466_v15  ;;  %vm4156_vm10 = vmmov %vm4154_vm9  ;;  %vm4157_vm9 = vcmask 900096   ;;  %v2796_v12 = vld [vmem:[%s4108_s4 + $0x30] sm:$0xff] }
 0x763   : > { %v1474_v17 = vpop.permute.xlu0 %1473  ;;  %v1455_v18 = vpop.permute.xlu1 %1454 }
 0x764   : > { %1570 = vrot.lane.b32.xlu0 %v1474_v17, %s2903_s25  ;;  %v1458_v19 = vsel %vm4152_vm8, %v1453_v11, %v1455_v18  ;;  %v1475_v28 = vsel %vm4155_vm4, %v1472_v13, %v1474_v17  ;;  %vm4158_vm4 = vmmov %vm4157_vm9 }
 0x765   : > { %1554 = vrot.lane.b32.xlu1 %v1458_v19, %s2903_s25 }
 0x767   : > { %v1457_v20 = vpop.permute.xlu0 %1456  ;;  %v1480_v21 = vpop.permute.xlu1 %1479 }
 0x768   : > { %1550 = vrot.lane.b32.xlu0 %v1448_v22, %s2903_s25  ;;  %v1459_v32 = vsel %vm4152_vm8, %v1455_v18, %v1457_v20  ;;  %vm4159_vm8 = vcmask 785408  }
 0x76b   : > { %v1491_v23 = vpop.permute.xlu0 %1490  ;;  %v1468_v24 = vpop.permute.xlu1 %1467 }
 0x76c   : > { %1558 = vrot.lane.b32.xlu0 %v1457_v20, %s2903_s25  ;;  %1564 = vrot.lane.b32.xlu1 %v1468_v24, %s2903_s25  ;;  %v1470_v38 = vsel %vm4156_vm10, %v1466_v15, %v1468_v24  ;;  %vm4160_vm10 = vmmov %vm4159_vm8 }
 0x76f   : > { %v1495_v25 = vpop.permute.xlu0 %1494  ;;  %v1484_v26 = vpop.permute.xlu1 %1483 }
 0x770   : > { %1560 = vrot.lane.b32.xlu0 %v1469_v27, %s2903_s25  ;;  %1568 = vrot.lane.b32.xlu1 %v1475_v28, %s2903_s25 }
 0x773   : > { %v1482_v30 = vpop.permute.xlu0 %1481  ;;  %v1502_v31 = vpop.permute.xlu1 %1501 }
 0x774   : > { %1572 = vrot.lane.b32.xlu0 %v1480_v21, %s2903_s25  ;;  %1556 = vrot.lane.b32.xlu1 %v1459_v32, %s2903_s25  ;;  %v1486_v50 = vsel %vm4157_vm9, %v1482_v30, %v1484_v26  ;;  %v1485_v52 = vsel %vm4158_vm4, %v1480_v21, %v1482_v30  ;;  %vm4161_vm9 = vcmp.ne.s16.totalorder %v3073_v56, 0  ;;  %vm4162_vm4 = vcmp.ne.s16.totalorder %v3090_v61, 0 }
 0x777   : > { %v1504_v34 = vpop.permute.xlu0 %1503  ;;  %v1493_v35 = vpop.permute.xlu1 %1492 }
 0x778   : > { %1562 = vrot.lane.b32.xlu0 %v1470_v38, %s2903_s25  ;;  %1566 = vrot.lane.b32.xlu1 %v1472_v13, %s2903_s25  ;;  %v1507_v45 = vsel %vm652_vm7, %v1502_v31, %v1504_v34  ;;  %v1497_v3 = vsel %vm4159_vm8, %v1493_v35, %v1495_v25  ;;  %v1496_v4 = vsel %vm4160_vm10, %v1491_v23, %v1493_v35  ;;  %v2797_v13 = vld [vmem:[%s4108_s4 + $0x38] sm:$0xff]  ;;  %vm4163_vm8 = vcmp.ne.s16.totalorder %v3092_v62, 0 }
 0x779   : > { %vm4164_vm10 = vcmp.ne.s16.totalorder %v3103_v2, 0 }
 0x77b   : > { %v1513_v40 = vpop.permute.xlu0 %1512  ;;  %v1506_v43 = vpop.permute.xlu1 %1505 }
 0x77c   : > { %1578 = vrot.lane.b32.xlu1 %v1491_v23, %s2903_s25  ;;  %1586 = vrot.lane.b32.xlu0 %v1507_v45, %s2903_s25  ;;  %v1508_v7 = vsel %vm652_vm7, %v1504_v34, %v1506_v43 }
 0x77f   : > { %v1517_v47 = vpop.permute.xlu0 %1516  ;;  %v1515_v49 = vpop.permute.xlu1 %1514 }
 0x780   : > { %1576 = vrot.lane.b32.xlu1 %v1486_v50, %s2903_s25  ;;  %1574 = vrot.lane.b32.xlu0 %v1485_v52, %s2903_s25  ;;  %v1519_v10 = vsel %vm664_vm1, %v1515_v49, %v1517_v47  ;;  %v1518_v11 = vsel %vm664_vm1, %v1513_v40, %v1515_v49 }
 0x783   : > { %v1547_v63 = vpop.permute.xlu0 %1546  ;;  %v1545_v1 = vpop.permute.xlu1 %1544 }
 0x784   : > { %1582 = vrot.lane.b32.xlu0 %v1497_v3, %s2903_s25  ;;  %1580 = vrot.lane.b32.xlu1 %v1496_v4, %s2903_s25  ;;  %v1597_v5 = vsel %vm571_vm5, %v1545_v1, %v1547_v63 }
 0x785   : > { %1635 = vmatprep.subr.bf16.mxu0 %v1597_v5 }
 0x787   : > { %v1543_v8 = vpop.permute.xlu1 %1542 }
 0x788   : > { %v1596_v9 = vsel %vm571_vm5, %v1543_v8, %v1545_v1  ;;  %1584 = vrot.lane.b32.xlu0 %v1502_v31, %s2903_s25  ;;  %1588 = vrot.lane.b32.xlu1 %v1508_v7, %s2903_s25 }
 0x789   : > { %1636 = vmatpush1.bf16.msra.mxu0 %v1596_v9 }
 0x78c   : > { %1594 = vrot.lane.b32.xlu0 %v1519_v10, %s2903_s25  ;;  %1592 = vrot.lane.b32.xlu1 %v1518_v11, %s2903_s25 }
 0x790   : > { %1522 = vperm.xlu0 %2852, %v2796_v12   ;;  %1590 = vrot.lane.b32.xlu1 %v1513_v40, %s2903_s25 }
 0x794   : > { %1527 = vperm.xlu1 %2853, %v2797_v13   ;;  %1729 = vrot.lane.b32.xlu0 %v2897_v0, %s2900_s22  ;;  %v2872_v13 = vld [vmem:[%s4107_s3 + $0x30] ss:$8 sps:$4 sm:$0xff]  }
 0x798   : > { %1751 = vrot.lane.b32.xlu0 %v2897_v0, %s2906_s28  ;;  %1740 = vrot.lane.b32.xlu1 %v2897_v0, %s2905_s27 }
 0x7cf   : > { %v1549_v14 = vpop.permute.xlu0 %1548 }
 0x7d2   : > { %v1553_v15 = vpop.permute.xlu1 %1552 }
 0x7d6   : > { %v1571_v16 = vpop.permute.xlu0 %1570 }
 0x7d7   : > { %v1555_v17 = vpop.permute.xlu1 %1554 }
 0x7da   : > { %v1551_v18 = vpop.permute.xlu0 %1550 }
 0x7db   : > { %v1599_v19 = vsel %vm571_vm5, %v1551_v18, %v1553_v15  ;;  %v1598_v20 = vsel %vm571_vm5, %v1549_v14, %v1551_v18 }
 0x7dc   : > { %1637 = vmatprep.subr.bf16.mxu0 %v1599_v19 }
 0x7dd   : > { %1638 = vmatpush1.bf16.msra.mxu0 %v1598_v20 }
 0x7de   : > { %v1559_v21 = vpop.permute.xlu0 %1558  ;;  %v1565_v22 = vpop.permute.xlu1 %1564 }
 0x7e2   : > { %v1561_v23 = vpop.permute.xlu0 %1560  ;;  %v1569_v24 = vpop.permute.xlu1 %1568 }
 0x7e3   : > { %v1605_v35 = vsel %vm571_vm5, %v1569_v24, %v1571_v16 }
 0x7e6   : > { %v1573_v25 = vpop.permute.xlu0 %1572  ;;  %v1557_v26 = vpop.permute.xlu1 %1556 }
 0x7e7   : > { %v1601_v27 = vsel %vm571_vm5, %v1557_v26, %v1559_v21  ;;  %v1600_v28 = vsel %vm571_vm5, %v1555_v17, %v1557_v26 }
 0x7e8   : > { %1639 = vmatprep.subr.bf16.mxu0 %v1601_v27 }
 0x7e9   : > { %1640 = vmatpush1.bf16.msra.mxu0 %v1600_v28 }
 0x7ea   : > { %v1563_v30 = vpop.permute.xlu0 %1562  ;;  %v1567_v31 = vpop.permute.xlu1 %1566 }
 0x7eb   : > { %v1603_v32 = vsel %vm571_vm5, %v1563_v30, %v1565_v22  ;;  %v1602_v34 = vsel %vm571_vm5, %v1561_v23, %v1563_v30  ;;  %v1604_v43 = vsel %vm571_vm5, %v1567_v31, %v1569_v24 }
 0x7ec   : > { %1641 = vmatprep.subr.bf16.mxu0 %v1603_v32 }
 0x7ed   : > { %1642 = vmatpush1.bf16.msra.mxu0 %v1602_v34 }
 0x7ee   : > { %v1587_v38 = vpop.permute.xlu0 %1586  ;;  %1643 = vmatprep.subr.bf16.mxu0 %v1605_v35  ;;  %v1579_v40 = vpop.permute.xlu1 %1578 }
 0x7f1   : > { %1644 = vmatpush1.bf16.msra.mxu0 %v1604_v43 }
 0x7f2   : > { %v1575_v45 = vpop.permute.xlu0 %1574  ;;  %v1577_v47 = vpop.permute.xlu1 %1576 }
 0x7f3   : > { %v1607_v49 = vsel %vm571_vm5, %v1575_v45, %v1577_v47  ;;  %v1606_v50 = vsel %vm571_vm5, %v1573_v25, %v1575_v45 }
 0x7f4   : > { %1645 = vmatprep.subr.bf16.mxu0 %v1607_v49 }
 0x7f5   : > { %1646 = vmatpush1.bf16.msra.mxu0 %v1606_v50 }
 0x7f6   : > { %v1583_v52 = vpop.permute.xlu0 %1582  ;;  %v1581_v63 = vpop.permute.xlu1 %1580 }
 0x7f7   : > { %v1609_v1 = vsel %vm571_vm5, %v1581_v63, %v1583_v52  ;;  %v1608_v3 = vsel %vm571_vm5, %v1579_v40, %v1581_v63 }
 0x7f8   : > { %1647 = vmatprep.subr.bf16.mxu0 %v1609_v1 }
 0x7f9   : > { %1648 = vmatpush1.bf16.msra.mxu0 %v1608_v3 }
 0x7fa   : > { %v1585_v4 = vpop.permute.xlu0 %1584  ;;  %v1589_v5 = vpop.permute.xlu1 %1588 }
 0x7fb   : > { %v1610_v6 = vsel %vm571_vm5, %v1585_v4, %v1587_v38  ;;  %v1611_v7 = vsel %vm571_vm5, %v1587_v38, %v1589_v5 }
 0x7fc   : > { %1649 = vmatprep.subr.bf16.mxu0 %v1611_v7 }
 0x7fd   : > { %1650 = vmatpush1.bf16.msra.mxu0 %v1610_v6 }
 0x7fe   : > { %v1595_v8 = vpop.permute.xlu0 %1594  ;;  %v1593_v9 = vpop.permute.xlu1 %1592 }
 0x7ff   : > { %v1613_v10 = vsel %vm571_vm5, %v1593_v9, %v1595_v8 }
 0x800   : > { %1651 = vmatprep.subr.bf16.mxu0 %v1613_v10 }
 0x802   : > { %v1591_v11 = vpop.permute.xlu1 %1590 }
 0x803   : > { %v1612_v12 = vsel %vm571_vm5, %v1591_v11, %v1593_v9 }
 0x804   : > { %1652 = vmatpush1.bf16.msra.mxu0 %v1612_v12 }
 0x807   : > { %1668 = vmatmul.mubr.bf16.vlgmr.msra.gmra.mrb[4].mxu0 %v2872_v13 }
 0x80f   : > { %v1523_v14 = vpop.permute.xlu0 %1522 }
 0x813   : > { %v1528_v18 = vpop.permute.xlu1 %1527  ;;  %v1730_v5 = vpop.permute.xlu0 %1729 }
 0x817   : > { %v1752_v6 = vpop.permute.xlu0 %1751  ;;  %v1741_v7 = vpop.permute.xlu1 %1740 }
 0x8da   : > { %v1669_v15 = vpop.f32.mrb[4].mxu0 }
 0x8db   : > { %v1670_v16 = vadd.f32 %v1669_v15, %v1523_v14  ;;  %v1671_v17 = vpop.f32.mrb[5].mxu0 }
 0x8dc   : > { %v1672_v19 = vadd.f32 %v1671_v17, %v1523_v14  ;;  %v1673_v20 = vpop.f32.mrb[6].mxu0 }
 0x8dd   : > { %v1678_v21 = vmul.f32 0.05, %v1670_v16  ;;  %v1674_v22 = vadd.f32 %v1673_v20, %v1528_v18  ;;  %v1675_v23 = vpop.f32.mrb[7].mxu0 }
 0x8de   : > { %v1676_v24 = vadd.f32 %v1675_v23, %v1528_v18  ;;  %v1679_v26 = vmul.f32 0.05, %v1672_v19 }
 0x8df   : > { %v1682_v25 = vmax.f32 %v1670_v16, %v1678_v21  ;;  %v1680_v27 = vmul.f32 0.05, %v1674_v22 }
 0x8e0   : > { %v1681_v28 = vmul.f32 0.05, %v1676_v24  ;;  %v1683_v34 = vmax.f32 %v1672_v19, %v1679_v26 }
 0x8e1   : > { %v1684_v30 = vmax.f32 %v1674_v22, %v1680_v27  ;;  %v3620_v32 = vadd.f32 %v1682_v25, %v3326_v51 }
 0x8e2   : > { %v1685_v31 = vmax.f32 %v1676_v24, %v1681_v28  ;;  %v3633_v43 = vadd.f32 %v1683_v34, %v3339_v58 }
 0x8e3   : > { %v3623_v35 = vadd.f32 %v1684_v30, %v3329_v53 }
 0x8e4   : > { %v3630_v40 = vadd.f32 %v1685_v31, %v3336_v57 }
 0x8e5   : > { %v3627_v38 = vpack.c.bf16 %v3623_v35, %v3620_v32 }
 0x8e6   : > { %v3641_v51 = vpack.c.bf16 %v3630_v40, %v3633_v43 }
 0x8e7   : > { %1759 = vrot.lane.b32.xlu1 %v3627_v38, %s2904_s26  ;;  %1731 = vrot.lane.b32.xlu0 %v3627_v38, %s2900_s22  ;;  %v1712_v53 = vsel %vm535_vm11, %v3627_v38, 0  ;;  %v1709_v57 = vsel %vm523_vm12, %v3627_v38, 0  ;;  %v1717_v45 = vsel %vm549_vm14, %v3627_v38, 0  ;;  %v1720_v47 = vsel %vm561_vm0, %v3627_v38, 0 }
 0x8e8   : > { %v1710_v58 = vsel %vm524_vm13, %v3641_v51, 0  ;;  %v1713_v49 = vsel %vm536_vm15, %v3641_v51, 0  ;;  %v1718_v50 = vsel %vm550_vm3, %v3641_v51, 0  ;;  %v1721_v52 = vsel %vm4161_vm9, %v3641_v51, 0 }
 0x8e9   : > { %v1723_v63 = vsel %vm573_vm6, %v3627_v38, 0  ;;  %v1724_v1 = vsel %vm4162_vm4, %v3641_v51, 0  ;;  %v1707_v3 = vsel %vm4163_vm8, %v3641_v51, 0  ;;  %v1706_v4 = vsel %vm4164_vm10, %v3627_v38, 0 }
 0x8ea   : > { %vm4165_vm9 = vcmask 1039360   ;;  %vm4166_vm4 = vcmask 1031168   ;;  %vm4168_vm10 = vcmask 916480  }
 0x8eb   : > { %1733 = vrot.lane.b32.xlu1 %v3641_v51, %s2900_s22  ;;  %1753 = vrot.lane.b32.xlu0 %v1712_v53, %s2906_s28  ;;  %vm4167_vm8 = vmmov %vm4165_vm9 }
 0x8ef   : > { %1761 = vrot.lane.b32.xlu0 %v3641_v51, %s2904_s26  ;;  %1742 = vrot.lane.b32.xlu1 %v1709_v57, %s2905_s27 }
 0x8f3   : > { %1744 = vrot.lane.b32.xlu0 %v1710_v58, %s2905_s27  ;;  %1767 = vrot.lane.b32.xlu1 %v1717_v45, %s2907_s29 }
 0x8f7   : > { %1778 = vrot.lane.b32.xlu0 %v1720_v47, %s2908_s11  ;;  %1755 = vrot.lane.b32.xlu1 %v1713_v49, %s2906_s28 }
 0x8fb   : > { %1782 = vrot.lane.b32.xlu0 %v2897_v0, %s2908_s11  ;;  %1771 = vrot.lane.b32.xlu1 %v2897_v0, %s2907_s29 }
 0x8ff   : > { %1769 = vrot.lane.b32.xlu0 %v1718_v50, %s2907_s29  ;;  %1789 = vrot.lane.b32.xlu1 %v3627_v38, %s2909_s12 }
 0x903   : > { %1791 = vrot.lane.b32.xlu0 %v3641_v51, %s2909_s12  ;;  %1780 = vrot.lane.b32.xlu1 %v1721_v52, %s2908_s11 }
 0x907   : > { %1800 = vrot.lane.b32.xlu0 %v1723_v63, %s2910_s13  ;;  %1793 = vrot.lane.b32.xlu1 %v2897_v0, %s2909_s12 }
 0x90b   : > { %1804 = vrot.lane.b32.xlu0 %v2897_v0, %s2910_s13  ;;  %1802 = vrot.lane.b32.xlu1 %v1724_v1, %s2910_s13 }
 0x90f   : > { %1834 = vrot.lane.b32.xlu0 %v1707_v3, %s2903_s25  ;;  %1832 = vrot.lane.b32.xlu1 %v1706_v4, %s2903_s25  ;;  %v2873_v4 = vld [vmem:[%s4107_s3 + $0x44] ss:$8 sps:$4 sm:$0xff]  }
 0x910   : > { %2807 = vmatprep.mubr.msk.bf16.mxu1 %vm779_vm2, %v2873_v4 }
 0x913   : > { %1830 = vrot.lane.b32.xlu1 %v2897_v0, %s2903_s25 }
 0x959   : > { %v1732_v8 = vpop.permute.xlu0 %1731  ;;  %v1760_v9 = vpop.permute.xlu1 %1759 }
 0x95a   : > { %v1735_v10 = vsel %vm4165_vm9, %v1730_v5, %v1732_v8  ;;  %vm4169_vm9 = vcmask 908288  }
 0x95b   : > { %1836 = vrot.lane.b32.xlu0 %v1735_v10, %s2903_s25  ;;  %v2803_v10 = vld [vmem:[%s4108_s4 + $0x40] sm:$0xff] }
 0x95d   : > { %v1754_v11 = vpop.permute.xlu0 %1753  ;;  %v1734_v12 = vpop.permute.xlu1 %1733 }
 0x95e   : > { %1840 = vrot.lane.b32.xlu1 %v1734_v12, %s2903_s25  ;;  %v1736_v18 = vsel %vm4167_vm8, %v1732_v8, %v1734_v12  ;;  %v1757_v23 = vsel %vm4168_vm10, %v1752_v6, %v1754_v11  ;;  %vm4170_vm8 = vmmov %vm4168_vm10  ;;  %vm4171_vm10 = vcmask 900096  }
 0x961   : > { %v1762_v13 = vpop.permute.xlu0 %1761  ;;  %v1743_v14 = vpop.permute.xlu1 %1742 }
 0x962   : > { %1858 = vrot.lane.b32.xlu0 %v1762_v13, %s2903_s25  ;;  %v1746_v15 = vsel %vm4166_vm4, %v1741_v7, %v1743_v14  ;;  %v1763_v24 = vsel %vm4169_vm9, %v1760_v9, %v1762_v13  ;;  %vm4172_vm9 = vmmov %vm4171_vm10 }
 0x963   : > { %1842 = vrot.lane.b32.xlu1 %v1746_v15, %s2903_s25 }
 0x965   : > { %v1745_v16 = vpop.permute.xlu0 %1744  ;;  %v1768_v17 = vpop.permute.xlu1 %1767 }
 0x966   : > { %1838 = vrot.lane.b32.xlu0 %v1736_v18, %s2903_s25  ;;  %v1747_v27 = vsel %vm4166_vm4, %v1743_v14, %v1745_v16  ;;  %vm4173_vm4 = vcmask 785408  }
 0x969   : > { %v1779_v19 = vpop.permute.xlu0 %1778  ;;  %v1756_v20 = vpop.permute.xlu1 %1755 }
 0x96a   : > { %1846 = vrot.lane.b32.xlu0 %v1745_v16, %s2903_s25  ;;  %1852 = vrot.lane.b32.xlu1 %v1756_v20, %s2903_s25  ;;  %v1758_v31 = vsel %vm4170_vm8, %v1754_v11, %v1756_v20  ;;  %vm4174_vm8 = vmmov %vm4173_vm4  ;;  %v2804_v11 = vld [vmem:[%s4108_s4 + $0x48] sm:$0xff] }
 0x96d   : > { %v1783_v21 = vpop.permute.xlu0 %1782  ;;  %v1772_v22 = vpop.permute.xlu1 %1771 }
 0x96e   : > { %1848 = vrot.lane.b32.xlu0 %v1757_v23, %s2903_s25  ;;  %1856 = vrot.lane.b32.xlu1 %v1763_v24, %s2903_s25 }
 0x971   : > { %v1770_v25 = vpop.permute.xlu0 %1769  ;;  %v1790_v26 = vpop.permute.xlu1 %1789 }
 0x972   : > { %1860 = vrot.lane.b32.xlu0 %v1768_v17, %s2903_s25  ;;  %1844 = vrot.lane.b32.xlu1 %v1747_v27, %s2903_s25  ;;  %v1774_v47 = vsel %vm4171_vm10, %v1770_v25, %v1772_v22  ;;  %v1773_v49 = vsel %vm4172_vm9, %v1768_v17, %v1770_v25  ;;  %vm4175_vm10 = vcmp.ne.s16.totalorder %v3073_v56, 0  ;;  %vm4176_vm9 = vcmp.ne.s16.totalorder %v3090_v61, 0 }
 0x975   : > { %v1792_v28 = vpop.permute.xlu0 %1791  ;;  %v1781_v30 = vpop.permute.xlu1 %1780 }
 0x976   : > { %1850 = vrot.lane.b32.xlu0 %v1758_v31, %s2903_s25  ;;  %1854 = vrot.lane.b32.xlu1 %v1760_v9, %s2903_s25  ;;  %v1795_v57 = vsel %vm652_vm7, %v1790_v26, %v1792_v28  ;;  %v1785_v63 = vsel %vm4173_vm4, %v1781_v30, %v1783_v21  ;;  %v1784_v1 = vsel %vm4174_vm8, %v1779_v19, %v1781_v30  ;;  %vm4177_vm4 = vcmp.ne.s16.totalorder %v3092_v62, 0 }
 0x977   : > { %vm4178_vm8 = vcmp.ne.s16.totalorder %v3103_v2, 0 }
 0x979   : > { %v1801_v34 = vpop.permute.xlu0 %1800  ;;  %v1794_v53 = vpop.permute.xlu1 %1793 }
 0x97a   : > { %1866 = vrot.lane.b32.xlu1 %v1779_v19, %s2903_s25  ;;  %1874 = vrot.lane.b32.xlu0 %v1795_v57, %s2903_s25  ;;  %v1796_v5 = vsel %vm652_vm7, %v1792_v28, %v1794_v53 }
 0x97d   : > { %v1805_v58 = vpop.permute.xlu0 %1804  ;;  %v1803_v45 = vpop.permute.xlu1 %1802 }
 0x97e   : > { %1864 = vrot.lane.b32.xlu1 %v1774_v47, %s2903_s25  ;;  %1862 = vrot.lane.b32.xlu0 %v1773_v49, %s2903_s25  ;;  %v1807_v8 = vsel %vm664_vm1, %v1803_v45, %v1805_v58  ;;  %v1806_v9 = vsel %vm664_vm1, %v1801_v34, %v1803_v45 }
 0x981   : > { %v1835_v50 = vpop.permute.xlu0 %1834  ;;  %v1833_v52 = vpop.permute.xlu1 %1832 }
 0x982   : > { %1870 = vrot.lane.b32.xlu0 %v1785_v63, %s2903_s25  ;;  %1868 = vrot.lane.b32.xlu1 %v1784_v1, %s2903_s25  ;;  %v1885_v3 = vsel %vm571_vm5, %v1833_v52, %v1835_v50 }
 0x983   : > { %1923 = vmatprep.subr.bf16.mxu1 %v1885_v3 }
 0x985   : > { %v1831_v6 = vpop.permute.xlu1 %1830 }
 0x986   : > { %v1884_v7 = vsel %vm571_vm5, %v1831_v6, %v1833_v52  ;;  %1872 = vrot.lane.b32.xlu0 %v1790_v26, %s2903_s25  ;;  %1876 = vrot.lane.b32.xlu1 %v1796_v5, %s2903_s25 }
 0x987   : > { %1924 = vmatpush1.bf16.msra.mxu1 %v1884_v7 }
 0x98a   : > { %1882 = vrot.lane.b32.xlu0 %v1807_v8, %s2903_s25  ;;  %1880 = vrot.lane.b32.xlu1 %v1806_v9, %s2903_s25 }
 0x98e   : > { %1810 = vperm.xlu0 %2852, %v2803_v10   ;;  %1878 = vrot.lane.b32.xlu1 %v1801_v34, %s2903_s25 }
 0x992   : > { %1815 = vperm.xlu1 %2853, %v2804_v11   ;;  %2011 = vrot.lane.b32.xlu0 %v2897_v0, %s2900_s22 }
 0x996   : > { %2033 = vrot.lane.b32.xlu0 %v2897_v0, %s2906_s28  ;;  %2022 = vrot.lane.b32.xlu1 %v2897_v0, %s2905_s27 }
 0x9cd   : > { %v1837_v12 = vpop.permute.xlu0 %1836 }
 0x9d0   : > { %v1841_v13 = vpop.permute.xlu1 %1840 }
 0x9d4   : > { %v1859_v14 = vpop.permute.xlu0 %1858 }
 0x9d5   : > { %v1843_v15 = vpop.permute.xlu1 %1842 }
 0x9d8   : > { %v1839_v16 = vpop.permute.xlu0 %1838 }
 0x9d9   : > { %v1887_v17 = vsel %vm571_vm5, %v1839_v16, %v1841_v13  ;;  %v1886_v18 = vsel %vm571_vm5, %v1837_v12, %v1839_v16  ;;  %v2875_v13 = vld [vmem:[%s4107_s3 + $0x40] ss:$8 sps:$4 sm:$0xff]  }
 0x9da   : > { %1925 = vmatprep.subr.bf16.mxu1 %v1887_v17 }
 0x9db   : > { %1926 = vmatpush1.bf16.msra.mxu1 %v1886_v18 }
 0x9dc   : > { %v1847_v19 = vpop.permute.xlu0 %1846  ;;  %v1853_v20 = vpop.permute.xlu1 %1852 }
 0x9e0   : > { %v1849_v21 = vpop.permute.xlu0 %1848  ;;  %v1857_v22 = vpop.permute.xlu1 %1856 }
 0x9e1   : > { %v1893_v34 = vsel %vm571_vm5, %v1857_v22, %v1859_v14 }
 0x9e4   : > { %v1861_v23 = vpop.permute.xlu0 %1860  ;;  %v1845_v24 = vpop.permute.xlu1 %1844 }
 0x9e5   : > { %v1889_v25 = vsel %vm571_vm5, %v1845_v24, %v1847_v19  ;;  %v1888_v26 = vsel %vm571_vm5, %v1843_v15, %v1845_v24 }
 0x9e6   : > { %1927 = vmatprep.subr.bf16.mxu1 %v1889_v25 }
 0x9e7   : > { %1928 = vmatpush1.bf16.msra.mxu1 %v1888_v26 }
 0x9e8   : > { %v1851_v27 = vpop.permute.xlu0 %1850  ;;  %v1855_v28 = vpop.permute.xlu1 %1854 }
 0x9e9   : > { %v1891_v30 = vsel %vm571_vm5, %v1851_v27, %v1853_v20  ;;  %v1890_v31 = vsel %vm571_vm5, %v1849_v21, %v1851_v27  ;;  %v1892_v58 = vsel %vm571_vm5, %v1855_v28, %v1857_v22 }
 0x9ea   : > { %1929 = vmatprep.subr.bf16.mxu1 %v1891_v30 }
 0x9eb   : > { %1930 = vmatpush1.bf16.msra.mxu1 %v1890_v31 }
 0x9ec   : > { %v1875_v53 = vpop.permute.xlu0 %1874  ;;  %1931 = vmatprep.subr.bf16.mxu1 %v1893_v34  ;;  %v1867_v57 = vpop.permute.xlu1 %1866 }
 0x9ef   : > { %1932 = vmatpush1.bf16.msra.mxu1 %v1892_v58 }
 0x9f0   : > { %v1863_v45 = vpop.permute.xlu0 %1862  ;;  %v1865_v47 = vpop.permute.xlu1 %1864 }
 0x9f1   : > { %v1895_v49 = vsel %vm571_vm5, %v1863_v45, %v1865_v47  ;;  %v1894_v50 = vsel %vm571_vm5, %v1861_v23, %v1863_v45 }
 0x9f2   : > { %1933 = vmatprep.subr.bf16.mxu1 %v1895_v49 }
 0x9f3   : > { %1934 = vmatpush1.bf16.msra.mxu1 %v1894_v50 }
 0x9f4   : > { %v1871_v52 = vpop.permute.xlu0 %1870  ;;  %v1869_v63 = vpop.permute.xlu1 %1868 }
 0x9f5   : > { %v1897_v1 = vsel %vm571_vm5, %v1869_v63, %v1871_v52  ;;  %v1896_v3 = vsel %vm571_vm5, %v1867_v57, %v1869_v63 }
 0x9f6   : > { %1935 = vmatprep.subr.bf16.mxu1 %v1897_v1 }
 0x9f7   : > { %1936 = vmatpush1.bf16.msra.mxu1 %v1896_v3 }
 0x9f8   : > { %v1873_v4 = vpop.permute.xlu0 %1872  ;;  %v1877_v5 = vpop.permute.xlu1 %1876 }
 0x9f9   : > { %v1898_v6 = vsel %vm571_vm5, %v1873_v4, %v1875_v53  ;;  %v1899_v7 = vsel %vm571_vm5, %v1875_v53, %v1877_v5 }
 0x9fa   : > { %1937 = vmatprep.subr.bf16.mxu1 %v1899_v7 }
 0x9fb   : > { %1938 = vmatpush1.bf16.msra.mxu1 %v1898_v6 }
 0x9fc   : > { %v1883_v8 = vpop.permute.xlu0 %1882  ;;  %v1881_v9 = vpop.permute.xlu1 %1880 }
 0x9fd   : > { %v1901_v10 = vsel %vm571_vm5, %v1881_v9, %v1883_v8 }
 0x9fe   : > { %1939 = vmatprep.subr.bf16.mxu1 %v1901_v10 }
 0xa00   : > { %v1879_v11 = vpop.permute.xlu1 %1878 }
 0xa01   : > { %v1900_v12 = vsel %vm571_vm5, %v1879_v11, %v1881_v9 }
 0xa02   : > { %1940 = vmatpush1.bf16.msra.mxu1 %v1900_v12 }
 0xa05   : > { %1956 = vmatmul.mubr.bf16.vlgmr.msra.gmra.mrb[12].mxu1 %v2875_v13 }
 0xa0d   : > { %v1811_v14 = vpop.permute.xlu0 %1810 }
 0xa11   : > { %v1816_v18 = vpop.permute.xlu1 %1815  ;;  %v2012_v7 = vpop.permute.xlu0 %2011 }
 0xa15   : > { %v2034_v8 = vpop.permute.xlu0 %2033  ;;  %v2023_v9 = vpop.permute.xlu1 %2022 }
 0xad8   : > { %v1957_v15 = vpop.f32.mrb[12].mxu1 }
 0xad9   : > { %v1958_v16 = vadd.f32 %v1957_v15, %v1811_v14  ;;  %v1959_v17 = vpop.f32.mrb[13].mxu1 }
 0xada   : > { %v1960_v19 = vadd.f32 %v1959_v17, %v1811_v14  ;;  %v1961_v20 = vpop.f32.mrb[14].mxu1 }
 0xadb   : > { %v1966_v21 = vmul.f32 0.05, %v1958_v16  ;;  %v1962_v22 = vadd.f32 %v1961_v20, %v1816_v18  ;;  %v1963_v23 = vpop.f32.mrb[15].mxu1 }
 0xadc   : > { %v1967_v24 = vmul.f32 0.05, %v1960_v19  ;;  %v1964_v25 = vadd.f32 %v1963_v23, %v1816_v18 }
 0xadd   : > { %v1968_v26 = vmul.f32 0.05, %v1962_v22  ;;  %v1970_v28 = vmax.f32 %v1958_v16, %v1966_v21 }
 0xade   : > { %v1969_v27 = vmul.f32 0.05, %v1964_v25  ;;  %v1971_v31 = vmax.f32 %v1960_v19, %v1967_v24 }
 0xadf   : > { %v1972_v30 = vmax.f32 %v1962_v22, %v1968_v26 }
 0xae0   : > { %v1973_v34 = vmax.f32 %v1964_v25, %v1969_v27 }
 0xae1   : > { %v1974_v53 = vpack.c.bf16 %v1972_v30, %v1970_v28 }
 0xae2   : > { %v1975_v57 = vpack.c.bf16 %v1973_v34, %v1971_v31 }
 0xae3   : > { %2041 = vrot.lane.b32.xlu1 %v1974_v53, %s2904_s26  ;;  %2013 = vrot.lane.b32.xlu0 %v1974_v53, %s2900_s22  ;;  %v1994_v58 = vsel %vm535_vm11, %v1974_v53, 0  ;;  %v1991_v45 = vsel %vm523_vm12, %v1974_v53, 0  ;;  %v1999_v49 = vsel %vm549_vm14, %v1974_v53, 0  ;;  %v2002_v50 = vsel %vm561_vm0, %v1974_v53, 0 }
 0xae4   : > { %v1992_v47 = vsel %vm524_vm13, %v1975_v57, 0  ;;  %v1995_v52 = vsel %vm536_vm15, %v1975_v57, 0  ;;  %v2000_v63 = vsel %vm550_vm3, %v1975_v57, 0  ;;  %v2003_v1 = vsel %vm4175_vm10, %v1975_v57, 0 }
 0xae5   : > { %v2005_v3 = vsel %vm573_vm6, %v1974_v53, 0  ;;  %v2006_v4 = vsel %vm4176_vm9, %v1975_v57, 0  ;;  %v1989_v5 = vsel %vm4177_vm4, %v1975_v57, 0  ;;  %v1988_v6 = vsel %vm4178_vm8, %v1974_v53, 0 }
 0xae6   : > { %vm4179_vm10 = vcmask 1039360   ;;  %vm4180_vm9 = vcmask 1031168   ;;  %vm4182_vm8 = vcmask 916480  }
 0xae7   : > { %2015 = vrot.lane.b32.xlu1 %v1975_v57, %s2900_s22  ;;  %2035 = vrot.lane.b32.xlu0 %v1994_v58, %s2906_s28  ;;  %vm4181_vm4 = vmmov %vm4179_vm10 }
 0xaeb   : > { %2043 = vrot.lane.b32.xlu0 %v1975_v57, %s2904_s26  ;;  %2024 = vrot.lane.b32.xlu1 %v1991_v45, %s2905_s27 }
 0xaef   : > { %2026 = vrot.lane.b32.xlu0 %v1992_v47, %s2905_s27  ;;  %2049 = vrot.lane.b32.xlu1 %v1999_v49, %s2907_s29 }
 0xaf3   : > { %2060 = vrot.lane.b32.xlu0 %v2002_v50, %s2908_s11  ;;  %2037 = vrot.lane.b32.xlu1 %v1995_v52, %s2906_s28 }
 0xaf7   : > { %2064 = vrot.lane.b32.xlu0 %v2897_v0, %s2908_s11  ;;  %2053 = vrot.lane.b32.xlu1 %v2897_v0, %s2907_s29 }
 0xafb   : > { %2051 = vrot.lane.b32.xlu0 %v2000_v63, %s2907_s29  ;;  %2071 = vrot.lane.b32.xlu1 %v1974_v53, %s2909_s12 }
 0xaff   : > { %2073 = vrot.lane.b32.xlu0 %v1975_v57, %s2909_s12  ;;  %2062 = vrot.lane.b32.xlu1 %v2003_v1, %s2908_s11 }
 0xb03   : > { %2082 = vrot.lane.b32.xlu0 %v2005_v3, %s2910_s13  ;;  %2075 = vrot.lane.b32.xlu1 %v2897_v0, %s2909_s12 }
 0xb07   : > { %2086 = vrot.lane.b32.xlu0 %v2897_v0, %s2910_s13  ;;  %2084 = vrot.lane.b32.xlu1 %v2006_v4, %s2910_s13 }
 0xb0b   : > { %2116 = vrot.lane.b32.xlu0 %v1989_v5, %s2903_s25  ;;  %2114 = vrot.lane.b32.xlu1 %v1988_v6, %s2903_s25  ;;  %v2876_v6 = vld [vmem:[%s4107_s3 + $0x54] ss:$8 sps:$4 sm:$0xff]  }
 0xb0c   : > { %2814 = vmatprep.mubr.msk.bf16.mxu0 %vm779_vm2, %v2876_v6 }
 0xb0f   : > { %2112 = vrot.lane.b32.xlu1 %v2897_v0, %s2903_s25 }
 0xb55   : > { %v2014_v10 = vpop.permute.xlu0 %2013  ;;  %v2042_v11 = vpop.permute.xlu1 %2041 }
 0xb56   : > { %v2017_v12 = vsel %vm4179_vm10, %v2012_v7, %v2014_v10  ;;  %vm4183_vm10 = vcmask 908288  }
 0xb57   : > { %2118 = vrot.lane.b32.xlu0 %v2017_v12, %s2903_s25  ;;  %v2810_v12 = vld [vmem:[%s4108_s4 + $0x50] sm:$0xff] }
 0xb59   : > { %v2036_v13 = vpop.permute.xlu0 %2035  ;;  %v2016_v14 = vpop.permute.xlu1 %2015 }
 0xb5a   : > { %2122 = vrot.lane.b32.xlu1 %v2016_v14, %s2903_s25  ;;  %v2018_v20 = vsel %vm4181_vm4, %v2014_v10, %v2016_v14  ;;  %v2039_v25 = vsel %vm4182_vm8, %v2034_v8, %v2036_v13  ;;  %vm4184_vm4 = vmmov %vm4182_vm8  ;;  %vm4185_vm8 = vcmask 900096   ;;  %v2811_v14 = vld [vmem:[%s4108_s4 + $0x58] sm:$0xff] }
 0xb5d   : > { %v2044_v15 = vpop.permute.xlu0 %2043  ;;  %v2025_v16 = vpop.permute.xlu1 %2024 }
 0xb5e   : > { %2140 = vrot.lane.b32.xlu0 %v2044_v15, %s2903_s25  ;;  %v2028_v17 = vsel %vm4180_vm9, %v2023_v9, %v2025_v16  ;;  %v2045_v26 = vsel %vm4183_vm10, %v2042_v11, %v2044_v15  ;;  %vm4186_vm10 = vmmov %vm4185_vm8  ;;  %v2273_v15 = vld [vmem:[%s4110_s6 + $0x8] sm:$0xff] }
 0xb5f   : > { %2124 = vrot.lane.b32.xlu1 %v2028_v17, %s2903_s25 }
 0xb61   : > { %v2027_v18 = vpop.permute.xlu0 %2026  ;;  %v2050_v19 = vpop.permute.xlu1 %2049 }
 0xb62   : > { %2120 = vrot.lane.b32.xlu0 %v2018_v20, %s2903_s25  ;;  %v2029_v30 = vsel %vm4180_vm9, %v2025_v16, %v2027_v18  ;;  %vm4187_vm9 = vcmask 785408  }
 0xb65   : > { %v2061_v21 = vpop.permute.xlu0 %2060  ;;  %v2038_v22 = vpop.permute.xlu1 %2037 }
 0xb66   : > { %2128 = vrot.lane.b32.xlu0 %v2027_v18, %s2903_s25  ;;  %2134 = vrot.lane.b32.xlu1 %v2038_v22, %s2903_s25  ;;  %v2040_v53 = vsel %vm4184_vm4, %v2036_v13, %v2038_v22  ;;  %vm4188_vm4 = vmmov %vm4187_vm9  ;;  %v2272_v13 = vld [vmem:[%s4110_s6] sm:$0xff] }
 0xb69   : > { %v2065_v23 = vpop.permute.xlu0 %2064  ;;  %v2054_v24 = vpop.permute.xlu1 %2053 }
 0xb6a   : > { %2130 = vrot.lane.b32.xlu0 %v2039_v25, %s2903_s25  ;;  %2138 = vrot.lane.b32.xlu1 %v2045_v26, %s2903_s25 }
 0xb6d   : > { %v2052_v27 = vpop.permute.xlu0 %2051  ;;  %v2072_v28 = vpop.permute.xlu1 %2071 }
 0xb6e   : > { %2142 = vrot.lane.b32.xlu0 %v2050_v19, %s2903_s25  ;;  %2126 = vrot.lane.b32.xlu1 %v2029_v30, %s2903_s25  ;;  %v2055_v47 = vsel %vm4185_vm8, %v2050_v19, %v2052_v27  ;;  %v2056_v49 = vsel %vm4186_vm10, %v2052_v27, %v2054_v24  ;;  %vm2289_vm8 = vcmask 392192   ;;  %vm4197_vm10 = vcmask 908288  }
 0xb71   : > { %v2074_v31 = vpop.permute.xlu0 %2073  ;;  %v2063_v34 = vpop.permute.xlu1 %2062 }
 0xb72   : > { %2132 = vrot.lane.b32.xlu0 %v2040_v53, %s2903_s25  ;;  %2136 = vrot.lane.b32.xlu1 %v2042_v11, %s2903_s25  ;;  %v2077_v57 = vsel %vm652_vm7, %v2072_v28, %v2074_v31  ;;  %v2066_v63 = vsel %vm4187_vm9, %v2061_v21, %v2063_v34  ;;  %v2067_v1 = vsel %vm4188_vm4, %v2063_v34, %v2065_v23 }
 0xb75   : > { %v2083_v58 = vpop.permute.xlu0 %2082  ;;  %v2076_v45 = vpop.permute.xlu1 %2075 }
 0xb76   : > { %2148 = vrot.lane.b32.xlu1 %v2061_v21, %s2903_s25  ;;  %2156 = vrot.lane.b32.xlu0 %v2077_v57, %s2903_s25  ;;  %v2078_v7 = vsel %vm652_vm7, %v2074_v31, %v2076_v45 }
 0xb79   : > { %v2087_v50 = vpop.permute.xlu0 %2086  ;;  %v2085_v52 = vpop.permute.xlu1 %2084 }
 0xb7a   : > { %2146 = vrot.lane.b32.xlu1 %v2056_v49, %s2903_s25  ;;  %2144 = vrot.lane.b32.xlu0 %v2055_v47, %s2903_s25  ;;  %v2088_v10 = vsel %vm664_vm1, %v2083_v58, %v2085_v52  ;;  %v2089_v11 = vsel %vm664_vm1, %v2085_v52, %v2087_v50 }
 0xb7d   : > { %v2117_v3 = vpop.permute.xlu0 %2116  ;;  %v2115_v4 = vpop.permute.xlu1 %2114 }
 0xb7e   : > { %2152 = vrot.lane.b32.xlu0 %v2067_v1, %s2903_s25  ;;  %2150 = vrot.lane.b32.xlu1 %v2066_v63, %s2903_s25  ;;  %v2167_v5 = vsel %vm571_vm5, %v2115_v4, %v2117_v3 }
 0xb7f   : > { %2205 = vmatprep.subr.bf16.mxu0 %v2167_v5 }
 0xb81   : > { %v2113_v8 = vpop.permute.xlu1 %2112 }
 0xb82   : > { %v2166_v9 = vsel %vm571_vm5, %v2113_v8, %v2115_v4  ;;  %2154 = vrot.lane.b32.xlu0 %v2072_v28, %s2903_s25  ;;  %2158 = vrot.lane.b32.xlu1 %v2078_v7, %s2903_s25 }
 0xb83   : > { %2206 = vmatpush1.bf16.msra.mxu0 %v2166_v9 }
 0xb86   : > { %2164 = vrot.lane.b32.xlu0 %v2089_v11, %s2903_s25  ;;  %2162 = vrot.lane.b32.xlu1 %v2088_v10, %s2903_s25 }
 0xb8a   : > { %2092 = vperm.xlu0 %2852, %v2810_v12   ;;  %2160 = vrot.lane.b32.xlu1 %v2083_v58, %s2903_s25 }
 0xb8e   : > { %2276 = vperm.xlu0 %2852, %v2272_v13   ;;  %2097 = vperm.xlu1 %2853, %v2811_v14  }
 0xb92   : > { %2281 = vperm.xlu1 %2853, %v2273_v15   ;;  %2395 = vrot.lane.b32.xlu0 %v2897_v0, %s2900_s22 }
 0xb96   : > { %2417 = vrot.lane.b32.xlu0 %v2897_v0, %s2906_s28  ;;  %2406 = vrot.lane.b32.xlu1 %v2897_v0, %s2905_s27 }
 0xbc9   : > { %v2119_v16 = vpop.permute.xlu0 %2118 }
 0xbcc   : > { %v2123_v17 = vpop.permute.xlu1 %2122 }
 0xbd0   : > { %v2141_v18 = vpop.permute.xlu0 %2140 }
 0xbd1   : > { %v2125_v19 = vpop.permute.xlu1 %2124 }
 0xbd4   : > { %v2121_v20 = vpop.permute.xlu0 %2120 }
 0xbd5   : > { %v2168_v21 = vsel %vm571_vm5, %v2119_v16, %v2121_v20  ;;  %v2169_v22 = vsel %vm571_vm5, %v2121_v20, %v2123_v17  ;;  %v2878_v17 = vld [vmem:[%s4107_s3 + $0x50] ss:$8 sps:$4 sm:$0xff]  }
 0xbd6   : > { %2207 = vmatprep.subr.bf16.mxu0 %v2169_v22 }
 0xbd7   : > { %2208 = vmatpush1.bf16.msra.mxu0 %v2168_v21 }
 0xbd8   : > { %v2129_v23 = vpop.permute.xlu0 %2128  ;;  %v2135_v24 = vpop.permute.xlu1 %2134 }
 0xbdc   : > { %v2131_v25 = vpop.permute.xlu0 %2130  ;;  %v2139_v26 = vpop.permute.xlu1 %2138 }
 0xbdd   : > { %v2175_v45 = vsel %vm571_vm5, %v2139_v26, %v2141_v18 }
 0xbe0   : > { %v2143_v27 = vpop.permute.xlu0 %2142  ;;  %v2127_v28 = vpop.permute.xlu1 %2126 }
 0xbe1   : > { %v2170_v30 = vsel %vm571_vm5, %v2125_v19, %v2127_v28  ;;  %v2171_v31 = vsel %vm571_vm5, %v2127_v28, %v2129_v23 }
 0xbe2   : > { %2209 = vmatprep.subr.bf16.mxu0 %v2171_v31 }
 0xbe3   : > { %2210 = vmatpush1.bf16.msra.mxu0 %v2170_v30 }
 0xbe4   : > { %v2133_v34 = vpop.permute.xlu0 %2132  ;;  %v2137_v53 = vpop.permute.xlu1 %2136 }
 0xbe5   : > { %v2172_v57 = vsel %vm571_vm5, %v2131_v25, %v2133_v34  ;;  %v2173_v58 = vsel %vm571_vm5, %v2133_v34, %v2135_v24  ;;  %v2174_v50 = vsel %vm571_vm5, %v2137_v53, %v2139_v26 }
 0xbe6   : > { %2211 = vmatprep.subr.bf16.mxu0 %v2173_v58 }
 0xbe7   : > { %2212 = vmatpush1.bf16.msra.mxu0 %v2172_v57 }
 0xbe8   : > { %v2157_v47 = vpop.permute.xlu0 %2156  ;;  %2213 = vmatprep.subr.bf16.mxu0 %v2175_v45  ;;  %v2149_v49 = vpop.permute.xlu1 %2148 }
 0xbeb   : > { %2214 = vmatpush1.bf16.msra.mxu0 %v2174_v50  ;;  %v2879_v50 = vld [vmem:[%s4109_s5] sm:$0xff]  }
 0xbec   : > { %v2145_v52 = vpop.permute.xlu0 %2144  ;;  %v2147_v63 = vpop.permute.xlu1 %2146 }
 0xbed   : > { %v2176_v1 = vsel %vm571_vm5, %v2143_v27, %v2145_v52  ;;  %v2177_v3 = vsel %vm571_vm5, %v2145_v52, %v2147_v63 }
 0xbee   : > { %2215 = vmatprep.subr.bf16.mxu0 %v2177_v3 }
 0xbef   : > { %2216 = vmatpush1.bf16.msra.mxu0 %v2176_v1 }
 0xbf0   : > { %v2153_v4 = vpop.permute.xlu0 %2152  ;;  %v2151_v5 = vpop.permute.xlu1 %2150 }
 0xbf1   : > { %v2178_v6 = vsel %vm571_vm5, %v2149_v49, %v2151_v5  ;;  %v2179_v7 = vsel %vm571_vm5, %v2151_v5, %v2153_v4 }
 0xbf2   : > { %2217 = vmatprep.subr.bf16.mxu0 %v2179_v7 }
 0xbf3   : > { %2218 = vmatpush1.bf16.msra.mxu0 %v2178_v6 }
 0xbf4   : > { %v2155_v8 = vpop.permute.xlu0 %2154  ;;  %v2159_v9 = vpop.permute.xlu1 %2158 }
 0xbf5   : > { %v2180_v10 = vsel %vm571_vm5, %v2155_v8, %v2157_v47  ;;  %v2181_v11 = vsel %vm571_vm5, %v2157_v47, %v2159_v9 }
 0xbf6   : > { %2219 = vmatprep.subr.bf16.mxu0 %v2181_v11 }
 0xbf7   : > { %2220 = vmatpush1.bf16.msra.mxu0 %v2180_v10 }
 0xbf8   : > { %v2165_v12 = vpop.permute.xlu0 %2164  ;;  %v2163_v13 = vpop.permute.xlu1 %2162 }
 0xbf9   : > { %v2183_v14 = vsel %vm571_vm5, %v2163_v13, %v2165_v12 }
 0xbfa   : > { %2221 = vmatprep.subr.bf16.mxu0 %v2183_v14 }
 0xbfc   : > { %v2161_v15 = vpop.permute.xlu1 %2160 }
 0xbfd   : > { %v2182_v16 = vsel %vm571_vm5, %v2161_v15, %v2163_v13 }
 0xbfe   : > { %2222 = vmatpush1.bf16.msra.mxu0 %v2182_v16 }
 0xbff   : > { %2293 = vmatprep.subr.bf16.mxu0 %v3347_v60 }
 0xc01   : > { %2238 = vmatmul.mubr.bf16.vlgmr.msra.gmra.mrb[8].mxu0 %v2878_v17 }
 0xc02   : > { %2294 = vmatpush1.bf16.msra.mxu0 %v3333_v55  ;;  %2325 = vmatprep.mubr.bf16.mxu0 %v2897_v0 }
 0xc03   : > { %2295 = vmatprep.subr.bf16.mxu0 %v3641_v51 }
 0xc06   : > { %2296 = vmatpush1.bf16.msra.mxu0 %v3627_v38 }
 0xc09   : > { %v2093_v18 = vpop.permute.xlu0 %2092 }
 0xc0d   : > { %v2098_v22 = vpop.permute.xlu1 %2097  ;;  %v2277_v52 = vpop.permute.xlu0 %2276 }
 0xc11   : > { %v2282_v3 = vpop.permute.xlu1 %2281 }
 0xcd4   : > { %v2239_v19 = vpop.f32.mrb[8].mxu0 }
 0xcd5   : > { %v2240_v20 = vadd.f32 %v2239_v19, %v2093_v18  ;;  %v2241_v21 = vpop.f32.mrb[9].mxu0 }
 0xcd6   : > { %v2242_v23 = vadd.f32 %v2241_v21, %v2093_v18  ;;  %v2243_v24 = vpop.f32.mrb[10].mxu0 }
 0xcd7   : > { %v2248_v25 = vmul.f32 0.05, %v2240_v20  ;;  %v2244_v26 = vadd.f32 %v2243_v24, %v2098_v22  ;;  %v2245_v27 = vpop.f32.mrb[11].mxu0 }
 0xcd8   : > { %v2249_v60 = vmul.f32 0.05, %v2242_v23  ;;  %v2246_v28 = vadd.f32 %v2245_v27, %v2098_v22 }
 0xcd9   : > { %v2252_v30 = vmax.f32 %v2240_v20, %v2248_v25  ;;  %v2250_v55 = vmul.f32 0.05, %v2244_v26 }
 0xcda   : > { %v2253_v31 = vmax.f32 %v2242_v23, %v2249_v60  ;;  %v2251_v34 = vmul.f32 0.05, %v2246_v28 }
 0xcdb   : > { %v2254_v53 = vmax.f32 %v2244_v26, %v2250_v55  ;;  %v2256_v38 = vadd.f32 %v2252_v30, %v3620_v32 }
 0xcdc   : > { %v2255_v51 = vmax.f32 %v2246_v28, %v2251_v34  ;;  %v2257_v58 = vadd.f32 %v2253_v31, %v3633_v43 }
 0xcdd   : > { %v2258_v57 = vadd.f32 %v2254_v53, %v3623_v35 }
 0xcde   : > { %v2259_v45 = vadd.f32 %v2255_v51, %v3630_v40 }
 0xcdf   : > { %v2260_v47 = vpack.c.bf16 %v2258_v57, %v2256_v38 }
 0xce0   : > { %v2261_v49 = vpack.c.bf16 %v2259_v45, %v2257_v58 }
 0xce2   : > { %2297 = vmatprep.subr.bf16.mxu0 %v2261_v49 }
 0xce3   : > { %2298 = vmatpush1.bf16.msra.mxu0 %v2260_v47 }
 0xce6   : > { %2816 = vmatmul.mubr.msk.bf16.vlgmr.msra.gmra.mrb[12].mxu0 %vm2289_vm8, %v2879_v50  ;;  %vm4200_vm8 = vcmask 900096  }
 0xdb9   : > { %v2327_v63 = vpop.f32.mrb[12].mxu0 }
 0xdba   : > { %v2328_v1 = vadd.f32 %v2327_v63, %v2277_v52  ;;  %v2329_v32 = vpop.f32.mrb[13].mxu0 }
 0xdbb   : > { %v2330_v35 = vadd.f32 %v2329_v32, %v2277_v52  ;;  %v2331_v4 = vpop.f32.mrb[14].mxu0 }
 0xdbc   : > { %v2336_v43 = vmul.f32 0.05, %v2328_v1  ;;  %v2332_v5 = vadd.f32 %v2331_v4, %v2282_v3  ;;  %v2333_v40 = vpop.f32.mrb[15].mxu0 }
 0xdbd   : > { %v2337_v6 = vmul.f32 0.05, %v2330_v35  ;;  %v2334_v7 = vadd.f32 %v2333_v40, %v2282_v3 }
 0xdbe   : > { %v2340_v8 = vmax.f32 %v2328_v1, %v2336_v43  ;;  %v2338_v9 = vmul.f32 0.05, %v2332_v5 }
 0xdbf   : > { %v2341_v10 = vmax.f32 %v2330_v35, %v2337_v6  ;;  %v2339_v11 = vmul.f32 0.05, %v2334_v7  ;;  %v2880_v6 = vld [vmem:[%s4111_s7 + $0x4] ss:$8 sps:$4 sm:$0xff]  }
 0xdc0   : > { %v2342_v12 = vmax.f32 %v2332_v5, %v2338_v9  ;;  %v2348_v14 = vadd.f32 %v2340_v8, %v3005_v36  ;;  %2823 = vmatprep.mubr.msk.bf16.mxu0 %vm779_vm2, %v2880_v6 }
 0xdc1   : > { %v2343_v13 = vmax.f32 %v2334_v7, %v2339_v11  ;;  %v2349_v16 = vadd.f32 %v2341_v10, %v3020_v42 }
 0xdc2   : > { %v2350_v15 = vadd.f32 %v2342_v12, %v3007_v37  ;;  %v2362_v12 = vld [vmem:[%s4112_s8] sm:$0xff] }
 0xdc3   : > { %v2351_v17 = vadd.f32 %v2343_v13, %v3017_v41  ;;  %v2364_v13 = vld [vmem:[%s4112_s8 + $0x10] sm:$0xff] }
 0xdc4   : > { %v2352_v18 = vpack.c.bf16 %v2350_v15, %v2348_v14  ;;  %v2363_v14 = vld [vmem:[%s4112_s8 + $0x8] sm:$0xff]  ;;  %v2366_v15 = vld [vmem:[%s4112_s8 + $0x20] sm:$0xff] }
 0xdc5   : > { %v2353_v19 = vpack.c.bf16 %v2351_v17, %v2349_v16  ;;  %v2365_v16 = vld [vmem:[%s4112_s8 + $0x18] sm:$0xff]  ;;  %v2367_v17 = vld [vmem:[%s4112_s8 + $0x28] sm:$0xff] }
 0xdc6   : > { %2425 = vrot.lane.b32.xlu1 %v2352_v18, %s2904_s26  ;;  %2397 = vrot.lane.b32.xlu0 %v2352_v18, %s2900_s22  ;;  %v2378_v20 = vsel %vm535_vm11, %v2352_v18, 0  ;;  %v2375_v36 = vsel %vm523_vm12, %v2352_v18, 0  ;;  %v2383_v41 = vsel %vm549_vm14, %v2352_v18, 0  ;;  %v2386_v39 = vsel %vm561_vm0, %v2352_v18, 0 }
 0xdc7   : > { %v2376_v37 = vsel %vm524_vm13, %v2353_v19, 0  ;;  %v2379_v42 = vsel %vm536_vm15, %v2353_v19, 0  ;;  %v2384_v29 = vsel %vm550_vm3, %v2353_v19, 0  ;;  %vm4189_vm11 = vcmp.ne.s16.totalorder %v3073_v56, 0  ;;  %v2396_v56 = vpop.permute.xlu0 %2395 }
 0xdc8   : > { %v2387_v33 = vsel %vm4189_vm11, %v2353_v19, 0  ;;  %v2389_v44 = vsel %vm573_vm6, %v2352_v18, 0  ;;  %vm4190_vm12 = vcmp.ne.s16.totalorder %v3090_v61, 0  ;;  %vm4191_vm13 = vcmp.ne.s16.totalorder %v3092_v62, 0  ;;  %v2407_v61 = vpop.permute.xlu1 %2406  ;;  %vm4201_vm11 = vmmov %vm4200_vm8 }
 0xdc9   : > { %v2390_v46 = vsel %vm4190_vm12, %v2353_v19, 0  ;;  %v2373_v48 = vsel %vm4191_vm13, %v2353_v19, 0  ;;  %vm4192_vm14 = vcmp.ne.s16.totalorder %v3103_v2, 0  ;;  %vm4193_vm15 = vcmask 1039360  }
 0xdca   : > { %2399 = vrot.lane.b32.xlu1 %v2353_v19, %s2900_s22  ;;  %2419 = vrot.lane.b32.xlu0 %v2378_v20, %s2906_s28  ;;  %v2372_v54 = vsel %vm4192_vm14, %v2352_v18, 0  ;;  %vm4194_vm0 = vcmask 1031168   ;;  %vm4195_vm3 = vmmov %vm4193_vm15  ;;  %vm4196_vm6 = vcmask 916480   ;;  %vm4202_vm12 = vcmask 785408  }
 0xdcb   : > { %v2418_v59 = vpop.permute.xlu0 %2417  ;;  %vm4198_vm9 = vmmov %vm4194_vm0 }
 0xdcc   : > { %vm4199_vm4 = vmmov %vm4196_vm6 }
 0xdcd   : > { %vm4203_vm13 = vmmov %vm4202_vm12 }
 0xdce   : > { %2427 = vrot.lane.b32.xlu0 %v2353_v19, %s2904_s26  ;;  %2408 = vrot.lane.b32.xlu1 %v2375_v36, %s2905_s27 }
 0xdd2   : > { %2410 = vrot.lane.b32.xlu0 %v2376_v37, %s2905_s27  ;;  %2433 = vrot.lane.b32.xlu1 %v2383_v41, %s2907_s29 }
 0xdd6   : > { %2444 = vrot.lane.b32.xlu0 %v2386_v39, %s2908_s11  ;;  %2421 = vrot.lane.b32.xlu1 %v2379_v42, %s2906_s28 }
 0xdda   : > { %2448 = vrot.lane.b32.xlu0 %v2897_v0, %s2908_s11  ;;  %2437 = vrot.lane.b32.xlu1 %v2897_v0, %s2907_s29 }
 0xdde   : > { %2435 = vrot.lane.b32.xlu0 %v2384_v29, %s2907_s29  ;;  %2455 = vrot.lane.b32.xlu1 %v2352_v18, %s2909_s12 }
 0xde2   : > { %2457 = vrot.lane.b32.xlu0 %v2353_v19, %s2909_s12  ;;  %2446 = vrot.lane.b32.xlu1 %v2387_v33, %s2908_s11  ;;  %s2829_s11 = smul.u32 96, %s4205_s10 }
 0xde4   : > { %s4087_s18 = scalar_lea.vmem %s4113_s9, %s2829_s11 }
 0xde6   : > { %2466 = vrot.lane.b32.xlu0 %v2389_v44, %s2910_s13  ;;  %2459 = vrot.lane.b32.xlu1 %v2897_v0, %s2909_s12 }
 0xdea   : > { %2470 = vrot.lane.b32.xlu0 %v2897_v0, %s2910_s13  ;;  %2468 = vrot.lane.b32.xlu1 %v2390_v46, %s2910_s13 }
 0xdee   : > { %2538 = vrot.lane.b32.xlu0 %v2373_v48, %s2903_s25  ;;  %2536 = vrot.lane.b32.xlu1 %v2372_v54, %s2903_s25 }
 0xdf2   : > { %2534 = vrot.lane.b32.xlu1 %v2897_v0, %s2903_s25 }
 0xe38   : > { %v2398_v21 = vpop.permute.xlu0 %2397  ;;  %v2426_v22 = vpop.permute.xlu1 %2425 }
 0xe39   : > { %v2401_v23 = vsel %vm4193_vm15, %v2396_v56, %v2398_v21 }
 0xe3a   : > { %2540 = vrot.lane.b32.xlu0 %v2401_v23, %s2903_s25 }
 0xe3c   : > { %v2420_v62 = vpop.permute.xlu0 %2419  ;;  %v2400_v24 = vpop.permute.xlu1 %2399 }
 0xe3d   : > { %2544 = vrot.lane.b32.xlu1 %v2400_v24, %s2903_s25  ;;  %v2402_v0 = vsel %vm4195_vm3, %v2398_v21, %v2400_v24  ;;  %v2423_v55 = vsel %vm4196_vm6, %v2418_v59, %v2420_v62 }
 0xe40   : > { %v2428_v2 = vpop.permute.xlu0 %2427  ;;  %v2409_v25 = vpop.permute.xlu1 %2408 }
 0xe41   : > { %v2412_v26 = vsel %vm4194_vm0, %v2407_v61, %v2409_v25  ;;  %2562 = vrot.lane.b32.xlu0 %v2428_v2, %s2903_s25  ;;  %v2429_v31 = vsel %vm4197_vm10, %v2426_v22, %v2428_v2 }
 0xe42   : > { %2546 = vrot.lane.b32.xlu1 %v2412_v26, %s2903_s25 }
 0xe44   : > { %v2411_v27 = vpop.permute.xlu0 %2410  ;;  %v2434_v60 = vpop.permute.xlu1 %2433 }
 0xe45   : > { %2542 = vrot.lane.b32.xlu0 %v2402_v0, %s2903_s25  ;;  %v2413_v51 = vsel %vm4198_vm9, %v2409_v25, %v2411_v27 }
 0xe48   : > { %v2445_v28 = vpop.permute.xlu0 %2444  ;;  %v2422_v30 = vpop.permute.xlu1 %2421 }
 0xe49   : > { %2550 = vrot.lane.b32.xlu0 %v2411_v27, %s2903_s25  ;;  %2556 = vrot.lane.b32.xlu1 %v2422_v30, %s2903_s25  ;;  %v2424_v58 = vsel %vm4199_vm4, %v2420_v62, %v2422_v30 }
 0xe4c   : > { %v2449_v34 = vpop.permute.xlu0 %2448  ;;  %v2438_v53 = vpop.permute.xlu1 %2437 }
 0xe4d   : > { %2552 = vrot.lane.b32.xlu0 %v2423_v55, %s2903_s25  ;;  %2560 = vrot.lane.b32.xlu1 %v2429_v31, %s2903_s25 }
 0xe50   : > { %v2436_v38 = vpop.permute.xlu0 %2435  ;;  %v2456_v57 = vpop.permute.xlu1 %2455 }
 0xe51   : > { %2564 = vrot.lane.b32.xlu0 %v2434_v60, %s2903_s25  ;;  %2548 = vrot.lane.b32.xlu1 %v2413_v51, %s2903_s25  ;;  %v2439_v63 = vsel %vm4200_vm8, %v2434_v60, %v2436_v38  ;;  %v2440_v1 = vsel %vm4201_vm11, %v2436_v38, %v2438_v53 }
 0xe54   : > { %v2458_v45 = vpop.permute.xlu0 %2457  ;;  %v2447_v47 = vpop.permute.xlu1 %2446 }
 0xe55   : > { %2554 = vrot.lane.b32.xlu0 %v2424_v58, %s2903_s25  ;;  %2558 = vrot.lane.b32.xlu1 %v2426_v22, %s2903_s25  ;;  %v2461_v49 = vsel %vm652_vm7, %v2456_v57, %v2458_v45  ;;  %v2450_v35 = vsel %vm4202_vm12, %v2445_v28, %v2447_v47  ;;  %v2451_v4 = vsel %vm4203_vm13, %v2447_v47, %v2449_v34 }
 0xe58   : > { %v2467_v50 = vpop.permute.xlu0 %2466  ;;  %v2460_v52 = vpop.permute.xlu1 %2459 }
 0xe59   : > { %2570 = vrot.lane.b32.xlu1 %v2445_v28, %s2903_s25  ;;  %2578 = vrot.lane.b32.xlu0 %v2461_v49, %s2903_s25  ;;  %v2462_v7 = vsel %vm652_vm7, %v2458_v45, %v2460_v52  ;;  %v2882_v49 = vld [vmem:[%s4111_s7] ss:$8 sps:$4 sm:$0xff]   ;;  %v2885_v52 = vld [vmem:[%s4111_s7 + $0x10] ss:$8 sps:$4 sm:$0xff]  }
 0xe5c   : > { %v2471_v32 = vpop.permute.xlu0 %2470  ;;  %v2469_v3 = vpop.permute.xlu1 %2468 }
 0xe5d   : > { %2568 = vrot.lane.b32.xlu1 %v2440_v1, %s2903_s25  ;;  %2566 = vrot.lane.b32.xlu0 %v2439_v63, %s2903_s25  ;;  %v2472_v10 = vsel %vm664_vm1, %v2467_v50, %v2469_v3  ;;  %v2473_v11 = vsel %vm664_vm1, %v2469_v3, %v2471_v32  ;;  %v2886_v63 = vld [vmem:[%s4111_s7 + $0x24] ss:$8 sps:$4 sm:$0xff]   ;;  %v2888_v1 = vld [vmem:[%s4111_s7 + $0x20] ss:$8 sps:$4 sm:$0xff]  }
 0xe60   : > { %v2539_v43 = vpop.permute.xlu0 %2538  ;;  %v2537_v5 = vpop.permute.xlu1 %2536 }
 0xe61   : > { %2574 = vrot.lane.b32.xlu0 %v2451_v4, %s2903_s25  ;;  %2572 = vrot.lane.b32.xlu1 %v2450_v35, %s2903_s25  ;;  %v2589_v40 = vsel %vm571_vm5, %v2537_v5, %v2539_v43 }
 0xe62   : > { %2633 = vmatprep.subr.bf16.mxu0 %v2589_v40 }
 0xe64   : > { %v2535_v8 = vpop.permute.xlu1 %2534 }
 0xe65   : > { %v2588_v9 = vsel %vm571_vm5, %v2535_v8, %v2537_v5  ;;  %2576 = vrot.lane.b32.xlu0 %v2456_v57, %s2903_s25  ;;  %2580 = vrot.lane.b32.xlu1 %v2462_v7, %s2903_s25 }
 0xe66   : > { %2634 = vmatpush1.bf16.msra.mxu0 %v2588_v9 }
 0xe69   : > { %2586 = vrot.lane.b32.xlu0 %v2473_v11, %s2903_s25  ;;  %2584 = vrot.lane.b32.xlu1 %v2472_v10, %s2903_s25 }
 0xe6d   : > { %2476 = vperm.xlu0 %2852, %v2362_v12   ;;  %2582 = vrot.lane.b32.xlu1 %v2467_v50, %s2903_s25  ;;  %v2883_v50 = vld [vmem:[%s4111_s7 + $0x14] ss:$8 sps:$4 sm:$0xff]  }
 0xe71   : > { %2486 = vperm.xlu0 %2852, %v2364_v13   ;;  %2481 = vperm.xlu1 %2853, %v2363_v14  }
 0xe75   : > { %2496 = vperm.xlu0 %2852, %v2366_v15   ;;  %2491 = vperm.xlu1 %2853, %v2365_v16  }
 0xe79   : > { %2501 = vperm.xlu1 %2853, %v2367_v17  }
 0xeac   : > { %v2541_v18 = vpop.permute.xlu0 %2540 }
 0xeaf   : > { %v2545_v19 = vpop.permute.xlu1 %2544 }
 0xeb3   : > { %v2563_v20 = vpop.permute.xlu0 %2562 }
 0xeb4   : > { %v2547_v36 = vpop.permute.xlu1 %2546 }
 0xeb7   : > { %v2543_v37 = vpop.permute.xlu0 %2542 }
 0xeb8   : > { %v2590_v41 = vsel %vm571_vm5, %v2541_v18, %v2543_v37  ;;  %v2591_v39 = vsel %vm571_vm5, %v2543_v37, %v2545_v19 }
 0xeb9   : > { %2635 = vmatprep.subr.bf16.mxu0 %v2591_v39 }
 0xeba   : > { %2636 = vmatpush1.bf16.msra.mxu0 %v2590_v41 }
 0xebb   : > { %v2551_v42 = vpop.permute.xlu0 %2550  ;;  %v2557_v29 = vpop.permute.xlu1 %2556 }
 0xebf   : > { %v2553_v33 = vpop.permute.xlu0 %2552  ;;  %v2561_v44 = vpop.permute.xlu1 %2560 }
 0xec0   : > { %v2597_v23 = vsel %vm571_vm5, %v2561_v44, %v2563_v20 }
 0xec3   : > { %v2565_v46 = vpop.permute.xlu0 %2564  ;;  %v2549_v48 = vpop.permute.xlu1 %2548 }
 0xec4   : > { %v2592_v54 = vsel %vm571_vm5, %v2547_v36, %v2549_v48  ;;  %v2593_v56 = vsel %vm571_vm5, %v2549_v48, %v2551_v42 }
 0xec5   : > { %2637 = vmatprep.subr.bf16.mxu0 %v2593_v56 }
 0xec6   : > { %2638 = vmatpush1.bf16.msra.mxu0 %v2592_v54 }
 0xec7   : > { %v2555_v59 = vpop.permute.xlu0 %2554  ;;  %v2559_v61 = vpop.permute.xlu1 %2558 }
 0xec8   : > { %v2594_v21 = vsel %vm571_vm5, %v2553_v33, %v2555_v59  ;;  %v2595_v22 = vsel %vm571_vm5, %v2555_v59, %v2557_v29  ;;  %v2596_v2 = vsel %vm571_vm5, %v2559_v61, %v2561_v44 }
 0xec9   : > { %2639 = vmatprep.subr.bf16.mxu0 %v2595_v22 }
 0xeca   : > { %2640 = vmatpush1.bf16.msra.mxu0 %v2594_v21 }
 0xecb   : > { %v2579_v62 = vpop.permute.xlu0 %2578  ;;  %2641 = vmatprep.subr.bf16.mxu0 %v2597_v23  ;;  %v2571_v24 = vpop.permute.xlu1 %2570 }
 0xece   : > { %2642 = vmatpush1.bf16.msra.mxu0 %v2596_v2 }
 0xecf   : > { %v2567_v25 = vpop.permute.xlu0 %2566  ;;  %v2569_v26 = vpop.permute.xlu1 %2568 }
 0xed0   : > { %v2598_v0 = vsel %vm571_vm5, %v2565_v46, %v2567_v25  ;;  %v2599_v27 = vsel %vm571_vm5, %v2567_v25, %v2569_v26 }
 0xed1   : > { %2643 = vmatprep.subr.bf16.mxu0 %v2599_v27 }
 0xed2   : > { %2644 = vmatpush1.bf16.msra.mxu0 %v2598_v0 }
 0xed3   : > { %v2575_v60 = vpop.permute.xlu0 %2574  ;;  %v2573_v28 = vpop.permute.xlu1 %2572 }
 0xed4   : > { %v2600_v30 = vsel %vm571_vm5, %v2571_v24, %v2573_v28  ;;  %v2601_v55 = vsel %vm571_vm5, %v2573_v28, %v2575_v60 }
 0xed5   : > { %2645 = vmatprep.subr.bf16.mxu0 %v2601_v55 }
 0xed6   : > { %2646 = vmatpush1.bf16.msra.mxu0 %v2600_v30 }
 0xed7   : > { %v2577_v31 = vpop.permute.xlu0 %2576  ;;  %v2581_v34 = vpop.permute.xlu1 %2580 }
 0xed8   : > { %v2602_v53 = vsel %vm571_vm5, %v2577_v31, %v2579_v62  ;;  %v2603_v51 = vsel %vm571_vm5, %v2579_v62, %v2581_v34 }
 0xed9   : > { %2647 = vmatprep.subr.bf16.mxu0 %v2603_v51 }
 0xeda   : > { %2648 = vmatpush1.bf16.msra.mxu0 %v2602_v53 }
 0xedb   : > { %v2587_v38 = vpop.permute.xlu0 %2586  ;;  %v2585_v57 = vpop.permute.xlu1 %2584 }
 0xedc   : > { %v2605_v58 = vsel %vm571_vm5, %v2585_v57, %v2587_v38 }
 0xedd   : > { %2649 = vmatprep.subr.bf16.mxu0 %v2605_v58 }
 0xedf   : > { %v2583_v45 = vpop.permute.xlu1 %2582 }
 0xee0   : > { %v2604_v47 = vsel %vm571_vm5, %v2583_v45, %v2585_v57 }
 0xee1   : > { %2650 = vmatpush1.bf16.msra.mxu0 %v2604_v47 }
 0xee4   : > { %2666 = vmatmul.mubr.bf16.vlgmr.msra.gmra.mrb[16].mxu0 %v2882_v49 }
 0xee5   : > { %2824 = vmatprep.mubr.msk.bf16.mxu0 %vm779_vm2, %v2883_v50 }
 0xeec   : > { %2676 = vmatmul.mubr.bf16.gmra.mrb[20].mxu0 %v2885_v52  ;;  %v2477_v32 = vpop.permute.xlu0 %2476 }
 0xeed   : > { %2825 = vmatprep.mubr.msk.bf16.mxu0 %vm779_vm2, %v2886_v63 }
 0xef0   : > { %v2482_v43 = vpop.permute.xlu1 %2481  ;;  %v2487_v9 = vpop.permute.xlu0 %2486 }
 0xef4   : > { %2686 = vmatmul.mubr.bf16.gmra.mrb[24].mxu0 %v2888_v1  ;;  %v2492_v13 = vpop.permute.xlu1 %2491  ;;  %v2497_v19 = vpop.permute.xlu0 %2496 }
 0xef8   : > { %v2502_v41 = vpop.permute.xlu1 %2501 }
 0xfb7   : > { %v2667_v3 = vpop.f32.mrb[16].mxu0 }
 0xfb8   : > { %v2668_v35 = vadd.f32 %v2667_v3, %v2477_v32  ;;  %v2669_v4 = vpop.f32.mrb[17].mxu0 }
 0xfb9   : > { %v2670_v5 = vadd.f32 %v2669_v4, %v2477_v32  ;;  %v2671_v40 = vpop.f32.mrb[18].mxu0 }
 0xfba   : > { %2696 = vst [vmem:[%s4087_s18] sm:$0xff] %v2668_v35  ;;  %v2672_v6 = vadd.f32 %v2671_v40, %v2482_v43  ;;  %v2673_v7 = vpop.f32.mrb[19].mxu0 }
 0xfbb   : > { %2697 = vst [vmem:[%s4087_s18 + $0x8] sm:$0xff] %v2670_v5  ;;  %v2674_v8 = vadd.f32 %v2673_v7, %v2482_v43 }
 0xfbc   : > { %2698 = vst [vmem:[%s4087_s18 + $0x10] sm:$0xff] %v2672_v6 }
 0xfbd   : > { %2699 = vst [vmem:[%s4087_s18 + $0x18] sm:$0xff] %v2674_v8 }
 0xfbf   : > { %v2677_v10 = vpop.f32.mrb[20].mxu0 }
 0xfc0   : > { %v2678_v11 = vadd.f32 %v2677_v10, %v2487_v9  ;;  %v2679_v12 = vpop.f32.mrb[21].mxu0 }
 0xfc1   : > { %v2680_v14 = vadd.f32 %v2679_v12, %v2487_v9  ;;  %v2681_v15 = vpop.f32.mrb[22].mxu0 }
 0xfc2   : > { %2700 = vst [vmem:[%s4087_s18 + $0x20] sm:$0xff] %v2678_v11  ;;  %v2682_v16 = vadd.f32 %v2681_v15, %v2492_v13  ;;  %v2683_v17 = vpop.f32.mrb[23].mxu0 }
 0xfc3   : > { %2701 = vst [vmem:[%s4087_s18 + $0x28] sm:$0xff] %v2680_v14  ;;  %v2684_v18 = vadd.f32 %v2683_v17, %v2492_v13 }
 0xfc4   : > { %2702 = vst [vmem:[%s4087_s18 + $0x30] sm:$0xff] %v2682_v16 }
 0xfc5   : > { %2703 = vst [vmem:[%s4087_s18 + $0x38] sm:$0xff] %v2684_v18 }
 0xfc7   : > { %v2687_v20 = vpop.f32.mrb[24].mxu0 }
 0xfc8   : > { %v2688_v36 = vadd.f32 %v2687_v20, %v2497_v19  ;;  %v2689_v37 = vpop.f32.mrb[25].mxu0 }
 0xfc9   : > { %v2690_v39 = vadd.f32 %v2689_v37, %v2497_v19  ;;  %v2691_v42 = vpop.f32.mrb[26].mxu0 }
 0xfca   : > { %2704 = vst [vmem:[%s4087_s18 + $0x40] sm:$0xff] %v2688_v36  ;;  %v2692_v29 = vadd.f32 %v2691_v42, %v2502_v41  ;;  %v2693_v33 = vpop.f32.mrb[27].mxu0 }
 0xfcb   : > { %2705 = vst [vmem:[%s4087_s18 + $0x48] sm:$0xff] %v2690_v39  ;;  %v2694_v44 = vadd.f32 %v2693_v33, %v2502_v41 }
 0xfcc   : > { %2706 = vst [vmem:[%s4087_s18 + $0x50] sm:$0xff] %v2692_v29 }
 0xfcd   : > { %2707 = vst [vmem:[%s4087_s18 + $0x58] sm:$0xff] %v2694_v44 }
 0xfce PF: > { %s19_s30 = sadd.s32 1, %s2895_s30  }
 0xfcf   : > { %p16_p4 = scmp.ge.s32.totalorder %s19_s30, 4  }
 0xfd1   :  { %18 = sbr.rel (!%p16_p4) target bundleno = 1 (0x1), region = 96 }

</bundles_post_ra>
